<compile_context>
chip_gen: v7x
topology: tpu7x:2x2x1
jax: 0.10.0
libtpu: 0.0.40
codegen_flags: <defaults>
</compile_context>

<pallas_src>
import functools

import jax
import jax.numpy as jnp
from jax.experimental import pallas as pl
from jax.experimental.pallas import tpu as pltpu


def _part_head_kernel(x_ref, w1_ref, scale_ref, bias_ref, w2_ref, fcb_ref, o_ref):
    # x_ref:     (B, pps, S, C) f32   this step's pool-bin rows (channels-last, S = Hp*W)
    # w1_ref:    (pps, C, D)    bf16  1x1-conv weights (transposed)
    # scale_ref: (pps, 1, D)    f32   folded BatchNorm scale  (gamma / sqrt(var + eps))
    # bias_ref:  (pps, 1, D)    f32   folded BatchNorm bias   (beta - mean * scale)
    # w2_ref:    (pps, D, NC)   bf16  fc weights (transposed)
    # fcb_ref:   (pps, 1, NC)   f32   fc bias
    # o_ref:     (pps, B, NC)   f32   logits for this step's parts
    x = x_ref[...].astype(jnp.float32)          # (B, pps, S, C)
    pps = w1_ref.shape[0]
    for j in range(pps):                        # static unroll over parts in this step
        # AdaptiveAvgPool2d((num_part, 1)) restricted to this part's bin: mean over S.
        pooled = jnp.mean(x[:, j], axis=1)      # (B, C), f32 pooling for accuracy
        # Dropout(p=0.5) is identity in eval mode.
        # 1x1 conv == dense C -> D matmul: bf16 MXU inputs, f32 accumulate.
        h = jnp.dot(pooled.astype(jnp.bfloat16), w1_ref[j],
                    preferred_element_type=jnp.float32)              # (B, D)
        # eval-mode BatchNorm folded into scale/bias, then ReLU.
        h = jnp.maximum(h * scale_ref[j] + bias_ref[j], 0.0)
        # per-part fc: D -> num_class, bf16 MXU inputs, f32 accumulate, + bias.
        logits = jnp.dot(h.astype(jnp.bfloat16), w2_ref[j],
                         preferred_element_type=jnp.float32)          # (B, NC)
        o_ref[j] = (logits + fcb_ref[j]).astype(o_ref.dtype)


def prepare_head_params(w1, bn_scale, bn_bias, w2t, fc_bias):
    """One-time arg prep: cast the big weights to bf16 (they are ~97% of the kernel's
    HBM bytes) and reshape the small per-part vectors to (P, 1, *) for clean tiling."""
    P, D = bn_scale.shape
    NC = fc_bias.shape[-1]
    return (w1.astype(jnp.bfloat16),
            bn_scale.reshape(P, 1, D).astype(jnp.float32),
            bn_bias.reshape(P, 1, D).astype(jnp.float32),
            w2t.astype(jnp.bfloat16),
            fc_bias.reshape(P, 1, NC).astype(jnp.float32))


def part_based_attention_head(feat, w1, bn_scale, bn_bias, w2t, fc_bias, *,
                              num_part, num_class, parts_per_step=None,
                              channels_last=False):
    """feat: (B, C, H, W) backbone feature map (PyTorch NCHW), or (B, H, W, C) if
    channels_last=True (skips the HBM transpose). Weights as from prepare_head_params."""
    if channels_last:
        B, H, W, C = feat.shape
    else:
        B, C, H, W = feat.shape
    P, NC = num_part, num_class
    D = w1.shape[-1]
    # TODO(synk): PyTorch AdaptiveAvgPool2d((P,1)) also supports H % P != 0 (uneven
    # bins); equal bins are assumed here.
    assert H % P == 0, "equal adaptive-pool bins assumed (H divisible by num_part)"
    Hp = H // P
    S = Hp * W

    if parts_per_step is None:
        # 2 parts/step: minimal grid overhead on single-TC v5e/v6e while keeping >=2
        # parallel steps for v7x's two TensorCores (for P=4 -> grid=(2,), split 1/1).
        parts_per_step = 2 if (P % 2 == 0 and P >= 2) else 1
    assert P % parts_per_step == 0
    pps = parts_per_step
    grid = (P // pps,)

    if channels_last:
        x = feat.reshape(B, P, S, C)            # pure bitcast, no HBM round trip
    else:
        # NCHW -> (B, P, S, C): channels-last, pool bins pre-flattened to one sublane-
        # friendly axis (no in-kernel reshape, no W<8 sublane padding).
        x = jnp.transpose(feat, (0, 2, 3, 1)).reshape(B, P, S, C)

    # No-ops if prepare_head_params was used; defensive otherwise.
    w1 = w1.astype(jnp.bfloat16)
    w2t = w2t.astype(jnp.bfloat16)
    scale = bn_scale.reshape(P, 1, D).astype(jnp.float32)
    bias = bn_bias.reshape(P, 1, D).astype(jnp.float32)
    fcb = fc_bias.reshape(P, 1, NC).astype(jnp.float32)

    out = pl.pallas_call(
        _part_head_kernel,
        out_shape=jax.ShapeDtypeStruct((P, B, NC), jnp.float32),
        grid_spec=pltpu.PrefetchScalarGridSpec(
            num_scalar_prefetch=0,
            grid=grid,
            in_specs=[
                pl.BlockSpec((B, pps, S, C), lambda g: (0, g, 0, 0)),
                pl.BlockSpec((pps, C, D),    lambda g: (g, 0, 0)),
                pl.BlockSpec((pps, 1, D),    lambda g: (g, 0, 0)),
                pl.BlockSpec((pps, 1, D),    lambda g: (g, 0, 0)),
                pl.BlockSpec((pps, D, NC),   lambda g: (g, 0, 0)),
                pl.BlockSpec((pps, 1, NC),   lambda g: (g, 0, 0)),
            ],
            out_specs=pl.BlockSpec((pps, B, NC), lambda g: (g, 0, 0)),
        ),
        compiler_params=pltpu.CompilerParams(
            dimension_semantics=("parallel",)),
    )(x, w1, scale, bias, w2t, fcb)

    # Match the PyTorch module: a list of num_part tensors of shape (B, num_class).
    return [out[i] for i in range(P)]


def _reference(feat_nchw, w1, bn_scale, bn_bias, w2t, fc_bias, num_part):
    """Pure-JAX reference mirroring the kernel numerics (bf16 matmul inputs, f32 acc)."""
    B, C, H, W = feat_nchw.shape
    P = num_part
    Hp = H // P
    x = jnp.transpose(feat_nchw, (0, 2, 3, 1)).reshape(B, P, Hp * W, C)
    pooled = jnp.mean(x, axis=2)                           # (B, P, C)
    outs = []
    for i in range(P):
        h = jnp.dot(pooled[:, i, :].astype(jnp.bfloat16),
                    w1[i].astype(jnp.bfloat16),
                    preferred_element_type=jnp.float32)
        h = jnp.maximum(h * bn_scale[i] + bn_bias[i], 0.0)
        logits = jnp.dot(h.astype(jnp.bfloat16),
                         w2t[i].astype(jnp.bfloat16),
                         preferred_element_type=jnp.float32) + fc_bias[i]
        outs.append(logits)
    return outs


if __name__ == "__main__":
    # Small-but-faithful shapes: backbone output has 2048 channels (hardcoded by the
    # module's local_convs), tiny batch / spatial extents.
    B, C, H, W = 2, 2048, 8, 4
    NUM_PART, NUM_CLASS, D = 4, 8, 256
    BN_EPS = 1e-5

    key = jax.random.PRNGKey(0)
    k_feat, k_w1, k_w2 = jax.random.split(key, 3)

    # Synthetic backbone feature map (what self.backbone(x) would emit), NCHW.
    feat = jax.random.normal(k_feat, (B, C, H, W), dtype=jnp.float32)

    # local_convs[i][0]: Conv2d(2048, 256, k=1, bias=False), kaiming_normal fan_out
    # (fan_out = 256). Stored transposed as (P, C, D).
    w1 = jax.random.normal(k_w1, (NUM_PART, C, D), dtype=jnp.float32) * jnp.sqrt(2.0 / D)

    # local_convs[i][1]: BatchNorm2d(256), gamma=1, beta=0, running stats (0, 1);
    # eval-mode BN folded into scale/bias.
    gamma = jnp.ones((NUM_PART, D), jnp.float32)
    beta = jnp.zeros((NUM_PART, D), jnp.float32)
    run_mean = jnp.zeros((NUM_PART, D), jnp.float32)
    run_var = jnp.ones((NUM_PART, D), jnp.float32)
    bn_scale = gamma / jnp.sqrt(run_var + BN_EPS)
    bn_bias = beta - run_mean * bn_scale

    # fcs[i]: Linear(256, num_class), weight ~ N(0, 0.001), bias = 0. Stored transposed.
    w2t = jax.random.normal(k_w2, (NUM_PART, D, NUM_CLASS), dtype=jnp.float32) * 1e-3
    fc_bias = jnp.zeros((NUM_PART, NUM_CLASS), jnp.float32)

    # One-time weight prep: bf16 weight streams + (P,1,*) per-part vectors.
    w1_p, scale_p, bias_p, w2_p, fcb_p = prepare_head_params(
        w1, bn_scale, bn_bias, w2t, fc_bias)

    run = jax.jit(functools.partial(part_based_attention_head,
                                    num_part=NUM_PART, num_class=NUM_CLASS))
    outs = run(feat, w1_p, scale_p, bias_p, w2_p, fcb_p)
    outs = [jax.block_until_ready(o) for o in outs]

    refs = _reference(feat, w1_p, bn_scale, bn_bias, w2_p, fc_bias, NUM_PART)
    for o, r in zip(outs, refs):
        assert o.shape == (B, NUM_CLASS)
        # bf16 weight/activation inputs (f32 accumulation) -> slightly looser tolerance.
        assert jnp.allclose(o, r, atol=1e-3, rtol=1e-2), "mismatch vs reference"

    print("KERNEL_OK")
</pallas_src>

<mosaic_0001>
module attributes {stable_mosaic.version = 11 : i64} {
  func.func @_part_head_kernel(%arg0: i32, %arg1: memref<2x2x8x2048xf32, #tpu.memory_space<vmem>>, %arg2: memref<2x2048x256xbf16, #tpu.memory_space<vmem>>, %arg3: memref<2x1x256xf32, #tpu.memory_space<vmem>>, %arg4: memref<2x1x256xf32, #tpu.memory_space<vmem>>, %arg5: memref<2x256x8xbf16, #tpu.memory_space<vmem>>, %arg6: memref<2x1x8xf32, #tpu.memory_space<vmem>>, %arg7: memref<2x2x8xf32, #tpu.memory_space<vmem>>) attributes {dimension_semantics = [#tpu.dimension_semantics<parallel>], iteration_bounds = array<i64: 2>, scalar_prefetch = 0 : i64, scratch_operands = 0 : i64, tpu.core_type = #tpu.core_type<tc>, window_params = [{transform_indices = @transform_0, window_bounds = array<i64: 2, 2, 8, 2048>}, {transform_indices = @transform_1, window_bounds = array<i64: 2, 2048, 256>}, {transform_indices = @transform_2, window_bounds = array<i64: 2, 1, 256>}, {transform_indices = @transform_3, window_bounds = array<i64: 2, 1, 256>}, {transform_indices = @transform_4, window_bounds = array<i64: 2, 256, 8>}, {transform_indices = @transform_5, window_bounds = array<i64: 2, 1, 8>}, {transform_indices = @transform_6, window_bounds = array<i64: 2, 2, 8>}]} {
    %c0 = arith.constant 0 : index
    %c0_0 = arith.constant 0 : index
    %c0_1 = arith.constant 0 : index
    %c0_2 = arith.constant 0 : index
    %0 = vector.load %arg1[%c0, %c0_0, %c0_1, %c0_2] : memref<2x2x8x2048xf32, #tpu.memory_space<vmem>>, vector<2x2x8x2048xf32>
    %1 = vector.extract_strided_slice %0 {offsets = [0, 0, 0, 0], sizes = [2, 1, 8, 2048], strides = [1, 1, 1, 1]} : vector<2x2x8x2048xf32> to vector<2x1x8x2048xf32>
    %2 = vector.shape_cast %1 : vector<2x1x8x2048xf32> to vector<2x8x2048xf32>
    %cst = arith.constant dense<0.000000e+00> : vector<2x2048xf32>
    %3 = vector.multi_reduction <add>, %2, %cst [1] : vector<2x8x2048xf32> to vector<2x2048xf32>
    %cst_3 = arith.constant 8.000000e+00 : f32
    %4 = vector.broadcast %cst_3 : f32 to vector<2x2048xf32>
    %5 = arith.divf %3, %4 : vector<2x2048xf32>
    %6 = arith.truncf %5 : vector<2x2048xf32> to vector<2x2048xbf16>
    %c0_4 = arith.constant 0 : index
    %c0_5 = arith.constant 0 : index
    %c0_6 = arith.constant 0 : index
    %7 = vector.load %arg2[%c0_4, %c0_5, %c0_6] : memref<2x2048x256xbf16, #tpu.memory_space<vmem>>, vector<1x2048x256xbf16>
    %8 = vector.shape_cast %7 : vector<1x2048x256xbf16> to vector<2048x256xbf16>
    %cst_7 = arith.constant dense<0.000000e+00> : vector<2x256xf32>
    %9 = tpu.matmul %6, %8, %cst_7 {dimension_numbers = #tpu.dot_dimension_numbers<[1], [0], [0], [1], [0, 0, 1, 1], [], []>} : vector<2x2048xbf16>, vector<2048x256xbf16>, vector<2x256xf32> -> vector<2x256xf32>
    %c0_8 = arith.constant 0 : index
    %c0_9 = arith.constant 0 : index
    %c0_10 = arith.constant 0 : index
    %10 = vector.load %arg3[%c0_8, %c0_9, %c0_10] : memref<2x1x256xf32, #tpu.memory_space<vmem>>, vector<1x1x256xf32>
    %11 = vector.shape_cast %10 : vector<1x1x256xf32> to vector<1x256xf32>
    %12 = vector.broadcast %11 : vector<1x256xf32> to vector<2x256xf32>
    %13 = arith.mulf %9, %12 : vector<2x256xf32>
    %c0_11 = arith.constant 0 : index
    %c0_12 = arith.constant 0 : index
    %c0_13 = arith.constant 0 : index
    %14 = vector.load %arg4[%c0_11, %c0_12, %c0_13] : memref<2x1x256xf32, #tpu.memory_space<vmem>>, vector<1x1x256xf32>
    %15 = vector.shape_cast %14 : vector<1x1x256xf32> to vector<1x256xf32>
    %16 = vector.broadcast %15 : vector<1x256xf32> to vector<2x256xf32>
    %17 = arith.addf %13, %16 : vector<2x256xf32>
    %cst_14 = arith.constant 0.000000e+00 : f32
    %18 = vector.broadcast %cst_14 : f32 to vector<2x256xf32>
    %19 = arith.maximumf %17, %18 : vector<2x256xf32>
    %20 = arith.truncf %19 : vector<2x256xf32> to vector<2x256xbf16>
    %c0_15 = arith.constant 0 : index
    %c0_16 = arith.constant 0 : index
    %c0_17 = arith.constant 0 : index
    %21 = vector.load %arg5[%c0_15, %c0_16, %c0_17] : memref<2x256x8xbf16, #tpu.memory_space<vmem>>, vector<1x256x8xbf16>
    %22 = vector.shape_cast %21 : vector<1x256x8xbf16> to vector<256x8xbf16>
    %cst_18 = arith.constant dense<0.000000e+00> : vector<2x8xf32>
    %23 = tpu.matmul %20, %22, %cst_18 {dimension_numbers = #tpu.dot_dimension_numbers<[1], [0], [0], [1], [0, 0, 1, 1], [], []>} : vector<2x256xbf16>, vector<256x8xbf16>, vector<2x8xf32> -> vector<2x8xf32>
    %c0_19 = arith.constant 0 : index
    %c0_20 = arith.constant 0 : index
    %c0_21 = arith.constant 0 : index
    %24 = vector.load %arg6[%c0_19, %c0_20, %c0_21] : memref<2x1x8xf32, #tpu.memory_space<vmem>>, vector<1x1x8xf32>
    %25 = vector.shape_cast %24 : vector<1x1x8xf32> to vector<1x8xf32>
    %26 = vector.broadcast %25 : vector<1x8xf32> to vector<2x8xf32>
    %27 = arith.addf %23, %26 : vector<2x8xf32>
    %c0_22 = arith.constant 0 : index
    %c0_23 = arith.constant 0 : index
    %c0_24 = arith.constant 0 : index
    %28 = vector.load %arg7[%c0_22, %c0_23, %c0_24] : memref<2x2x8xf32, #tpu.memory_space<vmem>>, vector<1x2x8xf32>
    %29 = vector.shape_cast %28 : vector<1x2x8xf32> to vector<2x8xf32>
    %30 = vector.shape_cast %27 : vector<2x8xf32> to vector<1x2x8xf32>
    tpu.vector_store %arg7[%c0_22, %c0_23, %c0_24], %30 {strides = array<i32>} : memref<2x2x8xf32, #tpu.memory_space<vmem>>, vector<1x2x8xf32>,
    %31 = vector.extract_strided_slice %0 {offsets = [0, 1, 0, 0], sizes = [2, 1, 8, 2048], strides = [1, 1, 1, 1]} : vector<2x2x8x2048xf32> to vector<2x1x8x2048xf32>
    %32 = vector.shape_cast %31 : vector<2x1x8x2048xf32> to vector<2x8x2048xf32>
    %cst_25 = arith.constant dense<0.000000e+00> : vector<2x2048xf32>
    %33 = vector.multi_reduction <add>, %32, %cst_25 [1] : vector<2x8x2048xf32> to vector<2x2048xf32>
    %cst_26 = arith.constant 8.000000e+00 : f32
    %34 = vector.broadcast %cst_26 : f32 to vector<2x2048xf32>
    %35 = arith.divf %33, %34 : vector<2x2048xf32>
    %36 = arith.truncf %35 : vector<2x2048xf32> to vector<2x2048xbf16>
    %c1 = arith.constant 1 : index
    %c0_27 = arith.constant 0 : index
    %c0_28 = arith.constant 0 : index
    %37 = vector.load %arg2[%c1, %c0_27, %c0_28] : memref<2x2048x256xbf16, #tpu.memory_space<vmem>>, vector<1x2048x256xbf16>
    %38 = vector.shape_cast %37 : vector<1x2048x256xbf16> to vector<2048x256xbf16>
    %cst_29 = arith.constant dense<0.000000e+00> : vector<2x256xf32>
    %39 = tpu.matmul %36, %38, %cst_29 {dimension_numbers = #tpu.dot_dimension_numbers<[1], [0], [0], [1], [0, 0, 1, 1], [], []>} : vector<2x2048xbf16>, vector<2048x256xbf16>, vector<2x256xf32> -> vector<2x256xf32>
    %c1_30 = arith.constant 1 : index
    %c0_31 = arith.constant 0 : index
    %c0_32 = arith.constant 0 : index
    %40 = vector.load %arg3[%c1_30, %c0_31, %c0_32] : memref<2x1x256xf32, #tpu.memory_space<vmem>>, vector<1x1x256xf32>
    %41 = vector.shape_cast %40 : vector<1x1x256xf32> to vector<1x256xf32>
    %42 = vector.broadcast %41 : vector<1x256xf32> to vector<2x256xf32>
    %43 = arith.mulf %39, %42 : vector<2x256xf32>
    %c1_33 = arith.constant 1 : index
    %c0_34 = arith.constant 0 : index
    %c0_35 = arith.constant 0 : index
    %44 = vector.load %arg4[%c1_33, %c0_34, %c0_35] : memref<2x1x256xf32, #tpu.memory_space<vmem>>, vector<1x1x256xf32>
    %45 = vector.shape_cast %44 : vector<1x1x256xf32> to vector<1x256xf32>
    %46 = vector.broadcast %45 : vector<1x256xf32> to vector<2x256xf32>
    %47 = arith.addf %43, %46 : vector<2x256xf32>
    %cst_36 = arith.constant 0.000000e+00 : f32
    %48 = vector.broadcast %cst_36 : f32 to vector<2x256xf32>
    %49 = arith.maximumf %47, %48 : vector<2x256xf32>
    %50 = arith.truncf %49 : vector<2x256xf32> to vector<2x256xbf16>
    %c1_37 = arith.constant 1 : index
    %c0_38 = arith.constant 0 : index
    %c0_39 = arith.constant 0 : index
    %51 = vector.load %arg5[%c1_37, %c0_38, %c0_39] : memref<2x256x8xbf16, #tpu.memory_space<vmem>>, vector<1x256x8xbf16>
    %52 = vector.shape_cast %51 : vector<1x256x8xbf16> to vector<256x8xbf16>
    %cst_40 = arith.constant dense<0.000000e+00> : vector<2x8xf32>
    %53 = tpu.matmul %50, %52, %cst_40 {dimension_numbers = #tpu.dot_dimension_numbers<[1], [0], [0], [1], [0, 0, 1, 1], [], []>} : vector<2x256xbf16>, vector<256x8xbf16>, vector<2x8xf32> -> vector<2x8xf32>
    %c1_41 = arith.constant 1 : index
    %c0_42 = arith.constant 0 : index
    %c0_43 = arith.constant 0 : index
    %54 = vector.load %arg6[%c1_41, %c0_42, %c0_43] : memref<2x1x8xf32, #tpu.memory_space<vmem>>, vector<1x1x8xf32>
    %55 = vector.shape_cast %54 : vector<1x1x8xf32> to vector<1x8xf32>
    %56 = vector.broadcast %55 : vector<1x8xf32> to vector<2x8xf32>
    %57 = arith.addf %53, %56 : vector<2x8xf32>
    %c1_44 = arith.constant 1 : index
    %c0_45 = arith.constant 0 : index
    %c0_46 = arith.constant 0 : index
    %58 = vector.load %arg7[%c1_44, %c0_45, %c0_46] : memref<2x2x8xf32, #tpu.memory_space<vmem>>, vector<1x2x8xf32>
    %59 = vector.shape_cast %58 : vector<1x2x8xf32> to vector<2x8xf32>
    %60 = vector.shape_cast %57 : vector<2x8xf32> to vector<1x2x8xf32>
    tpu.vector_store %arg7[%c1_44, %c0_45, %c0_46], %60 {strides = array<i32>} : memref<2x2x8xf32, #tpu.memory_space<vmem>>, vector<1x2x8xf32>,
    return
  }
  func.func @transform_0(%arg0: i32) -> (i32, i32, i32, i32) {
    %c0_i32 = arith.constant 0 : i32
    %c0_i32_0 = arith.constant 0 : i32
    %c0_i32_1 = arith.constant 0 : i32
    %c0_i32_2 = arith.constant 0 : i32
    return %c0_i32, %arg0, %c0_i32_0, %c0_i32_1 : i32, i32, i32, i32
  }
  func.func @transform_1(%arg0: i32) -> (i32, i32, i32) {
    %c0_i32 = arith.constant 0 : i32
    %c0_i32_0 = arith.constant 0 : i32
    %c0_i32_1 = arith.constant 0 : i32
    return %arg0, %c0_i32, %c0_i32_0 : i32, i32, i32
  }
  func.func @transform_2(%arg0: i32) -> (i32, i32, i32) {
    %c0_i32 = arith.constant 0 : i32
    %c0_i32_0 = arith.constant 0 : i32
    %c0_i32_1 = arith.constant 0 : i32
    return %arg0, %c0_i32, %c0_i32_0 : i32, i32, i32
  }
  func.func @transform_3(%arg0: i32) -> (i32, i32, i32) {
    %c0_i32 = arith.constant 0 : i32
    %c0_i32_0 = arith.constant 0 : i32
    %c0_i32_1 = arith.constant 0 : i32
    return %arg0, %c0_i32, %c0_i32_0 : i32, i32, i32
  }
  func.func @transform_4(%arg0: i32) -> (i32, i32, i32) {
    %c0_i32 = arith.constant 0 : i32
    %c0_i32_0 = arith.constant 0 : i32
    %c0_i32_1 = arith.constant 0 : i32
    return %arg0, %c0_i32, %c0_i32_0 : i32, i32, i32
  }
  func.func @transform_5(%arg0: i32) -> (i32, i32, i32) {
    %c0_i32 = arith.constant 0 : i32
    %c0_i32_0 = arith.constant 0 : i32
    %c0_i32_1 = arith.constant 0 : i32
    return %arg0, %c0_i32, %c0_i32_0 : i32, i32, i32
  }
  func.func @transform_6(%arg0: i32) -> (i32, i32, i32) {
    %c0_i32 = arith.constant 0 : i32
    %c0_i32_0 = arith.constant 0 : i32
    %c0_i32_1 = arith.constant 0 : i32
    return %arg0, %c0_i32, %c0_i32_0 : i32, i32, i32
  }
}

</mosaic_0001>

<bundles_post_ra>
// kernel: part_based_attention_head.1
= control target key start
LH: loop header
LB: loop body
LE: loop exit
PB: predicated region body
PF: predicated region fallthrough
CT: control target
= control target key end

     0   :  { %s8783_s0 = inlined_call_operand.vmem [shape: f32[2,4,8,2048], index: 0, kind: input, shape index: {}]   ;;  %s8784_s1 = inlined_call_operand.hbm [shape: bf16[4,2048,256], index: 1, kind: input, shape index: {}]   ;;  %s8785_s2 = inlined_call_operand.hbm [shape: f32[4,1,256], index: 2, kind: input, shape index: {}]   ;;  %s8786_s3 = inlined_call_operand.hbm [shape: f32[4,1,256], index: 3, kind: input, shape index: {}]   ;;  %s8787_s4 = inlined_call_operand.vmem [shape: bf16[4,256,8], index: 4, kind: input, shape index: {}]   ;;  %s8788_s5 = inlined_call_operand.hbm [shape: f32[4,1,8], index: 5, kind: input, shape index: {}]   ;;  %s8789_s6 = inlined_call_operand.vmem [shape: f32[4,2,8], index: 6, kind: output, shape index: {}]  }
   0x1   :  { %8790 = sst [smem:[#allocation13_spill]] %s8783_s0 }
   0x2   :  { %8791 = sst [smem:[#allocation14_spill]] %s8785_s2 }
   0x3   :  { %11 = vsyncpa [#allocation4], 0 }
   0x4   :  { %13 = vsyncpa [#allocation4 + $0x1], 0 }
   0x5   :  { %14 = vsyncpa [#allocation6], 0 }
   0x6   :  { %16 = vsyncpa [#allocation6 + $0x1], 0 }
   0x7   :  { %17 = vsyncpa [#allocation9], 0 }
   0x8   :  { %19 = vsyncpa [#allocation9 + $0x1], 0  ;;  %s7738_s21 = smov 0   ;;  %s7740_s22 = smov 0  }
   0x9   :  { %s7742_s23 = smov 0   ;;  %s7744_s24 = smov 0  }
   0xa LB: > { %s7757_s25 = sadd.s32 4294967295, %s7691_s24   ;;  %s7760_s26 = sadd.s32 1, %s7691_s24   ;;  %s7691_s24 = sphi %s7744_s24, %s8799_s24   ;;  %s7687_s23 = sphi %s7742_s23, %s8798_s23   ;;  %s7683_s22 = sphi %s7740_s22, %s8797_s22   ;;  %s7679_s21 = sphi %s7738_s21, %s8796_s21  }
   0xb   : > { %s29_s27 = ssub.s32 %s7691_s24, %s7760_s26  ;;  %s32_s28 = sadd.s32 1, %s7687_s23 }
   0xc   : > { %p30_p0 = scmp.eq.s32.totalorder %s29_s27, 0  ;;  %p39_p1 = scmp.ne.s32.totalorder %s7687_s23, %s7683_s22 }
   0xd   : > { %p40_p2 = scmp.eq.s32.totalorder %s7691_s24, 0  ;;  %p71_p3 = scmp.ne.s32.totalorder %s7683_s22, %s7679_s21 }
   0xe   : > { %s7770_s29 = scalar_select %p30_p0, %s7687_s23, %s32_s28  }
   0xf   : > { %p7772_p4 = por %p40_p2, %p39_p1  ;;  %p72_p5 = scmp.eq.s32.totalorder %s7757_s25, 0 }
  0x10   : > { %p5710_p7 = scmp.ge.s32.totalorder %s7691_s24, 2 }
  0x11   : > { %p7777_p6 = por %p72_p5, %p71_p3 }
  0x12   : > { %221 = sbr.rel (%p5710_p7) target bundleno = 173 (0xad), region = 16 }
  0x19   : > { %224 = sbr.rel (!%p7772_p4) target bundleno = 67 (0x43), region = 20  ;;  %s226_s8 = sand.u32 (%p7772_p4), 1, %s7687_s23  }
  0x1a   : > { %s6582_s9 = sshll.u32 (%p7772_p4), %s7691_s24, 8  ;;  %s5711_s10 = sshll.u32 (%p7772_p4), %s226_s8, 9 }
  0x1b   : > { %s8794_s0 = sld [smem:[#allocation13_spill]] (%p7772_p4)  ;;  %s7794_s14 = scalar_lea.vmem (%p7772_p4), [#allocation2], %s5711_s10 }
  0x21   : > { %s7789_s13 = scalar_lea.vmem %s8794_s0, %s6582_s9 }
  0x22   : > { %v245_v0 = vld [vmem:[%s7789_s13] sm:$0xff]  ;;  %v247_v1 = vld [vmem:[%s7789_s13 + $0x8] sm:$0xff]  ;;  %v249_v2 = vld [vmem:[%s7789_s13 + $0x10] sm:$0xff] }
  0x23   : > { %246 = vst [vmem:[%s7794_s14] sm:$0xff] %v245_v0  ;;  %248 = vst [vmem:[%s7794_s14 + $0x8] sm:$0xff] %v247_v1  ;;  %v251_v3 = vld [vmem:[%s7789_s13 + $0x18] sm:$0xff]  ;;  %v253_v4 = vld [vmem:[%s7789_s13 + $0x20] sm:$0xff] }
  0x24   : > { %250 = vst [vmem:[%s7794_s14 + $0x10] sm:$0xff] %v249_v2  ;;  %v255_v5 = vld [vmem:[%s7789_s13 + $0x28] sm:$0xff]  ;;  %252 = vst [vmem:[%s7794_s14 + $0x18] sm:$0xff] %v251_v3  ;;  %v257_v6 = vld [vmem:[%s7789_s13 + $0x30] sm:$0xff] }
  0x25   : > { %254 = vst [vmem:[%s7794_s14 + $0x20] sm:$0xff] %v253_v4  ;;  %256 = vst [vmem:[%s7794_s14 + $0x28] sm:$0xff] %v255_v5  ;;  %v259_v7 = vld [vmem:[%s7789_s13 + $0x38] sm:$0xff]  ;;  %v261_v8 = vld [vmem:[%s7789_s13 + $0x40] sm:$0xff] }
  0x26   : > { %258 = vst [vmem:[%s7794_s14 + $0x30] sm:$0xff] %v257_v6  ;;  %260 = vst [vmem:[%s7794_s14 + $0x38] sm:$0xff] %v259_v7  ;;  %v263_v9 = vld [vmem:[%s7789_s13 + $0x48] sm:$0xff]  ;;  %v265_v10 = vld [vmem:[%s7789_s13 + $0x50] sm:$0xff] }
  0x27   : > { %262 = vst [vmem:[%s7794_s14 + $0x40] sm:$0xff] %v261_v8  ;;  %v267_v11 = vld [vmem:[%s7789_s13 + $0x58] sm:$0xff]  ;;  %264 = vst [vmem:[%s7794_s14 + $0x48] sm:$0xff] %v263_v9  ;;  %v269_v12 = vld [vmem:[%s7789_s13 + $0x60] sm:$0xff] }
  0x28   : > { %266 = vst [vmem:[%s7794_s14 + $0x50] sm:$0xff] %v265_v10  ;;  %268 = vst [vmem:[%s7794_s14 + $0x58] sm:$0xff] %v267_v11  ;;  %v271_v13 = vld [vmem:[%s7789_s13 + $0x68] sm:$0xff]  ;;  %v273_v14 = vld [vmem:[%s7789_s13 + $0x70] sm:$0xff] }
  0x29   : > { %270 = vst [vmem:[%s7794_s14 + $0x60] sm:$0xff] %v269_v12  ;;  %272 = vst [vmem:[%s7794_s14 + $0x68] sm:$0xff] %v271_v13  ;;  %v275_v15 = vld [vmem:[%s7789_s13 + $0x78] sm:$0xff]  ;;  %v277_v16 = vld [vmem:[%s7789_s13 + $0x80] sm:$0xff] }
  0x2a   : > { %274 = vst [vmem:[%s7794_s14 + $0x70] sm:$0xff] %v273_v14  ;;  %v279_v17 = vld [vmem:[%s7789_s13 + $0x88] sm:$0xff]  ;;  %276 = vst [vmem:[%s7794_s14 + $0x78] sm:$0xff] %v275_v15  ;;  %v281_v18 = vld [vmem:[%s7789_s13 + $0x90] sm:$0xff] }
  0x2b   : > { %278 = vst [vmem:[%s7794_s14 + $0x80] sm:$0xff] %v277_v16  ;;  %280 = vst [vmem:[%s7794_s14 + $0x88] sm:$0xff] %v279_v17  ;;  %v283_v19 = vld [vmem:[%s7789_s13 + $0x98] sm:$0xff]  ;;  %v285_v20 = vld [vmem:[%s7789_s13 + $0xa0] sm:$0xff] }
  0x2c   : > { %282 = vst [vmem:[%s7794_s14 + $0x90] sm:$0xff] %v281_v18  ;;  %284 = vst [vmem:[%s7794_s14 + $0x98] sm:$0xff] %v283_v19  ;;  %v287_v21 = vld [vmem:[%s7789_s13 + $0xa8] sm:$0xff]  ;;  %v289_v22 = vld [vmem:[%s7789_s13 + $0xb0] sm:$0xff] }
  0x2d   : > { %286 = vst [vmem:[%s7794_s14 + $0xa0] sm:$0xff] %v285_v20  ;;  %v291_v23 = vld [vmem:[%s7789_s13 + $0xb8] sm:$0xff]  ;;  %288 = vst [vmem:[%s7794_s14 + $0xa8] sm:$0xff] %v287_v21  ;;  %v293_v24 = vld [vmem:[%s7789_s13 + $0xc0] sm:$0xff] }
  0x2e   : > { %290 = vst [vmem:[%s7794_s14 + $0xb0] sm:$0xff] %v289_v22  ;;  %292 = vst [vmem:[%s7794_s14 + $0xb8] sm:$0xff] %v291_v23  ;;  %v295_v25 = vld [vmem:[%s7789_s13 + $0xc8] sm:$0xff]  ;;  %v297_v26 = vld [vmem:[%s7789_s13 + $0xd0] sm:$0xff] }
  0x2f   : > { %294 = vst [vmem:[%s7794_s14 + $0xc0] sm:$0xff] %v293_v24  ;;  %296 = vst [vmem:[%s7794_s14 + $0xc8] sm:$0xff] %v295_v25  ;;  %v299_v27 = vld [vmem:[%s7789_s13 + $0xd8] sm:$0xff]  ;;  %v301_v28 = vld [vmem:[%s7789_s13 + $0xe0] sm:$0xff] }
  0x30   : > { %298 = vst [vmem:[%s7794_s14 + $0xd0] sm:$0xff] %v297_v26  ;;  %v303_v29 = vld [vmem:[%s7789_s13 + $0xe8] sm:$0xff]  ;;  %300 = vst [vmem:[%s7794_s14 + $0xd8] sm:$0xff] %v299_v27  ;;  %v305_v30 = vld [vmem:[%s7789_s13 + $0xf0] sm:$0xff] }
  0x31   : > { %302 = vst [vmem:[%s7794_s14 + $0xe0] sm:$0xff] %v301_v28  ;;  %304 = vst [vmem:[%s7794_s14 + $0xe8] sm:$0xff] %v303_v29  ;;  %v307_v31 = vld [vmem:[%s7789_s13 + $0xf8] sm:$0xff]  ;;  %v309_v32 = vld [vmem:[%s7789_s13 + $0x200] sm:$0xff] }
  0x32   : > { %306 = vst [vmem:[%s7794_s14 + $0xf0] sm:$0xff] %v305_v30  ;;  %308 = vst [vmem:[%s7794_s14 + $0xf8] sm:$0xff] %v307_v31  ;;  %v311_v33 = vld [vmem:[%s7789_s13 + $0x208] sm:$0xff]  ;;  %v313_v34 = vld [vmem:[%s7789_s13 + $0x210] sm:$0xff] }
  0x33   : > { %310 = vst [vmem:[%s7794_s14 + $0x100] sm:$0xff] %v309_v32  ;;  %v315_v35 = vld [vmem:[%s7789_s13 + $0x218] sm:$0xff]  ;;  %312 = vst [vmem:[%s7794_s14 + $0x108] sm:$0xff] %v311_v33  ;;  %v317_v36 = vld [vmem:[%s7789_s13 + $0x220] sm:$0xff] }
  0x34   : > { %314 = vst [vmem:[%s7794_s14 + $0x110] sm:$0xff] %v313_v34  ;;  %316 = vst [vmem:[%s7794_s14 + $0x118] sm:$0xff] %v315_v35  ;;  %v319_v37 = vld [vmem:[%s7789_s13 + $0x228] sm:$0xff]  ;;  %v321_v38 = vld [vmem:[%s7789_s13 + $0x230] sm:$0xff] }
  0x35   : > { %318 = vst [vmem:[%s7794_s14 + $0x120] sm:$0xff] %v317_v36  ;;  %320 = vst [vmem:[%s7794_s14 + $0x128] sm:$0xff] %v319_v37  ;;  %v323_v39 = vld [vmem:[%s7789_s13 + $0x238] sm:$0xff]  ;;  %v325_v40 = vld [vmem:[%s7789_s13 + $0x240] sm:$0xff] }
  0x36   : > { %322 = vst [vmem:[%s7794_s14 + $0x130] sm:$0xff] %v321_v38  ;;  %v327_v41 = vld [vmem:[%s7789_s13 + $0x248] sm:$0xff]  ;;  %324 = vst [vmem:[%s7794_s14 + $0x138] sm:$0xff] %v323_v39  ;;  %v329_v42 = vld [vmem:[%s7789_s13 + $0x250] sm:$0xff] }
  0x37   : > { %326 = vst [vmem:[%s7794_s14 + $0x140] sm:$0xff] %v325_v40  ;;  %328 = vst [vmem:[%s7794_s14 + $0x148] sm:$0xff] %v327_v41  ;;  %v331_v43 = vld [vmem:[%s7789_s13 + $0x258] sm:$0xff]  ;;  %v333_v44 = vld [vmem:[%s7789_s13 + $0x260] sm:$0xff] }
  0x38   : > { %330 = vst [vmem:[%s7794_s14 + $0x150] sm:$0xff] %v329_v42  ;;  %332 = vst [vmem:[%s7794_s14 + $0x158] sm:$0xff] %v331_v43  ;;  %v335_v45 = vld [vmem:[%s7789_s13 + $0x268] sm:$0xff]  ;;  %v337_v46 = vld [vmem:[%s7789_s13 + $0x270] sm:$0xff] }
  0x39   : > { %334 = vst [vmem:[%s7794_s14 + $0x160] sm:$0xff] %v333_v44  ;;  %v339_v47 = vld [vmem:[%s7789_s13 + $0x278] sm:$0xff]  ;;  %336 = vst [vmem:[%s7794_s14 + $0x168] sm:$0xff] %v335_v45  ;;  %v341_v48 = vld [vmem:[%s7789_s13 + $0x280] sm:$0xff] }
  0x3a   : > { %338 = vst [vmem:[%s7794_s14 + $0x170] sm:$0xff] %v337_v46  ;;  %340 = vst [vmem:[%s7794_s14 + $0x178] sm:$0xff] %v339_v47  ;;  %v343_v49 = vld [vmem:[%s7789_s13 + $0x288] sm:$0xff]  ;;  %v345_v50 = vld [vmem:[%s7789_s13 + $0x290] sm:$0xff] }
  0x3b   : > { %342 = vst [vmem:[%s7794_s14 + $0x180] sm:$0xff] %v341_v48  ;;  %344 = vst [vmem:[%s7794_s14 + $0x188] sm:$0xff] %v343_v49  ;;  %v347_v51 = vld [vmem:[%s7789_s13 + $0x298] sm:$0xff]  ;;  %v349_v52 = vld [vmem:[%s7789_s13 + $0x2a0] sm:$0xff] }
  0x3c   : > { %346 = vst [vmem:[%s7794_s14 + $0x190] sm:$0xff] %v345_v50  ;;  %v351_v53 = vld [vmem:[%s7789_s13 + $0x2a8] sm:$0xff]  ;;  %348 = vst [vmem:[%s7794_s14 + $0x198] sm:$0xff] %v347_v51  ;;  %v353_v54 = vld [vmem:[%s7789_s13 + $0x2b0] sm:$0xff] }
  0x3d   : > { %350 = vst [vmem:[%s7794_s14 + $0x1a0] sm:$0xff] %v349_v52  ;;  %352 = vst [vmem:[%s7794_s14 + $0x1a8] sm:$0xff] %v351_v53  ;;  %v355_v55 = vld [vmem:[%s7789_s13 + $0x2b8] sm:$0xff]  ;;  %v357_v56 = vld [vmem:[%s7789_s13 + $0x2c0] sm:$0xff] }
  0x3e   : > { %354 = vst [vmem:[%s7794_s14 + $0x1b0] sm:$0xff] %v353_v54  ;;  %356 = vst [vmem:[%s7794_s14 + $0x1b8] sm:$0xff] %v355_v55  ;;  %v359_v57 = vld [vmem:[%s7789_s13 + $0x2c8] sm:$0xff]  ;;  %v361_v58 = vld [vmem:[%s7789_s13 + $0x2d0] sm:$0xff] }
  0x3f   : > { %358 = vst [vmem:[%s7794_s14 + $0x1c0] sm:$0xff] %v357_v56  ;;  %v363_v59 = vld [vmem:[%s7789_s13 + $0x2d8] sm:$0xff]  ;;  %360 = vst [vmem:[%s7794_s14 + $0x1c8] sm:$0xff] %v359_v57  ;;  %v365_v60 = vld [vmem:[%s7789_s13 + $0x2e0] sm:$0xff] }
  0x40   : > { %362 = vst [vmem:[%s7794_s14 + $0x1d0] sm:$0xff] %v361_v58  ;;  %364 = vst [vmem:[%s7794_s14 + $0x1d8] sm:$0xff] %v363_v59  ;;  %v367_v61 = vld [vmem:[%s7789_s13 + $0x2e8] sm:$0xff]  ;;  %v369_v62 = vld [vmem:[%s7789_s13 + $0x2f0] sm:$0xff] }
  0x41   : > { %366 = vst [vmem:[%s7794_s14 + $0x1e0] sm:$0xff] %v365_v60  ;;  %368 = vst [vmem:[%s7794_s14 + $0x1e8] sm:$0xff] %v367_v61  ;;  %v371_v63 = vld [vmem:[%s7789_s13 + $0x2f8] sm:$0xff] }
  0x42   : > { %370 = vst [vmem:[%s7794_s14 + $0x1f0] sm:$0xff] %v369_v62  ;;  %372 = vst [vmem:[%s7794_s14 + $0x1f8] sm:$0xff] %v371_v63 }
  0x43 PF: > { %s7922_s15 = sand.u32 1, %s7687_s23   ;;  %s401_s16 = sand.u32 1, %s7691_s24  }
  0x44   : > { %s5719_s17 = sshll.u32 %s7922_s15, 2  ;;  %s6586_s18 = sshll.u32 %s7691_s24, 6 }
  0x45   : > { %s8795_s2 = sld [smem:[#allocation14_spill]]  ;;  %s405_s27 = scalar_lea.vmem [#allocation5], %s5719_s17 }
  0x46   : > { %s413_s28 = sshll.u32 %s405_s27, 4  ;;  %s7938_s8 = scalar_lea.sflag [#allocation6], %s401_s16  ;;  %s7936_s28 = int_to_ptr.vmem [resolvable:$true] %s413_s28 }
  0x4b   : > { %s7932_s21 = scalar_lea.hbm %s8795_s2, %s6586_s18  ;;  %s7541_s12 = scalar_lea.hbm %s8795_s2, 128 }
  0x4c   : > { %s7537_s9 = scalar_lea.hbm %s7932_s21, 64  ;;  %p7542_p11 = scmp.lt.u32.totalorder %s7932_s21, %s8795_s2 }
  0x4d   : > { %p7538_p8 = scmp.ne.s32.totalorder %s7932_s21, %s7537_s9  ;;  %p7543_p12 = scmp.lt.u32.totalorder %s7541_s12, %s7537_s9 }
  0x4e   : > { %p7545_p0 = scmp.lt.u32.totalorder %s7537_s9, %s7932_s21 }
  0x4f   : > { %p7539_p9 = pnand %p7538_p8, %p7772_p4  ;;  %p7544_p13 = por %p7543_p12, %p7542_p11 }
  0x51   : > { %p7540_p10 = pneg %p7539_p9  ;;  %p7546_p1 = por %p7545_p0, %p7544_p13 }
  0x53   : > { %p7547_p2 = pnand %p7546_p1, %p7540_p10 }
  0x55   : > { %7550 = shalt.err (!%p7547_p2)
}
  0x56   : > { %s7551_s16 = scalar_lea.vmem %s7936_s28, 64  ;;  %s7693_s19 = smov [#allocation5]  }
  0x57   : > { %p7552_p3 = scmp.ne.s32.totalorder %s7936_s28, %s7551_s16  ;;  %s7555_s20 = sshll.u32 %s7693_s19, 4  ;;  %s7556_s20 = int_to_ptr.vmem [resolvable:$false] %s7555_s20 }
  0x58   : > { %s7557_s27 = scalar_lea.vmem %s7556_s20, 128  ;;  %p7558_p8 = scmp.lt.s32.totalorder %s7936_s28, %s7556_s20 }
  0x59   : > { %p7553_p5 = pnand %p7552_p3, %p7772_p4  ;;  %p7559_p9 = scmp.lt.s32.totalorder %s7557_s27, %s7551_s16 }
  0x5b   : > { %p7554_p7 = pneg %p7553_p5  ;;  %p7560_p11 = por %p7559_p9, %p7558_p8 }
  0x5d   : > { %p7561_p12 = pnand %p7560_p11, %p7554_p7 }
  0x5f   : > { %7564 = shalt.err (!%p7561_p12)
}
  0x60   : > { %s7694_s9 = smov 32   ;;  %s7695_s10 = smov 2  }
  0x61   : > { %6692 = dma.hbm_to_vmem [thread:$0]  (%p7772_p4), %s7932_s21, 64, %s7936_s28, %s7938_s8, %s7694_s9, %s7694_s9, %s7695_s10  }
  0x62   : > { %s7970_s13 = scalar_lea.hbm %s8786_s3, %s6586_s18  ;;  %s427_s14 = scalar_lea.vmem [#allocation7], %s5719_s17 }
  0x63   : > { %s435_s16 = sshll.u32 %s427_s14, 4  ;;  %s5715_s19 = sshll.u32 %s7922_s15, 12  ;;  %s7983_s16 = int_to_ptr.vmem [resolvable:$true] %s435_s16 }
  0x64   : > { %s6584_s20 = sshll.u32 %s7691_s24, 16  ;;  %s383_s21 = scalar_lea.vmem [#allocation3], %s5715_s19 }
  0x65   : > { %s7979_s2 = scalar_lea.hbm %s8784_s1, %s6584_s20  ;;  %s391_s28 = sshll.u32 %s383_s21, 4  ;;  %s7981_s28 = int_to_ptr.vmem [resolvable:$true] %s391_s28 }
  0x66   : > { %s380_s18 = scalar_lea.sflag [#allocation4], %s7922_s15  ;;  %s7565_s17 = scalar_lea.hbm %s7979_s2, 65536 }
  0x67   : > { %p7566_p10 = scmp.ne.s32.totalorder %s7979_s2, %s7565_s17  ;;  %s7569_s12 = scalar_lea.hbm %s8784_s1, 131072 }
  0x68   : > { %p7570_p1 = scmp.lt.u32.totalorder %s7979_s2, %s8784_s1  ;;  %p7571_p2 = scmp.lt.u32.totalorder %s7569_s12, %s7565_s17 }
  0x69   : > { %p7567_p13 = pnand %p7566_p10, %p7772_p4  ;;  %p7573_p5 = scmp.lt.u32.totalorder %s7565_s17, %s7979_s2 }
  0x6a   : > { %p7572_p3 = por %p7571_p2, %p7570_p1 }
  0x6b   : > { %p7568_p0 = pneg %p7567_p13 }
  0x6c   : > { %p7574_p7 = por %p7573_p5, %p7572_p3 }
  0x6e   : > { %p7575_p8 = pnand %p7574_p7, %p7568_p0 }
  0x70   : > { %7578 = shalt.err (!%p7575_p8)
}
  0x71   : > { %s7579_s19 = scalar_lea.vmem %s7981_s28, 65536  ;;  %s7696_s27 = smov [#allocation3]  }
  0x72   : > { %p7580_p9 = scmp.ne.s32.totalorder %s7981_s28, %s7579_s19  ;;  %s7583_s21 = sshll.u32 %s7696_s27, 4  ;;  %s7584_s21 = int_to_ptr.vmem [resolvable:$false] %s7583_s21 }
  0x73   : > { %s7585_s11 = scalar_lea.vmem %s7584_s21, 131072  ;;  %p7586_p10 = scmp.lt.s32.totalorder %s7981_s28, %s7584_s21 }
  0x74   : > { %p7581_p11 = pnand %p7580_p9, %p7772_p4  ;;  %p7587_p13 = scmp.lt.s32.totalorder %s7585_s11, %s7579_s19 }
  0x76   : > { %p7582_p12 = pneg %p7581_p11  ;;  %p7588_p1 = por %p7587_p13, %p7586_p10 }
  0x78   : > { %p7589_p2 = pnand %p7588_p1, %p7582_p12 }
  0x7a   : > { %7592 = shalt.err (!%p7589_p2)
}
  0x7b   : > { %s7697_s17 = smov 128   ;;  %s7698_s0 = smov 8  }
  0x7c   : > { %6691 = dma.hbm_to_vmem [thread:$0]  (%p7772_p4), %s7979_s2, 65536, %s7981_s28, %s380_s18, %s7697_s17, %s7697_s17, %s7698_s0  }
  0x7d   : > { %s7593_s12 = scalar_lea.hbm %s7970_s13, 64  ;;  %s7597_s19 = scalar_lea.hbm %s8786_s3, 128 }
  0x7e   : > { %p7594_p0 = scmp.ne.s32.totalorder %s7970_s13, %s7593_s12  ;;  %p7598_p7 = scmp.lt.u32.totalorder %s7970_s13, %s8786_s3 }
  0x7f   : > { %p7599_p8 = scmp.lt.u32.totalorder %s7597_s19, %s7593_s12  ;;  %p7601_p11 = scmp.lt.u32.totalorder %s7593_s12, %s7970_s13 }
  0x80   : > { %p7595_p3 = pnand %p7594_p0, %p7772_p4 }
  0x81   : > { %p7600_p9 = por %p7599_p8, %p7598_p7 }
  0x82   : > { %p7596_p5 = pneg %p7595_p3 }
  0x83   : > { %p7602_p12 = por %p7601_p11, %p7600_p9 }
  0x85   : > { %p7603_p10 = pnand %p7602_p12, %p7596_p5 }
  0x87   : > { %7606 = shalt.err (!%p7603_p10)
}
  0x88   : > { %s7607_s2 = scalar_lea.vmem %s7983_s16, 64  ;;  %s7699_s28 = smov [#allocation7]  }
  0x89   : > { %p7608_p13 = scmp.ne.s32.totalorder %s7983_s16, %s7607_s2  ;;  %s7611_s18 = sshll.u32 %s7699_s28, 4  ;;  %s7612_s18 = int_to_ptr.vmem [resolvable:$false] %s7611_s18 }
  0x8a   : > { %s7613_s11 = scalar_lea.vmem %s7612_s18, 128  ;;  %p7614_p0 = scmp.lt.s32.totalorder %s7983_s16, %s7612_s18 }
  0x8b   : > { %p7609_p1 = pnand %p7608_p13, %p7772_p4  ;;  %p7615_p3 = scmp.lt.s32.totalorder %s7613_s11, %s7607_s2 }
  0x8d   : > { %p7610_p2 = pneg %p7609_p1  ;;  %p7616_p7 = por %p7615_p3, %p7614_p0 }
  0x8f   : > { %p7617_p8 = pnand %p7616_p7, %p7610_p2 }
  0x91   : > { %7620 = shalt.err (!%p7617_p8)
}
  0x92   : > { %6693 = dma.hbm_to_vmem [thread:$0]  (%p7772_p4), %s7970_s13, 64, %s7983_s16, %s7938_s8, %s7694_s9, %s7694_s9, %s7695_s10  }
  0x93   : > { %s5727_s17 = sshll.u32 %s7922_s15, 1  ;;  %s6589_s0 = sshll.u32 %s7691_s24, 5 }
  0x94   : > { %s8039_s20 = scalar_lea.hbm %s8788_s5, %s6589_s0  ;;  %s459_s19 = scalar_lea.vmem [#allocation8], %s5727_s17 }
  0x95   : > { %s466_s27 = sshll.u32 %s459_s19, 4  ;;  %s456_s21 = scalar_lea.sflag [#allocation9], %s7922_s15  ;;  %s8041_s27 = int_to_ptr.vmem [resolvable:$true] %s466_s27 }
  0x96   : > { %s7621_s2 = scalar_lea.hbm %s8039_s20, 32  ;;  %s7625_s10 = scalar_lea.hbm %s8788_s5, 64 }
  0x97   : > { %p7622_p5 = scmp.ne.s32.totalorder %s8039_s20, %s7621_s2  ;;  %p7626_p12 = scmp.lt.u32.totalorder %s8039_s20, %s8788_s5 }
  0x98   : > { %p7627_p10 = scmp.lt.u32.totalorder %s7625_s10, %s7621_s2  ;;  %p7629_p1 = scmp.lt.u32.totalorder %s7621_s2, %s8039_s20 }
  0x99   : > { %p7623_p9 = pnand %p7622_p5, %p7772_p4 }
  0x9a   : > { %p7628_p13 = por %p7627_p10, %p7626_p12 }
  0x9b   : > { %p7624_p11 = pneg %p7623_p9 }
  0x9c   : > { %p7630_p2 = por %p7629_p1, %p7628_p13 }
  0x9e   : > { %p7631_p0 = pnand %p7630_p2, %p7624_p11 }
  0xa0   : > { %7634 = shalt.err (!%p7631_p0)
}
  0xa1   : > { %s7635_s28 = scalar_lea.vmem %s8041_s27, 32  ;;  %s7700_s18 = smov [#allocation8]  }
  0xa2   : > { %p7636_p3 = scmp.ne.s32.totalorder %s8041_s27, %s7635_s28  ;;  %s7639_s11 = sshll.u32 %s7700_s18, 4  ;;  %s7640_s11 = int_to_ptr.vmem [resolvable:$false] %s7639_s11 }
  0xa3   : > { %s7641_s17 = scalar_lea.vmem %s7640_s11, 64  ;;  %p7642_p5 = scmp.lt.s32.totalorder %s8041_s27, %s7640_s11 }
  0xa4   : > { %p7637_p7 = pnand %p7636_p3, %p7772_p4  ;;  %p7643_p9 = scmp.lt.s32.totalorder %s7641_s17, %s7635_s28 }
  0xa6   : > { %p7638_p8 = pneg %p7637_p7  ;;  %p7644_p12 = por %p7643_p9, %p7642_p5 }
  0xa8   : > { %p7645_p10 = pnand %p7644_p12, %p7638_p8 }
  0xaa   : > { %7648 = shalt.err (!%p7645_p10)
}
  0xab   : > { %s7701_s0 = smov 16   ;;  %s7702_s12 = smov 1  }
  0xac   : > { %6694 = dma.hbm_to_vmem [thread:$0]  (%p7772_p4), %s8039_s20, 32, %s8041_s27, %s456_s21, %s7701_s0, %s7701_s0, %s7702_s12  }
  0xad PF: > { %p5730_p11 = scmp.ge.s32.totalorder %s7691_s24, 1  ;;  %p474_p13 = scmp.lt.s32.totalorder %s7691_s24, 3 }
  0xaf   : > { %p475_p1 = pnand %p5730_p11, %p474_p13 }
  0xb0   : > { %s481_s14 = sand.u32 (!%p475_p1), 1, %s7683_s22  }
  0xb1   : > { %478 = sbr.rel (%p475_p1) target bundleno = 1878 (0x756), region = 63  ;;  %s5731_s19 = sshll.u32 (!%p475_p1), %s481_s14, 9 }
  0xb2   : > { %s5732_s2 = sshll.u32 (!%p475_p1), %s481_s14, 12  ;;  %s8070_s8 = scalar_lea.vmem (!%p475_p1), [#allocation2], %s5731_s19 }
  0xb3   : > { %s488_s9 = scalar_lea.sflag (!%p475_p1), [#allocation4], %s481_s14  ;;  %s8072_s10 = scalar_lea.vmem (!%p475_p1), [#allocation3], %s5732_s2 }
  0xb8   : > { %7666 = dma.done.wait (%p7777_p6), %s488_s9, 65536  }
  0xb9   : > { %7668 = vsyncadd (%p7777_p6), %s488_s9, 4294901760  ;;  %s496_s24 = sand.u32 1, %s7757_s25   ;;  %s5733_s30 = sshll.u32 %s481_s14, 2 }
  0xba   : > { %s497_s15 = scalar_lea.sflag [#allocation6], %s496_s24  ;;  %s8079_s20 = scalar_lea.vmem [#allocation5], %s5733_s30 }
  0xbb   : > { %7670 = dma.done.wait (%p7777_p6), %s497_s15, 128  }
  0xbc   : > { %7672 = vsyncadd (%p7777_p6), %s497_s15, 4294967168  ;;  %s5735_s27 = sshll.u32 %s481_s14, 1  ;;  %s8085_s21 = scalar_lea.vmem [#allocation7], %s5733_s30 }
  0xbd   : > { %s515_s13 = scalar_lea.sflag [#allocation9], %s481_s14  ;;  %s8087_s16 = scalar_lea.vmem [#allocation8], %s5735_s27 }
  0xbe   : > { %7674 = dma.done.wait (%p7777_p6), %s515_s13, 32  }
  0xbf   : > { %7676 = vsyncadd (%p7777_p6), %s515_s13, 4294967264  ;;  %v6737_v0 = vld [vmem:[%s8072_s10 + $0x4] ss:$8 sps:$4 sm:$0xff]   ;;  %v6739_v1 = vld [vmem:[%s8072_s10] ss:$8 sps:$4 sm:$0xff]   ;;  %vm1232_vm0 = vcmask 1041409  }
  0xc0   : > { %2561 = vmatprep.subr.bf16.mxu0 %v6737_v0  ;;  %v6740_v2 = vld [vmem:[%s8072_s10 + $0x14] ss:$8 sps:$4 sm:$0xff]   ;;  %v6742_v3 = vld [vmem:[%s8072_s10 + $0x10] ss:$8 sps:$4 sm:$0xff]   ;;  %v6743_v4 = vld [vmem:[%s8072_s10 + $0x24] ss:$8 sps:$4 sm:$0xff]  }
  0xc1   : > { %2562 = vmatpush1.bf16.msra.mxu0 %v6739_v1  ;;  %v6745_v5 = vld [vmem:[%s8072_s10 + $0x20] ss:$8 sps:$4 sm:$0xff]   ;;  %v6746_v6 = vld [vmem:[%s8072_s10 + $0x34] ss:$8 sps:$4 sm:$0xff]   ;;  %v6748_v7 = vld [vmem:[%s8072_s10 + $0x30] ss:$8 sps:$4 sm:$0xff]  }
  0xc2   : > { %2563 = vmatprep.subr.bf16.mxu0 %v6740_v2  ;;  %v6749_v8 = vld [vmem:[%s8072_s10 + $0x44] ss:$8 sps:$4 sm:$0xff]   ;;  %v6751_v9 = vld [vmem:[%s8072_s10 + $0x40] ss:$8 sps:$4 sm:$0xff]   ;;  %v6752_v10 = vld [vmem:[%s8072_s10 + $0x54] ss:$8 sps:$4 sm:$0xff]  }
  0xc3   : > { %v6754_v11 = vld [vmem:[%s8072_s10 + $0x50] ss:$8 sps:$4 sm:$0xff]   ;;  %v6755_v12 = vld [vmem:[%s8072_s10 + $0x64] ss:$8 sps:$4 sm:$0xff]   ;;  %v6757_v17 = vld [vmem:[%s8072_s10 + $0x60] ss:$8 sps:$4 sm:$0xff]  }
  0xc4   : > { %v592_v13 = vld [vmem:[%s8070_s8 + $0x8] sm:$0xff]  ;;  %v591_v18 = vld [vmem:[%s8070_s8] sm:$0xff]  ;;  %v6758_v20 = vld [vmem:[%s8072_s10 + $0x74] ss:$8 sps:$4 sm:$0xff]   ;;  %s5736_s7 = sshll.u32 %s7757_s25, 1  ;;  %vm3096_vm1 = vcmask 58368  }
  0xc5   : > { %2564 = vmatpush1.bf16.msra.mxu0 %v6742_v3  ;;  %v624_v14 = vld [vmem:[%s8070_s8 + $0x108] sm:$0xff]  ;;  %v661_v15 = vrot.slane %v592_v13, 4  ;;  %v623_v19 = vld [vmem:[%s8070_s8 + $0x100] sm:$0xff]  ;;  %v655_v23 = vrot.slane %v591_v18, 4  ;;  %v6760_v27 = vld [vmem:[%s8072_s10 + $0x70] ss:$8 sps:$4 sm:$0xff]  }
  0xc6   : > { %2565 = vmatprep.subr.bf16.mxu0 %v6743_v4  ;;  %v757_v16 = vrot.slane %v624_v14, 4  ;;  %v751_v24 = vrot.slane %v623_v19, 4  ;;  %v6761_v30 = vld [vmem:[%s8072_s10 + $0x84] ss:$8 sps:$4 sm:$0xff]   ;;  %v6763_v35 = vld [vmem:[%s8072_s10 + $0x80] ss:$8 sps:$4 sm:$0xff]  }
  0xc7   : > { %v662_v21 = vadd.f32 %v661_v15, %v592_v13  ;;  %v656_v28 = vadd.f32 %v655_v23, %v591_v18  ;;  %v6764_v38 = vld [vmem:[%s8072_s10 + $0x94] ss:$8 sps:$4 sm:$0xff]   ;;  %v6766_v43 = vld [vmem:[%s8072_s10 + $0x90] ss:$8 sps:$4 sm:$0xff]   ;;  %v6767_v46 = vld [vmem:[%s8072_s10 + $0xa4] ss:$8 sps:$4 sm:$0xff]  }
  0xc8   : > { %v758_v22 = vadd.f32 %v757_v16, %v624_v14  ;;  %v752_v29 = vadd.f32 %v751_v24, %v623_v19  ;;  %v6769_v51 = vld [vmem:[%s8072_s10 + $0xa0] ss:$8 sps:$4 sm:$0xff]   ;;  %v6770_v54 = vld [vmem:[%s8072_s10 + $0xb4] ss:$8 sps:$4 sm:$0xff]   ;;  %v6772_v57 = vld [vmem:[%s8072_s10 + $0xb0] ss:$8 sps:$4 sm:$0xff]  }
  0xc9   : > { %2566 = vmatpush1.bf16.msra.mxu0 %v6745_v5  ;;  %v663_v25 = vrot.slane %v662_v21, 2  ;;  %v657_v36 = vrot.slane %v656_v28, 2  ;;  %v6773_v60 = vld [vmem:[%s8072_s10 + $0xc4] ss:$8 sps:$4 sm:$0xff]   ;;  %v594_v61 = vld [vmem:[%s8070_s8 + $0x18] sm:$0xff]  ;;  %p577_p4 = scmp.lt.s32.totalorder %s5736_s7, 3 }
  0xca   : > { %2567 = vmatprep.subr.bf16.mxu0 %v6746_v6  ;;  %v759_v26 = vrot.slane %v758_v22, 2  ;;  %v753_v37 = vrot.slane %v752_v29, 2  ;;  %v626_v62 = vld [vmem:[%s8070_s8 + $0x118] sm:$0xff]  ;;  %v673_v63 = vrot.slane %v594_v61, 4  ;;  %v6775_v1 = vld [vmem:[%s8072_s10 + $0xc0] ss:$8 sps:$4 sm:$0xff]  }
  0xcb   : > { %v664_v31 = vadd.f32 %v663_v25, %v662_v21  ;;  %v658_v44 = vadd.f32 %v657_v36, %v656_v28  ;;  %v769_v0 = vrot.slane %v626_v62, 4  ;;  %v6776_v6 = vld [vmem:[%s8072_s10 + $0xd4] ss:$8 sps:$4 sm:$0xff]   ;;  %v6779_v14 = vld [vmem:[%s8072_s10 + $0xe4] ss:$8 sps:$4 sm:$0xff]   ;;  %s8801_s7 = smov (!%p577_p4, %s5736_s7), 3 }
  0xcc   : > { %v760_v32 = vadd.f32 %v759_v26, %v758_v22  ;;  %v754_v45 = vadd.f32 %v753_v37, %v752_v29  ;;  %v674_v4 = vadd.f32 %v673_v63, %v594_v61  ;;  %v6782_v22 = vld [vmem:[%s8072_s10 + $0xf4] ss:$8 sps:$4 sm:$0xff]   ;;  %v6784_v25 = vld [vmem:[%s8072_s10 + $0xf0] ss:$8 sps:$4 sm:$0xff]   ;;  %v6787_v29 = vld [vmem:[%s8072_s10 + $0x104] ss:$8 sps:$4 sm:$0xff]  }
  0xcd   : > { %2568 = vmatpush1.bf16.msra.mxu0 %v6748_v7  ;;  %v665_v33 = vrot.slane %v664_v31, 1  ;;  %v659_v52 = vrot.slane %v658_v44, 1  ;;  %v770_v5 = vadd.f32 %v769_v0, %v626_v62  ;;  %v6788_v37 = vld [vmem:[%s8072_s10 + $0x110] ss:$8 sps:$4 sm:$0xff]   ;;  %v6809_v63 = vld [vmem:[%s8072_s10 + $0x180] ss:$8 sps:$4 sm:$0xff]  }
  0xce   : > { %2569 = vmatprep.subr.bf16.mxu0 %v6749_v8  ;;  %v761_v34 = vrot.slane %v760_v32, 1  ;;  %v755_v53 = vrot.slane %v754_v45, 1  ;;  %v675_v7 = vrot.slane %v674_v4, 2  ;;  %v6814_v0 = vld [vmem:[%s8072_s10 + $0x194] ss:$8 sps:$4 sm:$0xff]   ;;  %s6590_s28 = sshll.u32 %s8801_s7, 7 }
  0xcf   : > { %v666_v39 = vadd.f32 %v665_v33, %v664_v31  ;;  %v660_v58 = vadd.f32 %v659_v52, %v658_v44  ;;  %v771_v8 = vrot.slane %v770_v5, 2  ;;  %v6785_v33 = vld [vmem:[%s8072_s10 + $0x100] ss:$8 sps:$4 sm:$0xff]   ;;  %v6802_v44 = vld [vmem:[%s8072_s10 + $0x154] ss:$8 sps:$4 sm:$0xff]   ;;  %s8342_s11 = scalar_lea.vmem %s8787_s4, %s6590_s28  ;;  %s5740_s17 = sshll.u32 %s8801_s7, 1 }
  0xd0   : > { %v762_v40 = vadd.f32 %v761_v34, %v760_v32  ;;  %v756_v59 = vadd.f32 %v755_v53, %v754_v45  ;;  %v6800_v45 = vld [vmem:[%s8072_s10 + $0x150] ss:$8 sps:$4 sm:$0xff]   ;;  %v6808_v52 = vld [vmem:[%s8072_s10 + $0x174] ss:$8 sps:$4 sm:$0xff]   ;;  %s8572_s14 = scalar_lea.vmem %s8789_s6, %s5740_s17 }
  0xd1   : > { %2570 = vmatpush1.bf16.msra.mxu0 %v6751_v9  ;;  %v849_v41 = vmul.f32 0.125, %v666_v39  ;;  %v848_v2 = vmul.f32 0.125, %v660_v58  ;;  %v6778_v9 = vld [vmem:[%s8072_s10 + $0xd0] ss:$8 sps:$4 sm:$0xff]   ;;  %v772_v13 = vadd.f32 %v771_v8, %v770_v5  ;;  %v6791_v39 = vld [vmem:[%s8072_s10 + $0x120] ss:$8 sps:$4 sm:$0xff]  }
  0xd2   : > { %2571 = vmatprep.subr.bf16.mxu0 %v6752_v10  ;;  %v865_v42 = vmul.f32 0.125, %v762_v40  ;;  %v864_v3 = vmul.f32 0.125, %v756_v59  ;;  %v6796_v40 = vld [vmem:[%s8072_s10 + $0x134] ss:$8 sps:$4 sm:$0xff]   ;;  %v6811_v58 = vld [vmem:[%s8072_s10 + $0x184] ss:$8 sps:$4 sm:$0xff]  }
  0xd3   : > { %v881_v47 = vpack.c.bf16 %v849_v41, %v849_v41  ;;  %v880_v10 = vpack.c.bf16 %v848_v2, %v848_v2  ;;  %v773_v16 = vrot.slane %v772_v13, 1  ;;  %v6794_v41 = vld [vmem:[%s8072_s10 + $0x130] ss:$8 sps:$4 sm:$0xff]  }
  0xd4   : > { %v897_v48 = vpack.c.bf16 %v865_v42, %v865_v42  ;;  %v6799_v42 = vld [vmem:[%s8072_s10 + $0x144] ss:$8 sps:$4 sm:$0xff]   ;;  %v6812_v5 = vld [vmem:[%s8072_s10 + $0x190] ss:$8 sps:$4 sm:$0xff]  }
  0xd5   : > { %2572 = vmatpush1.bf16.msra.mxu0 %v6754_v11  ;;  %v1201_v49 = vunpack.c.l.b16 %v881_v47  ;;  %v896_v11 = vpack.c.bf16 %v864_v3, %v864_v3  ;;  %v1200_v18 = vunpack.c.l.b16 %v880_v10  ;;  %v774_v21 = vadd.f32 %v773_v16, %v772_v13  ;;  %v593_v47 = vld [vmem:[%s8070_s8 + $0x10] sm:$0xff] }
  0xd6   : > { %2573 = vmatprep.subr.bf16.mxu0 %v6755_v12  ;;  %v1217_v50 = vunpack.c.l.b16 %v897_v48  ;;  %v676_v12 = vadd.f32 %v675_v7, %v674_v4  ;;  %v625_v48 = vld [vmem:[%s8070_s8 + $0x110] sm:$0xff]  ;;  %v667_v53 = vrot.slane %v593_v47, 4 }
  0xd7   : > { %v1216_v19 = vunpack.c.l.b16 %v896_v11  ;;  %v867_v24 = vmul.f32 0.125, %v774_v21  ;;  %v6815_v11 = vld [vmem:[%s8072_s10 + $0x1a0] ss:$8 sps:$4 sm:$0xff]  }
  0xd8   : > { %v1234_v55 = vsel %vm1232_vm0, %v1217_v50, %v1201_v49  ;;  %v677_v15 = vrot.slane %v676_v12, 1  ;;  %v596_v49 = vld [vmem:[%s8070_s8 + $0x28] sm:$0xff]  ;;  %v668_v59 = vadd.f32 %v667_v53, %v593_v47  ;;  %v6838_v47 = vld [vmem:[%s8072_s10 + $0x214] ss:$8 sps:$4 sm:$0xff]   ;;  %v6842_v53 = vld [vmem:[%s8072_s10 + $0x230] ss:$8 sps:$4 sm:$0xff]  }
  0xd9   : > { %2574 = vmatpush1.bf16.msra.mxu0 %v6757_v17  ;;  %v1250_v56 = vpack.c.b16 %v1234_v55, %v1234_v55  ;;  %v6781_v17 = vld [vmem:[%s8072_s10 + $0xe0] ss:$8 sps:$4 sm:$0xff]   ;;  %v1233_v26 = vsel %vm1232_vm0, %v1216_v19, %v1200_v18  ;;  %v899_v28 = vpack.c.bf16 %v867_v24, %v867_v24  ;;  %v685_v55 = vrot.slane %v596_v49, 4  ;;  %v6826_v24 = vld [vmem:[%s8072_s10 + $0x1d4] ss:$8 sps:$4 sm:$0xff]  }
  0xda   : > { %2575 = vmatprep.subr.bf16.mxu0 %v6758_v20  ;;  %v678_v20 = vadd.f32 %v677_v15, %v676_v12  ;;  %v1249_v32 = vpack.c.b16 %v1233_v26, %v1233_v26  ;;  %v628_v50 = vld [vmem:[%s8070_s8 + $0x128] sm:$0xff]  ;;  %v6820_v12 = vld [vmem:[%s8072_s10 + $0x1b4] ss:$8 sps:$4 sm:$0xff]  }
  0xdb   : > { %2593 = vmatprep.mubr.bf16.mxu0 %v1250_v56  ;;  %v1219_v31 = vunpack.c.l.b16 %v899_v28  ;;  %v781_v56 = vrot.slane %v628_v50, 4  ;;  %v686_v61 = vadd.f32 %v685_v55, %v596_v49  ;;  %v6836_v49 = vld [vmem:[%s8072_s10 + $0x210] ss:$8 sps:$4 sm:$0xff]   ;;  %v6845_v55 = vld [vmem:[%s8072_s10 + $0x240] ss:$8 sps:$4 sm:$0xff]  }
  0xdc   : > { %v851_v23 = vmul.f32 0.125, %v678_v20  ;;  %v6823_v20 = vld [vmem:[%s8072_s10 + $0x1c4] ss:$8 sps:$4 sm:$0xff]  }
  0xdd   : > { %2576 = vmatpush1.bf16.msra.mxu0 %v6760_v27  ;;  %v782_v62 = vadd.f32 %v781_v56, %v628_v50  ;;  %v687_v3 = vrot.slane %v686_v61, 2  ;;  %v6841_v50 = vld [vmem:[%s8072_s10 + $0x224] ss:$8 sps:$4 sm:$0xff]   ;;  %v6850_v56 = vld [vmem:[%s8072_s10 + $0x254] ss:$8 sps:$4 sm:$0xff]  }
  0xde   : > { %2577 = vmatprep.subr.bf16.mxu0 %v6761_v30  ;;  %v883_v27 = vpack.c.bf16 %v851_v23, %v851_v23  ;;  %v6821_v23 = vld [vmem:[%s8072_s10 + $0x1c0] ss:$8 sps:$4 sm:$0xff]  }
  0xdf   : > { %v783_v4 = vrot.slane %v782_v62, 2 }
  0xe0   : > { %v1203_v30 = vunpack.c.l.b16 %v883_v27 }
  0xe1   : > { %2578 = vmatpush1.bf16.msra.mxu0 %v6763_v35  ;;  %v6790_v35 = vld [vmem:[%s8072_s10 + $0x114] ss:$8 sps:$4 sm:$0xff]   ;;  %v784_v10 = vadd.f32 %v783_v4, %v782_v62 }
  0xe2   : > { %2579 = vmatprep.subr.bf16.mxu0 %v6764_v38  ;;  %v1236_v34 = vsel %vm1232_vm0, %v1219_v31, %v1203_v30  ;;  %v6793_v38 = vld [vmem:[%s8072_s10 + $0x124] ss:$8 sps:$4 sm:$0xff]   ;;  %v630_v62 = vld [vmem:[%s8070_s8 + $0x138] sm:$0xff] }
  0xe3   : > { %v1252_v36 = vpack.c.b16 %v1236_v34, %v1236_v34  ;;  %v785_v16 = vrot.slane %v784_v10, 1  ;;  %v6829_v30 = vld [vmem:[%s8072_s10 + $0x1e4] ss:$8 sps:$4 sm:$0xff]   ;;  %v793_v4 = vrot.slane %v630_v62, 4 }
  0xe5   : > { %2580 = vmatpush1.bf16.msra.mxu0 %v6766_v43  ;;  %v6797_v43 = vld [vmem:[%s8072_s10 + $0x140] ss:$8 sps:$4 sm:$0xff]  }
  0xe6   : > { %2581 = vmatprep.subr.bf16.mxu0 %v6767_v46  ;;  %v6805_v46 = vld [vmem:[%s8072_s10 + $0x164] ss:$8 sps:$4 sm:$0xff]  }
  0xe9   : > { %2582 = vmatpush1.bf16.msra.mxu0 %v6769_v51  ;;  %v6803_v51 = vld [vmem:[%s8072_s10 + $0x160] ss:$8 sps:$4 sm:$0xff]  }
  0xea   : > { %2583 = vmatprep.subr.bf16.mxu0 %v6770_v54  ;;  %v763_v54 = vrot.slane %v625_v48, 4 }
  0xed   : > { %2584 = vmatpush1.bf16.msra.mxu0 %v6772_v57  ;;  %v6806_v57 = vld [vmem:[%s8072_s10 + $0x170] ss:$8 sps:$4 sm:$0xff]  }
  0xee   : > { %2585 = vmatprep.subr.bf16.mxu0 %v6773_v60  ;;  %v764_v60 = vadd.f32 %v763_v54, %v625_v48  ;;  %v6847_v54 = vld [vmem:[%s8072_s10 + $0x244] ss:$8 sps:$4 sm:$0xff]  }
  0xf0   : > { %v765_v2 = vrot.slane %v764_v60, 2 }
  0xf1   : > { %2586 = vmatpush1.bf16.msra.mxu0 %v6775_v1  ;;  %v669_v1 = vrot.slane %v668_v59, 2 }
  0xf2   : > { %2587 = vmatprep.subr.bf16.mxu0 %v6776_v6  ;;  %v6817_v6 = vld [vmem:[%s8072_s10 + $0x1a4] ss:$8 sps:$4 sm:$0xff]   ;;  %v766_v8 = vadd.f32 %v765_v2, %v764_v60 }
  0xf3   : > { %v670_v7 = vadd.f32 %v669_v1, %v668_v59  ;;  %v595_v59 = vld [vmem:[%s8070_s8 + $0x20] sm:$0xff] }
  0xf4   : > { %v627_v60 = vld [vmem:[%s8070_s8 + $0x120] sm:$0xff]  ;;  %v679_v1 = vrot.slane %v595_v59, 4 }
  0xf5   : > { %2588 = vmatpush1.bf16.msra.mxu0 %v6778_v9  ;;  %v688_v9 = vadd.f32 %v687_v3, %v686_v61  ;;  %v671_v13 = vrot.slane %v670_v7, 1  ;;  %v598_v61 = vld [vmem:[%s8070_s8 + $0x38] sm:$0xff]  ;;  %v775_v2 = vrot.slane %v627_v60, 4 }
  0xf6   : > { %2589 = vmatprep.subr.bf16.mxu0 %v6779_v14  ;;  %v767_v14 = vrot.slane %v766_v8, 1  ;;  %v697_v3 = vrot.slane %v598_v61, 4 }
  0xf7   : > { %v689_v15 = vrot.slane %v688_v9, 1  ;;  %v672_v18 = vadd.f32 %v671_v13, %v670_v7  ;;  %v680_v7 = vadd.f32 %v679_v1, %v595_v59  ;;  %v6886_v59 = vld [vmem:[%s8072_s10 + $0x314] ss:$8 sps:$4 sm:$0xff]   ;;  %v6890_v1 = vld [vmem:[%s8072_s10 + $0x330] ss:$8 sps:$4 sm:$0xff]  }
  0xf8   : > { %v768_v19 = vadd.f32 %v767_v14, %v766_v8  ;;  %v776_v8 = vadd.f32 %v775_v2, %v627_v60  ;;  %v6895_v2 = vld [vmem:[%s8072_s10 + $0x344] ss:$8 sps:$4 sm:$0xff]  }
  0xf9   : > { %2590 = vmatpush1.bf16.msra.mxu0 %v6781_v17  ;;  %v6818_v17 = vld [vmem:[%s8072_s10 + $0x1b0] ss:$8 sps:$4 sm:$0xff]   ;;  %v690_v21 = vadd.f32 %v689_v15, %v688_v9  ;;  %v698_v9 = vadd.f32 %v697_v3, %v598_v61  ;;  %v681_v13 = vrot.slane %v680_v7, 2  ;;  %v6893_v3 = vld [vmem:[%s8072_s10 + $0x340] ss:$8 sps:$4 sm:$0xff]  }
  0xfa   : > { %2591 = vmatprep.subr.bf16.mxu0 %v6782_v22  ;;  %v786_v22 = vadd.f32 %v785_v16, %v784_v10  ;;  %v866_v26 = vmul.f32 0.125, %v768_v19  ;;  %v794_v10 = vadd.f32 %v793_v4, %v630_v62  ;;  %v777_v14 = vrot.slane %v776_v8, 2  ;;  %v6884_v61 = vld [vmem:[%s8072_s10 + $0x310] ss:$8 sps:$4 sm:$0xff]   ;;  %v6889_v62 = vld [vmem:[%s8072_s10 + $0x324] ss:$8 sps:$4 sm:$0xff]  }
  0xfb   : > { %v853_v27 = vmul.f32 0.125, %v690_v21  ;;  %v699_v15 = vrot.slane %v698_v9, 2  ;;  %v682_v19 = vadd.f32 %v681_v13, %v680_v7  ;;  %v6898_v4 = vld [vmem:[%s8072_s10 + $0x354] ss:$8 sps:$4 sm:$0xff]  }
  0xfc   : > { %v869_v28 = vmul.f32 0.125, %v786_v22  ;;  %v795_v16 = vrot.slane %v794_v10, 2  ;;  %v597_v7 = vld [vmem:[%s8070_s8 + $0x30] sm:$0xff] }
  0xfd   : > { %2592 = vmatpush1.bf16.msra.mxu0 %v6784_v25  ;;  %v850_v25 = vmul.f32 0.125, %v672_v18  ;;  %v6865_v18 = vld [vmem:[%s8072_s10 + $0x2a4] ss:$8 sps:$4 sm:$0xff]   ;;  %v700_v21 = vadd.f32 %v699_v15, %v698_v9  ;;  %v691_v13 = vrot.slane %v597_v7, 4 }
  0xfe   : > { %2602 = vmatprep.subr.bf16.mxu0 %v6787_v29  ;;  %v6824_v29 = vld [vmem:[%s8072_s10 + $0x1d0] ss:$8 sps:$4 sm:$0xff]   ;;  %v901_v34 = vpack.c.bf16 %v869_v28, %v869_v28  ;;  %v796_v22 = vadd.f32 %v795_v16, %v794_v10  ;;  %v600_v9 = vld [vmem:[%s8070_s8 + $0x48] sm:$0xff] }
  0xff   : > { %v882_v31 = vpack.c.bf16 %v850_v25, %v850_v25  ;;  %v683_v25 = vrot.slane %v682_v19, 1  ;;  %v632_v10 = vld [vmem:[%s8070_s8 + $0x148] sm:$0xff]  ;;  %v709_v15 = vrot.slane %v600_v9, 4 }
 0x100   : > { %2594 = vmatmul.mubr.bf16.vlgmr.msra.gmra.mrb[0].mxu0 %v1249_v32  ;;  %v898_v32 = vpack.c.bf16 %v866_v26, %v866_v26  ;;  %v797_v28 = vrot.slane %v796_v22, 1  ;;  %v805_v16 = vrot.slane %v632_v10, 4 }
 0x101   : > { %2603 = vmatpush1.bf16.msra.mxu0 %v6785_v33  ;;  %2634 = vmatprep.mubr.bf16.mxu0 %v1252_v36  ;;  %v885_v33 = vpack.c.bf16 %v853_v27, %v853_v27  ;;  %v6832_v36 = vld [vmem:[%s8072_s10 + $0x1f4] ss:$8 sps:$4 sm:$0xff]   ;;  %v701_v27 = vrot.slane %v700_v21, 1 }
 0x102   : > { %2604 = vmatprep.subr.bf16.mxu0 %v6790_v35  ;;  %v6827_v35 = vld [vmem:[%s8072_s10 + $0x1e0] ss:$8 sps:$4 sm:$0xff]  }
 0x105   : > { %2605 = vmatpush1.bf16.msra.mxu0 %v6788_v37  ;;  %v1202_v37 = vunpack.c.l.b16 %v882_v31 }
 0x106   : > { %2606 = vmatprep.subr.bf16.mxu0 %v6793_v38  ;;  %v1218_v38 = vunpack.c.l.b16 %v898_v32  ;;  %v6871_v32 = vld [vmem:[%s8072_s10 + $0x2c4] ss:$8 sps:$4 sm:$0xff]  }
 0x109   : > { %2607 = vmatpush1.bf16.msra.mxu0 %v6791_v39  ;;  %v1205_v39 = vunpack.c.l.b16 %v885_v33  ;;  %v702_v33 = vadd.f32 %v701_v27, %v700_v21  ;;  %v710_v21 = vadd.f32 %v709_v15, %v600_v9  ;;  %v6932_v9 = vld [vmem:[%s8072_s10 + $0x410] ss:$8 sps:$4 sm:$0xff]   ;;  %v6941_v15 = vld [vmem:[%s8072_s10 + $0x440] ss:$8 sps:$4 sm:$0xff]  }
 0x10a   : > { %2608 = vmatprep.subr.bf16.mxu0 %v6796_v40  ;;  %v1221_v40 = vunpack.c.l.b16 %v901_v34  ;;  %v798_v34 = vadd.f32 %v797_v28, %v796_v22  ;;  %v806_v22 = vadd.f32 %v805_v16, %v632_v10  ;;  %v6937_v10 = vld [vmem:[%s8072_s10 + $0x424] ss:$8 sps:$4 sm:$0xff]   ;;  %v6946_v16 = vld [vmem:[%s8072_s10 + $0x454] ss:$8 sps:$4 sm:$0xff]  }
 0x10b   : > { %v711_v27 = vrot.slane %v710_v21, 2 }
 0x10c   : > { %v807_v28 = vrot.slane %v806_v22, 2 }
 0x10d   : > { %2609 = vmatpush1.bf16.msra.mxu0 %v6794_v41  ;;  %v6830_v41 = vld [vmem:[%s8072_s10 + $0x1f0] ss:$8 sps:$4 sm:$0xff]  }
 0x10e   : > { %2610 = vmatprep.subr.bf16.mxu0 %v6799_v42  ;;  %v6835_v42 = vld [vmem:[%s8072_s10 + $0x204] ss:$8 sps:$4 sm:$0xff]  }
 0x111   : > { %2611 = vmatpush1.bf16.msra.mxu0 %v6797_v43  ;;  %v1235_v43 = vsel %vm1232_vm0, %v1218_v38, %v1202_v37 }
 0x112   : > { %2612 = vmatprep.subr.bf16.mxu0 %v6802_v44  ;;  %v1238_v44 = vsel %vm1232_vm0, %v1221_v40, %v1205_v39  ;;  %v855_v39 = vmul.f32 0.125, %v702_v33  ;;  %v871_v40 = vmul.f32 0.125, %v798_v34  ;;  %v712_v33 = vadd.f32 %v711_v27, %v710_v21  ;;  %v602_v21 = vld [vmem:[%s8070_s8 + $0x58] sm:$0xff] }
 0x113   : > { %v1254_v48 = vpack.c.b16 %v1238_v44, %v1238_v44  ;;  %v808_v34 = vadd.f32 %v807_v28, %v806_v22  ;;  %v634_v22 = vld [vmem:[%s8070_s8 + $0x158] sm:$0xff]  ;;  %v721_v27 = vrot.slane %v602_v21, 4 }
 0x114   : > { %v817_v28 = vrot.slane %v634_v22, 4 }
 0x115   : > { %2613 = vmatpush1.bf16.msra.mxu0 %v6800_v45  ;;  %v1251_v45 = vpack.c.b16 %v1235_v43, %v1235_v43 }
 0x116   : > { %2614 = vmatprep.subr.bf16.mxu0 %v6805_v46  ;;  %v6833_v46 = vld [vmem:[%s8072_s10 + $0x200] ss:$8 sps:$4 sm:$0xff]  }
 0x119   : > { %2615 = vmatpush1.bf16.msra.mxu0 %v6803_v51  ;;  %v6839_v51 = vld [vmem:[%s8072_s10 + $0x220] ss:$8 sps:$4 sm:$0xff]  }
 0x11a   : > { %2616 = vmatprep.subr.bf16.mxu0 %v6808_v52  ;;  %v6844_v52 = vld [vmem:[%s8072_s10 + $0x234] ss:$8 sps:$4 sm:$0xff]  }
 0x11d   : > { %2617 = vmatpush1.bf16.msra.mxu0 %v6806_v57  ;;  %v6848_v57 = vld [vmem:[%s8072_s10 + $0x250] ss:$8 sps:$4 sm:$0xff]  }
 0x11e   : > { %2618 = vmatprep.subr.bf16.mxu0 %v6811_v58  ;;  %v6853_v58 = vld [vmem:[%s8072_s10 + $0x264] ss:$8 sps:$4 sm:$0xff]  }
 0x121   : > { %2619 = vmatpush1.bf16.msra.mxu0 %v6809_v63  ;;  %v6851_v63 = vld [vmem:[%s8072_s10 + $0x260] ss:$8 sps:$4 sm:$0xff]  }
 0x122   : > { %2620 = vmatprep.subr.bf16.mxu0 %v6814_v0  ;;  %v6856_v0 = vld [vmem:[%s8072_s10 + $0x274] ss:$8 sps:$4 sm:$0xff]  }
 0x125   : > { %2621 = vmatpush1.bf16.msra.mxu0 %v6812_v5  ;;  %v6854_v5 = vld [vmem:[%s8072_s10 + $0x270] ss:$8 sps:$4 sm:$0xff]  }
 0x126   : > { %2622 = vmatprep.subr.bf16.mxu0 %v6817_v6  ;;  %v6859_v6 = vld [vmem:[%s8072_s10 + $0x284] ss:$8 sps:$4 sm:$0xff]  }
 0x129   : > { %2623 = vmatpush1.bf16.msra.mxu0 %v6815_v11  ;;  %v6857_v11 = vld [vmem:[%s8072_s10 + $0x280] ss:$8 sps:$4 sm:$0xff]  }
 0x12a   : > { %2624 = vmatprep.subr.bf16.mxu0 %v6820_v12  ;;  %v6862_v12 = vld [vmem:[%s8072_s10 + $0x294] ss:$8 sps:$4 sm:$0xff]  }
 0x12d   : > { %2625 = vmatpush1.bf16.msra.mxu0 %v6818_v17  ;;  %v6860_v17 = vld [vmem:[%s8072_s10 + $0x290] ss:$8 sps:$4 sm:$0xff]  }
 0x12e   : > { %2626 = vmatprep.subr.bf16.mxu0 %v6823_v20  ;;  %v778_v20 = vadd.f32 %v777_v14, %v776_v8  ;;  %v629_v8 = vld [vmem:[%s8070_s8 + $0x130] sm:$0xff] }
 0x12f   : > { %v787_v14 = vrot.slane %v629_v8, 4 }
 0x130   : > { %v779_v26 = vrot.slane %v778_v20, 1 }
 0x131   : > { %2627 = vmatpush1.bf16.msra.mxu0 %v6821_v23  ;;  %v6863_v23 = vld [vmem:[%s8072_s10 + $0x2a0] ss:$8 sps:$4 sm:$0xff]  }
 0x132   : > { %2628 = vmatprep.subr.bf16.mxu0 %v6826_v24  ;;  %v6868_v24 = vld [vmem:[%s8072_s10 + $0x2b4] ss:$8 sps:$4 sm:$0xff]   ;;  %v780_v31 = vadd.f32 %v779_v26, %v778_v20  ;;  %v788_v20 = vadd.f32 %v787_v14, %v629_v8  ;;  %v6943_v14 = vld [vmem:[%s8072_s10 + $0x444] ss:$8 sps:$4 sm:$0xff]  }
 0x133   : > { %v6934_v8 = vld [vmem:[%s8072_s10 + $0x414] ss:$8 sps:$4 sm:$0xff]  }
 0x134   : > { %v868_v38 = vmul.f32 0.125, %v780_v31  ;;  %v789_v26 = vrot.slane %v788_v20, 2 }
 0x135   : > { %2629 = vmatpush1.bf16.msra.mxu0 %v6824_v29  ;;  %v6866_v29 = vld [vmem:[%s8072_s10 + $0x2b0] ss:$8 sps:$4 sm:$0xff]  }
 0x136   : > { %2630 = vmatprep.subr.bf16.mxu0 %v6829_v30  ;;  %v684_v30 = vadd.f32 %v683_v25, %v682_v19  ;;  %v900_v44 = vpack.c.bf16 %v868_v38, %v868_v38  ;;  %v692_v19 = vadd.f32 %v691_v13, %v597_v7  ;;  %v6938_v13 = vld [vmem:[%s8072_s10 + $0x430] ss:$8 sps:$4 sm:$0xff]  }
 0x138   : > { %v852_v37 = vmul.f32 0.125, %v684_v30  ;;  %v693_v25 = vrot.slane %v692_v19, 2  ;;  %v6913_v30 = vld [vmem:[%s8072_s10 + $0x3a4] ss:$8 sps:$4 sm:$0xff]  }
 0x139   : > { %2631 = vmatpush1.bf16.msra.mxu0 %v6827_v35  ;;  %v6869_v35 = vld [vmem:[%s8072_s10 + $0x2c0] ss:$8 sps:$4 sm:$0xff]  }
 0x13a   : > { %2632 = vmatprep.subr.bf16.mxu0 %v6832_v36  ;;  %v6874_v36 = vld [vmem:[%s8072_s10 + $0x2d4] ss:$8 sps:$4 sm:$0xff]   ;;  %v884_v43 = vpack.c.bf16 %v852_v37, %v852_v37  ;;  %v694_v31 = vadd.f32 %v693_v25, %v692_v19  ;;  %v599_v19 = vld [vmem:[%s8070_s8 + $0x40] sm:$0xff] }
 0x13c   : > { %v695_v37 = vrot.slane %v694_v31, 1 }
 0x13d   : > { %2633 = vmatpush1.bf16.msra.mxu0 %v6830_v41  ;;  %v6872_v41 = vld [vmem:[%s8072_s10 + $0x2d0] ss:$8 sps:$4 sm:$0xff]  }
 0x13e   : > { %2643 = vmatprep.subr.bf16.mxu0 %v6835_v42  ;;  %v6877_v42 = vld [vmem:[%s8072_s10 + $0x2e4] ss:$8 sps:$4 sm:$0xff]  }
 0x140   : > { %2635 = vmatmul.mubr.bf16.vlgmr.msra.gmra.mrb[0].mxu0 %v1251_v45  ;;  %v887_v45 = vpack.c.bf16 %v855_v39, %v855_v39  ;;  %v713_v39 = vrot.slane %v712_v33, 1 }
 0x141   : > { %2644 = vmatpush1.bf16.msra.mxu0 %v6833_v46  ;;  %2675 = vmatprep.mubr.bf16.mxu0 %v1254_v48  ;;  %v903_v46 = vpack.c.bf16 %v871_v40, %v871_v40  ;;  %v6880_v48 = vld [vmem:[%s8072_s10 + $0x2f4] ss:$8 sps:$4 sm:$0xff]   ;;  %v809_v40 = vrot.slane %v808_v34, 1 }
 0x142   : > { %2645 = vmatprep.subr.bf16.mxu0 %v6838_v47  ;;  %v6875_v47 = vld [vmem:[%s8072_s10 + $0x2e0] ss:$8 sps:$4 sm:$0xff]  }
 0x145   : > { %2646 = vmatpush1.bf16.msra.mxu0 %v6836_v49  ;;  %v1204_v49 = vunpack.c.l.b16 %v884_v43 }
 0x146   : > { %2647 = vmatprep.subr.bf16.mxu0 %v6841_v50  ;;  %v1220_v50 = vunpack.c.l.b16 %v900_v44  ;;  %v6919_v44 = vld [vmem:[%s8072_s10 + $0x3c4] ss:$8 sps:$4 sm:$0xff]  }
 0x149   : > { %2648 = vmatpush1.bf16.msra.mxu0 %v6839_v51  ;;  %v1207_v51 = vunpack.c.l.b16 %v887_v45  ;;  %v714_v45 = vadd.f32 %v713_v39, %v712_v33  ;;  %v722_v33 = vadd.f32 %v721_v27, %v602_v21  ;;  %v6980_v21 = vld [vmem:[%s8072_s10 + $0x510] ss:$8 sps:$4 sm:$0xff]   ;;  %v6989_v27 = vld [vmem:[%s8072_s10 + $0x540] ss:$8 sps:$4 sm:$0xff]  }
 0x14a   : > { %2649 = vmatprep.subr.bf16.mxu0 %v6844_v52  ;;  %v1223_v52 = vunpack.c.l.b16 %v903_v46  ;;  %v810_v46 = vadd.f32 %v809_v40, %v808_v34  ;;  %v818_v34 = vadd.f32 %v817_v28, %v634_v22  ;;  %v6985_v22 = vld [vmem:[%s8072_s10 + $0x524] ss:$8 sps:$4 sm:$0xff]   ;;  %v6994_v28 = vld [vmem:[%s8072_s10 + $0x554] ss:$8 sps:$4 sm:$0xff]  }
 0x14b   : > { %v723_v39 = vrot.slane %v722_v33, 2 }
 0x14c   : > { %v819_v40 = vrot.slane %v818_v34, 2 }
 0x14d   : > { %2650 = vmatpush1.bf16.msra.mxu0 %v6842_v53  ;;  %v6878_v53 = vld [vmem:[%s8072_s10 + $0x2f0] ss:$8 sps:$4 sm:$0xff]  }
 0x14e   : > { %2651 = vmatprep.subr.bf16.mxu0 %v6847_v54  ;;  %v6883_v54 = vld [vmem:[%s8072_s10 + $0x304] ss:$8 sps:$4 sm:$0xff]  }
 0x151   : > { %2652 = vmatpush1.bf16.msra.mxu0 %v6845_v55  ;;  %v1237_v55 = vsel %vm1232_vm0, %v1220_v50, %v1204_v49 }
 0x152   : > { %2653 = vmatprep.subr.bf16.mxu0 %v6850_v56  ;;  %v1240_v56 = vsel %vm1232_vm0, %v1223_v52, %v1207_v51  ;;  %v857_v51 = vmul.f32 0.125, %v714_v45  ;;  %v873_v52 = vmul.f32 0.125, %v810_v46  ;;  %v724_v45 = vadd.f32 %v723_v39, %v722_v33  ;;  %v604_v33 = vld [vmem:[%s8070_s8 + $0x68] sm:$0xff] }
 0x153   : > { %v1256_v60 = vpack.c.b16 %v1240_v56, %v1240_v56  ;;  %v6925_v56 = vld [vmem:[%s8072_s10 + $0x3e4] ss:$8 sps:$4 sm:$0xff]   ;;  %v820_v46 = vadd.f32 %v819_v40, %v818_v34  ;;  %v733_v39 = vrot.slane %v604_v33, 4 }
 0x154   : > { %v636_v34 = vld [vmem:[%s8070_s8 + $0x168] sm:$0xff] }
 0x155   : > { %2654 = vmatpush1.bf16.msra.mxu0 %v6848_v57  ;;  %v1253_v57 = vpack.c.b16 %v1237_v55, %v1237_v55  ;;  %v829_v40 = vrot.slane %v636_v34, 4 }
 0x156   : > { %2655 = vmatprep.subr.bf16.mxu0 %v6853_v58  ;;  %v6881_v58 = vld [vmem:[%s8072_s10 + $0x300] ss:$8 sps:$4 sm:$0xff]  }
 0x159   : > { %2656 = vmatpush1.bf16.msra.mxu0 %v6851_v63  ;;  %v6887_v63 = vld [vmem:[%s8072_s10 + $0x320] ss:$8 sps:$4 sm:$0xff]  }
 0x15a   : > { %2657 = vmatprep.subr.bf16.mxu0 %v6856_v0  ;;  %v6892_v0 = vld [vmem:[%s8072_s10 + $0x334] ss:$8 sps:$4 sm:$0xff]  }
 0x15d   : > { %2658 = vmatpush1.bf16.msra.mxu0 %v6854_v5  ;;  %v6896_v5 = vld [vmem:[%s8072_s10 + $0x350] ss:$8 sps:$4 sm:$0xff]  }
 0x15e   : > { %2659 = vmatprep.subr.bf16.mxu0 %v6859_v6  ;;  %v6901_v6 = vld [vmem:[%s8072_s10 + $0x364] ss:$8 sps:$4 sm:$0xff]  }
 0x161   : > { %2660 = vmatpush1.bf16.msra.mxu0 %v6857_v11  ;;  %v6899_v11 = vld [vmem:[%s8072_s10 + $0x360] ss:$8 sps:$4 sm:$0xff]  }
 0x162   : > { %2661 = vmatprep.subr.bf16.mxu0 %v6862_v12  ;;  %v6904_v12 = vld [vmem:[%s8072_s10 + $0x374] ss:$8 sps:$4 sm:$0xff]  }
 0x165   : > { %2662 = vmatpush1.bf16.msra.mxu0 %v6860_v17  ;;  %v6902_v17 = vld [vmem:[%s8072_s10 + $0x370] ss:$8 sps:$4 sm:$0xff]  }
 0x166   : > { %2663 = vmatprep.subr.bf16.mxu0 %v6865_v18  ;;  %v6907_v18 = vld [vmem:[%s8072_s10 + $0x384] ss:$8 sps:$4 sm:$0xff]  }
 0x169   : > { %2664 = vmatpush1.bf16.msra.mxu0 %v6863_v23  ;;  %v6905_v23 = vld [vmem:[%s8072_s10 + $0x380] ss:$8 sps:$4 sm:$0xff]  }
 0x16a   : > { %2665 = vmatprep.subr.bf16.mxu0 %v6868_v24  ;;  %v6910_v24 = vld [vmem:[%s8072_s10 + $0x394] ss:$8 sps:$4 sm:$0xff]  }
 0x16d   : > { %2666 = vmatpush1.bf16.msra.mxu0 %v6866_v29  ;;  %v6908_v29 = vld [vmem:[%s8072_s10 + $0x390] ss:$8 sps:$4 sm:$0xff]  }
 0x16e   : > { %2667 = vmatprep.subr.bf16.mxu0 %v6871_v32  ;;  %v790_v32 = vadd.f32 %v789_v26, %v788_v20  ;;  %v631_v20 = vld [vmem:[%s8070_s8 + $0x140] sm:$0xff]  ;;  %v6952_v26 = vld [vmem:[%s8072_s10 + $0x474] ss:$8 sps:$4 sm:$0xff]  }
 0x16f   : > { %v799_v25 = vrot.slane %v631_v20, 4 }
 0x170   : > { %v791_v38 = vrot.slane %v790_v32, 1 }
 0x171   : > { %2668 = vmatpush1.bf16.msra.mxu0 %v6869_v35  ;;  %v6911_v35 = vld [vmem:[%s8072_s10 + $0x3a0] ss:$8 sps:$4 sm:$0xff]  }
 0x172   : > { %2669 = vmatprep.subr.bf16.mxu0 %v6874_v36  ;;  %v6916_v36 = vld [vmem:[%s8072_s10 + $0x3b4] ss:$8 sps:$4 sm:$0xff]   ;;  %v792_v43 = vadd.f32 %v791_v38, %v790_v32  ;;  %v6955_v32 = vld [vmem:[%s8072_s10 + $0x484] ss:$8 sps:$4 sm:$0xff]  }
 0x173   : > { %v6958_v38 = vld [vmem:[%s8072_s10 + $0x494] ss:$8 sps:$4 sm:$0xff]  }
 0x174   : > { %v870_v50 = vmul.f32 0.125, %v792_v43 }
 0x175   : > { %2670 = vmatpush1.bf16.msra.mxu0 %v6872_v41  ;;  %v6914_v41 = vld [vmem:[%s8072_s10 + $0x3b0] ss:$8 sps:$4 sm:$0xff]  }
 0x176   : > { %2671 = vmatprep.subr.bf16.mxu0 %v6877_v42  ;;  %v696_v42 = vadd.f32 %v695_v37, %v694_v31  ;;  %v902_v55 = vpack.c.bf16 %v870_v50, %v870_v50  ;;  %v800_v31 = vadd.f32 %v799_v25, %v631_v20  ;;  %v6964_v50 = vld [vmem:[%s8072_s10 + $0x4b4] ss:$8 sps:$4 sm:$0xff]   ;;  %v6986_v25 = vld [vmem:[%s8072_s10 + $0x530] ss:$8 sps:$4 sm:$0xff]  }
 0x177   : > { %v6982_v20 = vld [vmem:[%s8072_s10 + $0x514] ss:$8 sps:$4 sm:$0xff]  }
 0x178   : > { %v854_v49 = vmul.f32 0.125, %v696_v42  ;;  %v801_v37 = vrot.slane %v800_v31, 2 }
 0x179   : > { %2672 = vmatpush1.bf16.msra.mxu0 %v6875_v47  ;;  %v6917_v47 = vld [vmem:[%s8072_s10 + $0x3c0] ss:$8 sps:$4 sm:$0xff]  }
 0x17a   : > { %2673 = vmatprep.subr.bf16.mxu0 %v6880_v48  ;;  %v6922_v48 = vld [vmem:[%s8072_s10 + $0x3d4] ss:$8 sps:$4 sm:$0xff]   ;;  %v802_v43 = vadd.f32 %v801_v37, %v800_v31 }
 0x17b   : > { %v601_v31 = vld [vmem:[%s8070_s8 + $0x50] sm:$0xff] }
 0x17d   : > { %2674 = vmatpush1.bf16.msra.mxu0 %v6878_v53  ;;  %v6920_v53 = vld [vmem:[%s8072_s10 + $0x3d0] ss:$8 sps:$4 sm:$0xff]  }
 0x17e   : > { %2684 = vmatprep.subr.bf16.mxu0 %v6883_v54  ;;  %v886_v54 = vpack.c.bf16 %v854_v49, %v854_v49  ;;  %v803_v49 = vrot.slane %v802_v43, 1 }
 0x180   : > { %2676 = vmatmul.mubr.bf16.vlgmr.msra.gmra.mrb[0].mxu0 %v1253_v57  ;;  %v889_v57 = vpack.c.bf16 %v857_v51, %v857_v51  ;;  %v725_v51 = vrot.slane %v724_v45, 1 }
 0x181   : > { %2685 = vmatpush1.bf16.msra.mxu0 %v6881_v58  ;;  %2716 = vmatprep.mubr.bf16.mxu0 %v1256_v60  ;;  %v905_v58 = vpack.c.bf16 %v873_v52, %v873_v52  ;;  %v1206_v60 = vunpack.c.l.b16 %v886_v54  ;;  %v821_v52 = vrot.slane %v820_v46, 1 }
 0x182   : > { %2686 = vmatprep.subr.bf16.mxu0 %v6886_v59  ;;  %v6923_v59 = vld [vmem:[%s8072_s10 + $0x3e0] ss:$8 sps:$4 sm:$0xff]  }
 0x185   : > { %2687 = vmatpush1.bf16.msra.mxu0 %v6884_v61  ;;  %v1222_v61 = vunpack.c.l.b16 %v902_v55  ;;  %v804_v55 = vadd.f32 %v803_v49, %v802_v43 }
 0x186   : > { %2688 = vmatprep.subr.bf16.mxu0 %v6889_v62  ;;  %v6928_v62 = vld [vmem:[%s8072_s10 + $0x3f4] ss:$8 sps:$4 sm:$0xff]  }
 0x189   : > { %2689 = vmatpush1.bf16.msra.mxu0 %v6887_v63  ;;  %v1209_v63 = vunpack.c.l.b16 %v889_v57  ;;  %v726_v57 = vadd.f32 %v725_v51, %v724_v45  ;;  %v734_v45 = vadd.f32 %v733_v39, %v604_v33  ;;  %v7028_v33 = vld [vmem:[%s8072_s10 + $0x610] ss:$8 sps:$4 sm:$0xff]  }
 0x18a   : > { %2690 = vmatprep.subr.bf16.mxu0 %v6892_v0  ;;  %v1225_v0 = vunpack.c.l.b16 %v905_v58  ;;  %v822_v58 = vadd.f32 %v821_v52, %v820_v46  ;;  %v830_v46 = vadd.f32 %v829_v40, %v636_v34  ;;  %v7033_v34 = vld [vmem:[%s8072_s10 + $0x624] ss:$8 sps:$4 sm:$0xff]   ;;  %v606_v39 = vld [vmem:[%s8070_s8 + $0x78] sm:$0xff] }
 0x18b   : > { %v735_v51 = vrot.slane %v734_v45, 2  ;;  %v638_v40 = vld [vmem:[%s8070_s8 + $0x178] sm:$0xff] }
 0x18c   : > { %v831_v52 = vrot.slane %v830_v46, 2 }
 0x18d   : > { %2691 = vmatpush1.bf16.msra.mxu0 %v6890_v1  ;;  %v6926_v1 = vld [vmem:[%s8072_s10 + $0x3f0] ss:$8 sps:$4 sm:$0xff]  }
 0x18e   : > { %2692 = vmatprep.subr.bf16.mxu0 %v6895_v2  ;;  %v1239_v2 = vsel %vm1232_vm0, %v1222_v61, %v1206_v60  ;;  %v872_v61 = vmul.f32 0.125, %v804_v55 }
 0x191   : > { %2693 = vmatpush1.bf16.msra.mxu0 %v6893_v3  ;;  %v6931_v3 = vld [vmem:[%s8072_s10 + $0x404] ss:$8 sps:$4 sm:$0xff]  }
 0x192   : > { %2694 = vmatprep.subr.bf16.mxu0 %v6898_v4  ;;  %v1242_v4 = vsel %vm1232_vm0, %v1225_v0, %v1209_v63  ;;  %v859_v63 = vmul.f32 0.125, %v726_v57  ;;  %v875_v0 = vmul.f32 0.125, %v822_v58  ;;  %v736_v57 = vadd.f32 %v735_v51, %v734_v45  ;;  %v7125_v51 = vld [vmem:[%s8342_s11 + $0x50] sm:$0xff]  }
 0x193   : > { %v1258_v7 = vpack.c.b16 %v1242_v4, %v1242_v4  ;;  %v6973_v4 = vld [vmem:[%s8072_s10 + $0x4e4] ss:$8 sps:$4 sm:$0xff]   ;;  %v832_v58 = vadd.f32 %v831_v52, %v830_v46  ;;  %v7037_v52 = vld [vmem:[%s8072_s10 + $0x640] ss:$8 sps:$4 sm:$0xff]  }
 0x194   : > { %v7122_v46 = vld [vmem:[%s8342_s11] sm:$0xff]  }
 0x195   : > { %2695 = vmatpush1.bf16.msra.mxu0 %v6896_v5  ;;  %v1255_v5 = vpack.c.b16 %v1239_v2, %v1239_v2 }
 0x196   : > { %2696 = vmatprep.subr.bf16.mxu0 %v6901_v6  ;;  %v6929_v6 = vld [vmem:[%s8072_s10 + $0x400] ss:$8 sps:$4 sm:$0xff]  }
 0x199   : > { %2697 = vmatpush1.bf16.msra.mxu0 %v6899_v11  ;;  %v6935_v11 = vld [vmem:[%s8072_s10 + $0x420] ss:$8 sps:$4 sm:$0xff]  }
 0x19a   : > { %2698 = vmatprep.subr.bf16.mxu0 %v6904_v12  ;;  %v6940_v12 = vld [vmem:[%s8072_s10 + $0x434] ss:$8 sps:$4 sm:$0xff]  }
 0x19d   : > { %2699 = vmatpush1.bf16.msra.mxu0 %v6902_v17  ;;  %v6944_v17 = vld [vmem:[%s8072_s10 + $0x450] ss:$8 sps:$4 sm:$0xff]  }
 0x19e   : > { %2700 = vmatprep.subr.bf16.mxu0 %v6907_v18  ;;  %v6949_v18 = vld [vmem:[%s8072_s10 + $0x464] ss:$8 sps:$4 sm:$0xff]  }
 0x1a1   : > { %2701 = vmatpush1.bf16.msra.mxu0 %v6905_v23  ;;  %v6947_v23 = vld [vmem:[%s8072_s10 + $0x460] ss:$8 sps:$4 sm:$0xff]  }
 0x1a2   : > { %2702 = vmatprep.subr.bf16.mxu0 %v6910_v24  ;;  %v703_v24 = vrot.slane %v599_v19, 4 }
 0x1a5   : > { %2703 = vmatpush1.bf16.msra.mxu0 %v6908_v29  ;;  %v6950_v29 = vld [vmem:[%s8072_s10 + $0x470] ss:$8 sps:$4 sm:$0xff]  }
 0x1a6   : > { %2704 = vmatprep.subr.bf16.mxu0 %v6913_v30  ;;  %v704_v30 = vadd.f32 %v703_v24, %v599_v19  ;;  %v6988_v24 = vld [vmem:[%s8072_s10 + $0x534] ss:$8 sps:$4 sm:$0xff]  }
 0x1a9   : > { %2705 = vmatpush1.bf16.msra.mxu0 %v6911_v35  ;;  %v6953_v35 = vld [vmem:[%s8072_s10 + $0x480] ss:$8 sps:$4 sm:$0xff]  }
 0x1aa   : > { %2706 = vmatprep.subr.bf16.mxu0 %v6916_v36  ;;  %v705_v36 = vrot.slane %v704_v30, 2 }
 0x1ac   : > { %v706_v42 = vadd.f32 %v705_v36, %v704_v30  ;;  %v6997_v30 = vld [vmem:[%s8072_s10 + $0x564] ss:$8 sps:$4 sm:$0xff]   ;;  %v715_v36 = vrot.slane %v601_v31, 4 }
 0x1ad   : > { %2707 = vmatpush1.bf16.msra.mxu0 %v6914_v41  ;;  %v6956_v41 = vld [vmem:[%s8072_s10 + $0x490] ss:$8 sps:$4 sm:$0xff]  }
 0x1ae   : > { %2708 = vmatprep.subr.bf16.mxu0 %v6919_v44  ;;  %v6961_v44 = vld [vmem:[%s8072_s10 + $0x4a4] ss:$8 sps:$4 sm:$0xff]  }
 0x1b1   : > { %2709 = vmatpush1.bf16.msra.mxu0 %v6917_v47  ;;  %v6959_v47 = vld [vmem:[%s8072_s10 + $0x4a0] ss:$8 sps:$4 sm:$0xff]  }
 0x1b2   : > { %2710 = vmatprep.subr.bf16.mxu0 %v6922_v48  ;;  %v707_v48 = vrot.slane %v706_v42, 1 }
 0x1b4   : > { %v708_v54 = vadd.f32 %v707_v48, %v706_v42  ;;  %v716_v42 = vadd.f32 %v715_v36, %v601_v31  ;;  %v7031_v36 = vld [vmem:[%s8072_s10 + $0x620] ss:$8 sps:$4 sm:$0xff]  }
 0x1b5   : > { %2711 = vmatpush1.bf16.msra.mxu0 %v6920_v53  ;;  %v6962_v53 = vld [vmem:[%s8072_s10 + $0x4b0] ss:$8 sps:$4 sm:$0xff]  }
 0x1b6   : > { %2712 = vmatprep.subr.bf16.mxu0 %v6925_v56  ;;  %v6967_v56 = vld [vmem:[%s8072_s10 + $0x4c4] ss:$8 sps:$4 sm:$0xff]   ;;  %v856_v60 = vmul.f32 0.125, %v708_v54  ;;  %v717_v48 = vrot.slane %v716_v42, 2 }
 0x1b8   : > { %v888_v2 = vpack.c.bf16 %v856_v60, %v856_v60  ;;  %v718_v54 = vadd.f32 %v717_v48, %v716_v42  ;;  %v7123_v48 = vld [vmem:[%s8342_s11 + $0x48] sm:$0xff]  }
 0x1b9   : > { %2713 = vmatpush1.bf16.msra.mxu0 %v6923_v59  ;;  %v6965_v59 = vld [vmem:[%s8072_s10 + $0x4c0] ss:$8 sps:$4 sm:$0xff]  }
 0x1ba   : > { %2714 = vmatprep.subr.bf16.mxu0 %v6928_v62  ;;  %v6970_v62 = vld [vmem:[%s8072_s10 + $0x4d4] ss:$8 sps:$4 sm:$0xff]   ;;  %v719_v60 = vrot.slane %v718_v54, 1 }
 0x1bd   : > { %2715 = vmatpush1.bf16.msra.mxu0 %v6926_v1  ;;  %v6968_v1 = vld [vmem:[%s8072_s10 + $0x4d0] ss:$8 sps:$4 sm:$0xff]  }
 0x1be   : > { %2725 = vmatprep.subr.bf16.mxu0 %v6931_v3  ;;  %v904_v3 = vpack.c.bf16 %v872_v61, %v872_v61 }
 0x1c0   : > { %2717 = vmatmul.mubr.bf16.vlgmr.msra.gmra.mrb[0].mxu0 %v1255_v5  ;;  %v891_v5 = vpack.c.bf16 %v859_v63, %v859_v63  ;;  %v737_v63 = vrot.slane %v736_v57, 1 }
 0x1c1   : > { %2726 = vmatpush1.bf16.msra.mxu0 %v6929_v6  ;;  %2757 = vmatprep.mubr.bf16.mxu0 %v1258_v7  ;;  %v907_v6 = vpack.c.bf16 %v875_v0, %v875_v0  ;;  %v6971_v7 = vld [vmem:[%s8072_s10 + $0x4e0] ss:$8 sps:$4 sm:$0xff]   ;;  %v833_v0 = vrot.slane %v832_v58, 1 }
 0x1c2   : > { %2727 = vmatprep.subr.bf16.mxu0 %v6934_v8  ;;  %v1208_v8 = vunpack.c.l.b16 %v888_v2  ;;  %v720_v2 = vadd.f32 %v719_v60, %v718_v54  ;;  %v7127_v60 = vld [vmem:[%s8342_s11 + $0x58] sm:$0xff]  }
 0x1c5   : > { %2728 = vmatpush1.bf16.msra.mxu0 %v6932_v9  ;;  %v1224_v9 = vunpack.c.l.b16 %v904_v3 }
 0x1c6   : > { %2729 = vmatprep.subr.bf16.mxu0 %v6937_v10  ;;  %v6976_v10 = vld [vmem:[%s8072_s10 + $0x4f4] ss:$8 sps:$4 sm:$0xff]  }
 0x1c9   : > { %2730 = vmatpush1.bf16.msra.mxu0 %v6935_v11  ;;  %v1211_v11 = vunpack.c.l.b16 %v891_v5  ;;  %v738_v5 = vadd.f32 %v737_v63, %v736_v57 }
 0x1ca   : > { %2731 = vmatprep.subr.bf16.mxu0 %v6940_v12  ;;  %v1227_v12 = vunpack.c.l.b16 %v907_v6  ;;  %v834_v6 = vadd.f32 %v833_v0, %v832_v58  ;;  %v7126_v58 = vld [vmem:[%s8342_s11 + $0x10] sm:$0xff]  }
 0x1cd   : > { %2732 = vmatpush1.bf16.msra.mxu0 %v6938_v13  ;;  %v6974_v13 = vld [vmem:[%s8072_s10 + $0x4f0] ss:$8 sps:$4 sm:$0xff]  }
 0x1ce   : > { %2733 = vmatprep.subr.bf16.mxu0 %v6943_v14  ;;  %v1241_v14 = vsel %vm1232_vm0, %v1224_v9, %v1208_v8  ;;  %v858_v8 = vmul.f32 0.125, %v720_v2 }
 0x1d1   : > { %2734 = vmatpush1.bf16.msra.mxu0 %v6941_v15  ;;  %v6979_v15 = vld [vmem:[%s8072_s10 + $0x504] ss:$8 sps:$4 sm:$0xff]  }
 0x1d2   : > { %2735 = vmatprep.subr.bf16.mxu0 %v6946_v16  ;;  %v1244_v16 = vsel %vm1232_vm0, %v1227_v12, %v1211_v11  ;;  %v861_v11 = vmul.f32 0.125, %v738_v5  ;;  %v877_v12 = vmul.f32 0.125, %v834_v6  ;;  %v7048_v5 = vld [vmem:[%s8072_s10 + $0x674] ss:$8 sps:$4 sm:$0xff]   ;;  %v7130_v6 = vld [vmem:[%s8342_s11 + $0x20] sm:$0xff]  }
 0x1d3   : > { %v1260_v19 = vpack.c.b16 %v1244_v16, %v1244_v16  ;;  %v7021_v16 = vld [vmem:[%s8072_s10 + $0x5e4] ss:$8 sps:$4 sm:$0xff]  }
 0x1d5   : > { %2736 = vmatpush1.bf16.msra.mxu0 %v6944_v17  ;;  %v1257_v17 = vpack.c.b16 %v1241_v14, %v1241_v14  ;;  %v890_v14 = vpack.c.bf16 %v858_v8, %v858_v8  ;;  %v7046_v8 = vld [vmem:[%s8072_s10 + $0x670] ss:$8 sps:$4 sm:$0xff]  }
 0x1d6   : > { %2737 = vmatprep.subr.bf16.mxu0 %v6949_v18  ;;  %v6977_v18 = vld [vmem:[%s8072_s10 + $0x500] ss:$8 sps:$4 sm:$0xff]  }
 0x1d9   : > { %2738 = vmatpush1.bf16.msra.mxu0 %v6947_v23  ;;  %v6983_v23 = vld [vmem:[%s8072_s10 + $0x520] ss:$8 sps:$4 sm:$0xff]  }
 0x1da   : > { %2739 = vmatprep.subr.bf16.mxu0 %v6952_v26  ;;  %v6991_v26 = vld [vmem:[%s8072_s10 + $0x544] ss:$8 sps:$4 sm:$0xff]  }
 0x1dd   : > { %2740 = vmatpush1.bf16.msra.mxu0 %v6950_v29  ;;  %v6992_v29 = vld [vmem:[%s8072_s10 + $0x550] ss:$8 sps:$4 sm:$0xff]  }
 0x1de   : > { %2741 = vmatprep.subr.bf16.mxu0 %v6955_v32  ;;  %v633_v32 = vld [vmem:[%s8070_s8 + $0x150] sm:$0xff] }
 0x1df   : > { %v811_v37 = vrot.slane %v633_v32, 4 }
 0x1e1   : > { %2742 = vmatpush1.bf16.msra.mxu0 %v6953_v35  ;;  %v6995_v35 = vld [vmem:[%s8072_s10 + $0x560] ss:$8 sps:$4 sm:$0xff]   ;;  %v812_v43 = vadd.f32 %v811_v37, %v633_v32  ;;  %v7030_v32 = vld [vmem:[%s8072_s10 + $0x614] ss:$8 sps:$4 sm:$0xff]  }
 0x1e2   : > { %2743 = vmatprep.subr.bf16.mxu0 %v6958_v38  ;;  %v7000_v38 = vld [vmem:[%s8072_s10 + $0x574] ss:$8 sps:$4 sm:$0xff]   ;;  %v635_v37 = vld [vmem:[%s8070_s8 + $0x160] sm:$0xff] }
 0x1e3   : > { %v813_v49 = vrot.slane %v812_v43, 2  ;;  %v823_v45 = vrot.slane %v635_v37, 4 }
 0x1e5   : > { %2744 = vmatpush1.bf16.msra.mxu0 %v6956_v41  ;;  %v6998_v41 = vld [vmem:[%s8072_s10 + $0x570] ss:$8 sps:$4 sm:$0xff]   ;;  %v814_v55 = vadd.f32 %v813_v49, %v812_v43  ;;  %v7121_v43 = vld [vmem:[%s8342_s11 + $0x40] sm:$0xff]   ;;  %v841_v49 = vrot.slane %v638_v40, 4  ;;  %v824_v54 = vadd.f32 %v823_v45, %v635_v37 }
 0x1e6   : > { %2745 = vmatprep.subr.bf16.mxu0 %v6961_v44  ;;  %v7003_v44 = vld [vmem:[%s8072_s10 + $0x584] ss:$8 sps:$4 sm:$0xff]   ;;  %6591 = vmatprep.subr.bf16.mxu1 %v7121_v43  ;;  %v7064_v37 = vld [vmem:[%s8072_s10 + $0x6d0] ss:$8 sps:$4 sm:$0xff]   ;;  %v7067_v43 = vld [vmem:[%s8072_s10 + $0x6e0] ss:$8 sps:$4 sm:$0xff]  }
 0x1e7   : > { %v815_v61 = vrot.slane %v814_v55, 1  ;;  %6592 = vmatpush3.bf16.msra.mxu1 %v7122_v46  ;;  %v842_v57 = vadd.f32 %v841_v49, %v638_v40  ;;  %v825_v63 = vrot.slane %v824_v54, 2  ;;  %v7069_v40 = vld [vmem:[%s8072_s10 + $0x6e4] ss:$8 sps:$4 sm:$0xff]   ;;  %v7072_v46 = vld [vmem:[%s8072_s10 + $0x6f4] ss:$8 sps:$4 sm:$0xff]  }
 0x1e8   : > { %6593 = vmatprep.subr.bf16.mxu1 %v7123_v48  ;;  %v7070_v49 = vld [vmem:[%s8072_s10 + $0x6f0] ss:$8 sps:$4 sm:$0xff]  }
 0x1e9   : > { %2746 = vmatpush1.bf16.msra.mxu0 %v6959_v47  ;;  %v7001_v47 = vld [vmem:[%s8072_s10 + $0x580] ss:$8 sps:$4 sm:$0xff]   ;;  %v816_v3 = vadd.f32 %v815_v61, %v814_v55  ;;  %v7042_v55 = vld [vmem:[%s8072_s10 + $0x654] ss:$8 sps:$4 sm:$0xff]   ;;  %v7045_v61 = vld [vmem:[%s8072_s10 + $0x664] ss:$8 sps:$4 sm:$0xff]  }
 0x1ea   : > { %2747 = vmatprep.subr.bf16.mxu0 %v6964_v50  ;;  %v7006_v50 = vld [vmem:[%s8072_s10 + $0x594] ss:$8 sps:$4 sm:$0xff]   ;;  %v843_v2 = vrot.slane %v842_v57, 2 }
 0x1eb   : > { %v874_v9 = vmul.f32 0.125, %v816_v3  ;;  %v7129_v3 = vld [vmem:[%s8342_s11 + $0x60] sm:$0xff]  }
 0x1ed   : > { %2748 = vmatpush1.bf16.msra.mxu0 %v6962_v53  ;;  %v7004_v53 = vld [vmem:[%s8072_s10 + $0x590] ss:$8 sps:$4 sm:$0xff]  }
 0x1ee   : > { %2749 = vmatprep.subr.bf16.mxu0 %v6967_v56  ;;  %v7009_v56 = vld [vmem:[%s8072_s10 + $0x5a4] ss:$8 sps:$4 sm:$0xff]  }
 0x1f1   : > { %2750 = vmatpush1.bf16.msra.mxu0 %v6965_v59  ;;  %v7007_v59 = vld [vmem:[%s8072_s10 + $0x5a0] ss:$8 sps:$4 sm:$0xff]  }
 0x1f2   : > { %2751 = vmatprep.subr.bf16.mxu0 %v6970_v62  ;;  %v7012_v62 = vld [vmem:[%s8072_s10 + $0x5b4] ss:$8 sps:$4 sm:$0xff]  }
 0x1f5   : > { %2752 = vmatpush1.bf16.msra.mxu0 %v6968_v1  ;;  %v7010_v1 = vld [vmem:[%s8072_s10 + $0x5b0] ss:$8 sps:$4 sm:$0xff]  }
 0x1f6   : > { %2753 = vmatprep.subr.bf16.mxu0 %v6973_v4  ;;  %v7015_v4 = vld [vmem:[%s8072_s10 + $0x5c4] ss:$8 sps:$4 sm:$0xff]  }
 0x1f9   : > { %2754 = vmatpush1.bf16.msra.mxu0 %v6971_v7  ;;  %v7013_v7 = vld [vmem:[%s8072_s10 + $0x5c0] ss:$8 sps:$4 sm:$0xff]  }
 0x1fa   : > { %2755 = vmatprep.subr.bf16.mxu0 %v6976_v10  ;;  %v7018_v10 = vld [vmem:[%s8072_s10 + $0x5d4] ss:$8 sps:$4 sm:$0xff]  }
 0x1fd   : > { %2756 = vmatpush1.bf16.msra.mxu0 %v6974_v13  ;;  %v7016_v13 = vld [vmem:[%s8072_s10 + $0x5d0] ss:$8 sps:$4 sm:$0xff]  }
 0x1fe   : > { %2766 = vmatprep.subr.bf16.mxu0 %v6979_v15  ;;  %v906_v15 = vpack.c.bf16 %v874_v9, %v874_v9  ;;  %v7051_v9 = vld [vmem:[%s8072_s10 + $0x684] ss:$8 sps:$4 sm:$0xff]  }
 0x200   : > { %2758 = vmatmul.mubr.bf16.vlgmr.msra.gmra.mrb[0].mxu0 %v1257_v17  ;;  %v893_v17 = vpack.c.bf16 %v861_v11, %v861_v11  ;;  %v7049_v11 = vld [vmem:[%s8072_s10 + $0x680] ss:$8 sps:$4 sm:$0xff]  }
 0x201   : > { %2767 = vmatpush1.bf16.msra.mxu0 %v6977_v18  ;;  %2798 = vmatprep.mubr.bf16.mxu0 %v1260_v19  ;;  %v909_v18 = vpack.c.bf16 %v877_v12, %v877_v12  ;;  %v7019_v19 = vld [vmem:[%s8072_s10 + $0x5e0] ss:$8 sps:$4 sm:$0xff]   ;;  %v7054_v12 = vld [vmem:[%s8072_s10 + $0x694] ss:$8 sps:$4 sm:$0xff]  }
 0x202   : > { %2768 = vmatprep.subr.bf16.mxu0 %v6982_v20  ;;  %v1210_v20 = vunpack.c.l.b16 %v890_v14 }
 0x205   : > { %2769 = vmatpush1.bf16.msra.mxu0 %v6980_v21  ;;  %v1226_v21 = vunpack.c.l.b16 %v906_v15  ;;  %v826_v15 = vadd.f32 %v825_v63, %v824_v54  ;;  %v7073_v54 = vld [vmem:[%s8072_s10 + $0x700] ss:$8 sps:$4 sm:$0xff]  }
 0x206   : > { %2770 = vmatprep.subr.bf16.mxu0 %v6985_v22  ;;  %v7024_v22 = vld [vmem:[%s8072_s10 + $0x5f4] ss:$8 sps:$4 sm:$0xff]   ;;  %v7085_v63 = vld [vmem:[%s8072_s10 + $0x740] ss:$8 sps:$4 sm:$0xff]  }
 0x209   : > { %2771 = vmatpush1.bf16.msra.mxu0 %v6983_v23  ;;  %v1213_v23 = vunpack.c.l.b16 %v893_v17 }
 0x20a   : > { %2772 = vmatprep.subr.bf16.mxu0 %v6988_v24  ;;  %v1229_v24 = vunpack.c.l.b16 %v909_v18  ;;  %v844_v18 = vadd.f32 %v843_v2, %v842_v57  ;;  %v7076_v57 = vld [vmem:[%s8072_s10 + $0x710] ss:$8 sps:$4 sm:$0xff]   ;;  %v7093_v2 = vld [vmem:[%s8072_s10 + $0x764] ss:$8 sps:$4 sm:$0xff]  }
 0x20d   : > { %2773 = vmatpush1.bf16.msra.mxu0 %v6986_v25  ;;  %v7022_v25 = vld [vmem:[%s8072_s10 + $0x5f0] ss:$8 sps:$4 sm:$0xff]  }
 0x20e   : > { %2774 = vmatprep.subr.bf16.mxu0 %v6991_v26  ;;  %v1243_v26 = vsel %vm1232_vm0, %v1226_v21, %v1210_v20  ;;  %v827_v21 = vrot.slane %v826_v15, 1 }
 0x211   : > { %2775 = vmatpush1.bf16.msra.mxu0 %v6989_v27  ;;  %v7027_v27 = vld [vmem:[%s8072_s10 + $0x604] ss:$8 sps:$4 sm:$0xff]  }
 0x212   : > { %2776 = vmatprep.subr.bf16.mxu0 %v6994_v28  ;;  %v1246_v28 = vsel %vm1232_vm0, %v1229_v24, %v1213_v23  ;;  %v845_v24 = vrot.slane %v844_v18, 1 }
 0x213   : > { %v1262_v31 = vpack.c.b16 %v1246_v28, %v1246_v28  ;;  %v7063_v28 = vld [vmem:[%s8072_s10 + $0x6c4] ss:$8 sps:$4 sm:$0xff]  }
 0x215   : > { %2777 = vmatpush1.bf16.msra.mxu0 %v6992_v29  ;;  %v1259_v29 = vpack.c.b16 %v1243_v26, %v1243_v26 }
 0x216   : > { %2778 = vmatprep.subr.bf16.mxu0 %v6997_v30  ;;  %v7025_v30 = vld [vmem:[%s8072_s10 + $0x600] ss:$8 sps:$4 sm:$0xff]  }
 0x219   : > { %2779 = vmatpush1.bf16.msra.mxu0 %v6995_v35  ;;  %v603_v35 = vld [vmem:[%s8070_s8 + $0x60] sm:$0xff] }
 0x21a   : > { %2780 = vmatprep.subr.bf16.mxu0 %v7000_v38  ;;  %v7036_v38 = vld [vmem:[%s8072_s10 + $0x634] ss:$8 sps:$4 sm:$0xff]   ;;  %v727_v42 = vrot.slane %v603_v35, 4 }
 0x21d   : > { %2781 = vmatpush1.bf16.msra.mxu0 %v6998_v41  ;;  %v7034_v41 = vld [vmem:[%s8072_s10 + $0x630] ss:$8 sps:$4 sm:$0xff]  }
 0x21e   : > { %2782 = vmatprep.subr.bf16.mxu0 %v7003_v44  ;;  %v7039_v44 = vld [vmem:[%s8072_s10 + $0x644] ss:$8 sps:$4 sm:$0xff]  }
 0x221   : > { %2783 = vmatpush1.bf16.msra.mxu0 %v7001_v47  ;;  %v745_v47 = vrot.slane %v606_v39, 4 }
 0x222   : > { %2784 = vmatprep.subr.bf16.mxu0 %v7006_v50  ;;  %v7124_v50 = vld [vmem:[%s8342_s11 + $0x8] sm:$0xff]  }
 0x223   : > { %6594 = vmatpush3.bf16.msra.mxu1 %v7124_v50 }
 0x224   : > { %6595 = vmatprep.subr.bf16.mxu1 %v7125_v51  ;;  %v7075_v51 = vld [vmem:[%s8072_s10 + $0x704] ss:$8 sps:$4 sm:$0xff]  }
 0x225   : > { %2785 = vmatpush1.bf16.msra.mxu0 %v7004_v53  ;;  %v728_v53 = vadd.f32 %v727_v42, %v603_v35 }
 0x226   : > { %2786 = vmatprep.subr.bf16.mxu0 %v7009_v56  ;;  %v746_v56 = vadd.f32 %v745_v47, %v606_v39 }
 0x227   : > { %6596 = vmatpush3.bf16.msra.mxu1 %v7126_v58  ;;  %v7081_v58 = vld [vmem:[%s8072_s10 + $0x724] ss:$8 sps:$4 sm:$0xff]  }
 0x228   : > { %v747_v0 = vrot.slane %v746_v56, 2  ;;  %6597 = vmatprep.subr.bf16.mxu1 %v7127_v60  ;;  %v7084_v60 = vld [vmem:[%s8072_s10 + $0x734] ss:$8 sps:$4 sm:$0xff]  }
 0x229   : > { %2787 = vmatpush1.bf16.msra.mxu0 %v7007_v59  ;;  %v7040_v59 = vld [vmem:[%s8072_s10 + $0x650] ss:$8 sps:$4 sm:$0xff]  }
 0x22a   : > { %2788 = vmatprep.subr.bf16.mxu0 %v7012_v62  ;;  %v729_v62 = vrot.slane %v728_v53, 2  ;;  %v748_v17 = vadd.f32 %v747_v0, %v746_v56  ;;  %v7078_v56 = vld [vmem:[%s8072_s10 + $0x714] ss:$8 sps:$4 sm:$0xff]  }
 0x22b   : > { %v7090_v0 = vld [vmem:[%s8072_s10 + $0x754] ss:$8 sps:$4 sm:$0xff]  }
 0x22c   : > { %v730_v14 = vadd.f32 %v729_v62, %v728_v53  ;;  %v749_v23 = vrot.slane %v748_v17, 1  ;;  %v7087_v62 = vld [vmem:[%s8072_s10 + $0x744] ss:$8 sps:$4 sm:$0xff]  }
 0x22d   : > { %2789 = vmatpush1.bf16.msra.mxu0 %v7010_v1  ;;  %v7128_v1 = vld [vmem:[%s8342_s11 + $0x18] sm:$0xff]  }
 0x22e   : > { %2790 = vmatprep.subr.bf16.mxu0 %v7015_v4  ;;  %v7043_v4 = vld [vmem:[%s8072_s10 + $0x660] ss:$8 sps:$4 sm:$0xff]   ;;  %6598 = vmatpush3.bf16.msra.mxu1 %v7128_v1  ;;  %v731_v20 = vrot.slane %v730_v14, 1  ;;  %v7088_v1 = vld [vmem:[%s8072_s10 + $0x750] ss:$8 sps:$4 sm:$0xff]  }
 0x22f   : > { %6599 = vmatprep.subr.bf16.mxu1 %v7129_v3  ;;  %v605_v3 = vld [vmem:[%s8070_s8 + $0x70] sm:$0xff] }
 0x230   : > { %v732_v26 = vadd.f32 %v731_v20, %v730_v14  ;;  %v7105_v20 = vld [vmem:[%s8072_s10 + $0x7a4] ss:$8 sps:$4 sm:$0xff]  }
 0x231   : > { %2791 = vmatpush1.bf16.msra.mxu0 %v7013_v7  ;;  %v7131_v7 = vld [vmem:[%s8342_s11 + $0x68] sm:$0xff]  }
 0x232   : > { %2792 = vmatprep.subr.bf16.mxu0 %v7018_v10  ;;  %v7132_v10 = vld [vmem:[%s8342_s11 + $0x28] sm:$0xff]   ;;  %6600 = vmatpush3.bf16.msra.mxu1 %v7130_v6  ;;  %v739_v6 = vrot.slane %v605_v3, 4 }
 0x233   : > { %6601 = vmatprep.subr.bf16.mxu1 %v7131_v7 }
 0x235   : > { %2793 = vmatpush1.bf16.msra.mxu0 %v7016_v13  ;;  %v7052_v13 = vld [vmem:[%s8072_s10 + $0x690] ss:$8 sps:$4 sm:$0xff]  }
 0x236   : > { %2794 = vmatprep.subr.bf16.mxu0 %v7021_v16  ;;  %6602 = vmatpush3.bf16.msra.mxu1 %v7132_v10  ;;  %v7057_v16 = vld [vmem:[%s8072_s10 + $0x6a4] ss:$8 sps:$4 sm:$0xff]   ;;  %v740_v10 = vadd.f32 %v739_v6, %v605_v3 }
 0x237   : > { %v2903_v6 = vld [vmem:[%s8085_s21] sm:$0x3] }
 0x238   : > { %v741_v14 = vrot.slane %v740_v10, 2 }
 0x239   : > { %2795 = vmatpush1.bf16.msra.mxu0 %v7019_v19  ;;  %v7055_v19 = vld [vmem:[%s8072_s10 + $0x6a0] ss:$8 sps:$4 sm:$0xff]  }
 0x23a   : > { %2796 = vmatprep.subr.bf16.mxu0 %v7024_v22  ;;  %v7060_v22 = vld [vmem:[%s8072_s10 + $0x6b4] ss:$8 sps:$4 sm:$0xff]  }
 0x23d   : > { %2797 = vmatpush1.bf16.msra.mxu0 %v7022_v25  ;;  %v7058_v25 = vld [vmem:[%s8072_s10 + $0x6b0] ss:$8 sps:$4 sm:$0xff]  }
 0x23e   : > { %2807 = vmatprep.subr.bf16.mxu0 %v7027_v27  ;;  %v828_v27 = vadd.f32 %v827_v21, %v826_v15  ;;  %v7103_v21 = vld [vmem:[%s8072_s10 + $0x7a0] ss:$8 sps:$4 sm:$0xff]  }
 0x240   : > { %2799 = vmatmul.mubr.bf16.vlgmr.msra.gmra.mrb[0].mxu0 %v1259_v29  ;;  %v750_v29 = vadd.f32 %v749_v23, %v748_v17  ;;  %v7100_v17 = vld [vmem:[%s8072_s10 + $0x790] ss:$8 sps:$4 sm:$0xff]  }
 0x241   : > { %2808 = vmatpush1.bf16.msra.mxu0 %v7025_v30  ;;  %2839 = vmatprep.mubr.bf16.mxu0 %v1262_v31  ;;  %v846_v30 = vadd.f32 %v845_v24, %v844_v18  ;;  %v7061_v31 = vld [vmem:[%s8072_s10 + $0x6c0] ss:$8 sps:$4 sm:$0xff]   ;;  %v742_v18 = vadd.f32 %v741_v14, %v740_v10  ;;  %v7108_v24 = vld [vmem:[%s8072_s10 + $0x7b4] ss:$8 sps:$4 sm:$0xff]  }
 0x242   : > { %2809 = vmatprep.subr.bf16.mxu0 %v7030_v32  ;;  %v860_v32 = vmul.f32 0.125, %v732_v26  ;;  %v863_v35 = vmul.f32 0.125, %v750_v29  ;;  %v7109_v29 = vld [vmem:[%s8072_s10 + $0x7c0] ss:$8 sps:$4 sm:$0xff]  }
 0x245   : > { %2810 = vmatpush1.bf16.msra.mxu0 %v7028_v33  ;;  %v876_v33 = vmul.f32 0.125, %v828_v27 }
 0x246   : > { %2811 = vmatprep.subr.bf16.mxu0 %v7033_v34  ;;  %v7066_v34 = vld [vmem:[%s8072_s10 + $0x6d4] ss:$8 sps:$4 sm:$0xff]  }
 0x247   : > { %v908_v39 = vpack.c.bf16 %v876_v33, %v876_v33  ;;  %v7112_v33 = vld [vmem:[%s8072_s10 + $0x7d0] ss:$8 sps:$4 sm:$0xff]  }
 0x249   : > { %2812 = vmatpush1.bf16.msra.mxu0 %v7031_v36  ;;  %v879_v36 = vmul.f32 0.125, %v846_v30  ;;  %v1228_v45 = vunpack.c.l.b16 %v908_v39 }
 0x24a   : > { %2813 = vmatprep.subr.bf16.mxu0 %v7036_v38  ;;  %v892_v38 = vpack.c.bf16 %v860_v32, %v860_v32  ;;  %v7114_v32 = vld [vmem:[%s8072_s10 + $0x7d4] ss:$8 sps:$4 sm:$0xff]  }
 0x24b   : > { %v911_v42 = vpack.c.bf16 %v879_v36, %v879_v36  ;;  %v7117_v36 = vld [vmem:[%s8072_s10 + $0x7e4] ss:$8 sps:$4 sm:$0xff]  }
 0x24d   : > { %2814 = vmatpush1.bf16.msra.mxu0 %v7034_v41  ;;  %v895_v41 = vpack.c.bf16 %v863_v35, %v863_v35  ;;  %v1231_v48 = vunpack.c.l.b16 %v911_v42 }
 0x24e   : > { %2815 = vmatprep.subr.bf16.mxu0 %v7039_v44  ;;  %v1212_v44 = vunpack.c.l.b16 %v892_v38 }
 0x24f   : > { %v1215_v47 = vunpack.c.l.b16 %v895_v41  ;;  %v7118_v41 = vld [vmem:[%s8072_s10 + $0x7f0] ss:$8 sps:$4 sm:$0xff]  }
 0x250   : > { %v1245_v50 = vsel %vm1232_vm0, %v1228_v45, %v1212_v44  ;;  %v7133_v44 = vld [vmem:[%s8342_s11 + $0x70] sm:$0xff]  }
 0x251   : > { %2816 = vmatpush1.bf16.msra.mxu0 %v7037_v52  ;;  %v1248_v52 = vsel %vm1232_vm0, %v1231_v48, %v1215_v47  ;;  %v1261_v53 = vpack.c.b16 %v1245_v50, %v1245_v50  ;;  %v7134_v45 = vld [vmem:[%s8342_s11 + $0x30] sm:$0xff]   ;;  %6603 = vmatprep.subr.bf16.mxu1 %v7133_v44  ;;  %v7136_v47 = vld [vmem:[%s8342_s11 + $0x38] sm:$0xff]   ;;  %v7139_v48 = vld [vmem:[%s8072_s10 + $0x804] ss:$8 sps:$4 sm:$0xff]  }
 0x252   : > { %2817 = vmatprep.subr.bf16.mxu0 %v7042_v55  ;;  %v1264_v55 = vpack.c.b16 %v1248_v52, %v1248_v52  ;;  %6604 = vmatpush3.bf16.msra.mxu1 %v7134_v45  ;;  %v640_v50 = vld [vmem:[%s8070_s8 + $0x188] sm:$0xff]  ;;  %v642_v44 = vld [vmem:[%s8070_s8 + $0x198] sm:$0xff] }
 0x253   : > { %v3200_v52 = vrot.slane %v640_v50, 4  ;;  %v7155_v45 = vld [vmem:[%s8072_s10 + $0x860] ss:$8 sps:$4 sm:$0xff]  }
 0x255   : > { %2818 = vmatpush1.bf16.msra.mxu0 %v7040_v59  ;;  %v7079_v59 = vld [vmem:[%s8072_s10 + $0x720] ss:$8 sps:$4 sm:$0xff]  }
 0x256   : > { %2819 = vmatprep.subr.bf16.mxu0 %v7045_v61  ;;  %v7082_v61 = vld [vmem:[%s8072_s10 + $0x730] ss:$8 sps:$4 sm:$0xff]  }
 0x259   : > { %2820 = vmatpush1.bf16.msra.mxu0 %v7043_v4  ;;  %v637_v4 = vld [vmem:[%s8070_s8 + $0x170] sm:$0xff] }
 0x25a   : > { %2821 = vmatprep.subr.bf16.mxu0 %v7048_v5  ;;  %v7091_v5 = vld [vmem:[%s8072_s10 + $0x760] ss:$8 sps:$4 sm:$0xff]   ;;  %v835_v7 = vrot.slane %v637_v4, 4 }
 0x25d   : > { %2822 = vmatpush1.bf16.msra.mxu0 %v7046_v8  ;;  %v7096_v8 = vld [vmem:[%s8072_s10 + $0x774] ss:$8 sps:$4 sm:$0xff]  }
 0x25e   : > { %2823 = vmatprep.subr.bf16.mxu0 %v7051_v9  ;;  %v7094_v9 = vld [vmem:[%s8072_s10 + $0x770] ss:$8 sps:$4 sm:$0xff]  }
 0x261   : > { %2824 = vmatpush1.bf16.msra.mxu0 %v7049_v11  ;;  %v836_v11 = vadd.f32 %v835_v7, %v637_v4  ;;  %v2889_v4 = vld [vmem:[%s8079_s20] sm:$0x3] }
 0x262   : > { %2825 = vmatprep.subr.bf16.mxu0 %v7054_v12  ;;  %v7099_v12 = vld [vmem:[%s8072_s10 + $0x784] ss:$8 sps:$4 sm:$0xff]  }
 0x263   : > { %v837_v15 = vrot.slane %v836_v11, 2 }
 0x265   : > { %2826 = vmatpush1.bf16.msra.mxu0 %v7052_v13  ;;  %v7097_v13 = vld [vmem:[%s8072_s10 + $0x780] ss:$8 sps:$4 sm:$0xff]  }
 0x266   : > { %2827 = vmatprep.subr.bf16.mxu0 %v7057_v16  ;;  %v7102_v16 = vld [vmem:[%s8072_s10 + $0x794] ss:$8 sps:$4 sm:$0xff]  }
 0x269   : > { %2828 = vmatpush1.bf16.msra.mxu0 %v7055_v19  ;;  %v838_v19 = vadd.f32 %v837_v15, %v836_v11 }
 0x26a   : > { %2829 = vmatprep.subr.bf16.mxu0 %v7060_v22  ;;  %v743_v22 = vrot.slane %v742_v18, 1 }
 0x26b   : > { %v839_v23 = vrot.slane %v838_v19, 1 }
 0x26c   : > { %v744_v26 = vadd.f32 %v743_v22, %v742_v18 }
 0x26d   : > { %2830 = vmatpush1.bf16.msra.mxu0 %v7058_v25  ;;  %v7106_v25 = vld [vmem:[%s8072_s10 + $0x7b0] ss:$8 sps:$4 sm:$0xff]   ;;  %v840_v27 = vadd.f32 %v839_v23, %v838_v19 }
 0x26e   : > { %2831 = vmatprep.subr.bf16.mxu0 %v7063_v28  ;;  %v7111_v28 = vld [vmem:[%s8072_s10 + $0x7c4] ss:$8 sps:$4 sm:$0xff]   ;;  %v862_v30 = vmul.f32 0.125, %v744_v26 }
 0x271   : > { %2832 = vmatpush1.bf16.msra.mxu0 %v7061_v31  ;;  %v878_v31 = vmul.f32 0.125, %v840_v27  ;;  %v7137_v27 = vld [vmem:[%s8072_s10 + $0x800] ss:$8 sps:$4 sm:$0xff]  }
 0x272   : > { %2833 = vmatprep.subr.bf16.mxu0 %v7066_v34  ;;  %v894_v34 = vpack.c.bf16 %v862_v30, %v862_v30  ;;  %v7142_v30 = vld [vmem:[%s8072_s10 + $0x814] ss:$8 sps:$4 sm:$0xff]  }
 0x273   : > { %v910_v35 = vpack.c.bf16 %v878_v31, %v878_v31  ;;  %v7140_v31 = vld [vmem:[%s8072_s10 + $0x810] ss:$8 sps:$4 sm:$0xff]  }
 0x274   : > { %v1214_v38 = vunpack.c.l.b16 %v894_v34  ;;  %v7148_v34 = vld [vmem:[%s8072_s10 + $0x834] ss:$8 sps:$4 sm:$0xff]  }
 0x275   : > { %2834 = vmatpush1.bf16.msra.mxu0 %v7064_v37  ;;  %v7115_v37 = vld [vmem:[%s8072_s10 + $0x7e0] ss:$8 sps:$4 sm:$0xff]   ;;  %v1230_v39 = vunpack.c.l.b16 %v910_v35  ;;  %v7146_v35 = vld [vmem:[%s8072_s10 + $0x830] ss:$8 sps:$4 sm:$0xff]  }
 0x276   : > { %2835 = vmatprep.subr.bf16.mxu0 %v7069_v40  ;;  %v7120_v40 = vld [vmem:[%s8072_s10 + $0x7f4] ss:$8 sps:$4 sm:$0xff]  }
 0x277   : > { %v1247_v42 = vsel %vm1232_vm0, %v1230_v39, %v1214_v38  ;;  %v7154_v38 = vld [vmem:[%s8072_s10 + $0x854] ss:$8 sps:$4 sm:$0xff]   ;;  %v7152_v39 = vld [vmem:[%s8072_s10 + $0x850] ss:$8 sps:$4 sm:$0xff]  }
 0x279   : > { %2836 = vmatpush1.bf16.msra.mxu0 %v7067_v43  ;;  %v1263_v43 = vpack.c.b16 %v1247_v42, %v1247_v42  ;;  %v639_v42 = vld [vmem:[%s8070_s8 + $0x180] sm:$0xff] }
 0x27a   : > { %2837 = vmatprep.subr.bf16.mxu0 %v7072_v46  ;;  %v7135_v46 = vld [vmem:[%s8342_s11 + $0x78] sm:$0xff]  }
 0x27b   : > { %6605 = vmatprep.subr.bf16.mxu1 %v7135_v46 }
 0x27c   : > { %6606 = vmatpush3.bf16.msra.mxu1 %v7136_v47  ;;  %v3194_v47 = vrot.slane %v639_v42, 4 }
 0x27d   : > { %2838 = vmatpush1.bf16.msra.mxu0 %v7070_v49  ;;  %5003 = vmatprep.subr.bf16.mxu1 %v7139_v48  ;;  %v608_v49 = vld [vmem:[%s8070_s8 + $0x88] sm:$0xff]  ;;  %v7160_v48 = vld [vmem:[%s8072_s10 + $0x874] ss:$8 sps:$4 sm:$0xff]  }
 0x27e   : > { %2848 = vmatprep.subr.bf16.mxu0 %v7075_v51  ;;  %v3104_v51 = vrot.slane %v608_v49, 4 }
 0x280   : > { %2840 = vmatmul.mubr.bf16.vlgmr.msra.gmra.mrb[0].mxu0 %v1261_v53  ;;  %v3105_v53 = vadd.f32 %v3104_v51, %v608_v49  ;;  %v7158_v51 = vld [vmem:[%s8072_s10 + $0x870] ss:$8 sps:$4 sm:$0xff]  }
 0x281   : > { %2849 = vmatpush1.bf16.msra.mxu0 %v7073_v54  ;;  %2880 = vmatprep.mubr.bf16.mxu0 %v1264_v55  ;;  %v3201_v54 = vadd.f32 %v3200_v52, %v640_v50  ;;  %v3212_v50 = vrot.slane %v642_v44, 4 }
 0x282   : > { %2850 = vmatprep.subr.bf16.mxu0 %v7078_v56  ;;  %v3106_v55 = vrot.slane %v3105_v53, 2 }
 0x283   : > { %v3202_v56 = vrot.slane %v3201_v54, 2 }
 0x285   : > { %2851 = vmatpush1.bf16.msra.mxu0 %v7076_v57  ;;  %v3107_v57 = vadd.f32 %v3106_v55, %v3105_v53  ;;  %v3195_v53 = vadd.f32 %v3194_v47, %v639_v42  ;;  %v7185_v42 = vld [vmem:[%s8072_s10 + $0x900] ss:$8 sps:$4 sm:$0xff]  }
 0x286   : > { %2852 = vmatprep.subr.bf16.mxu0 %v7081_v58  ;;  %v3203_v58 = vadd.f32 %v3202_v56, %v3201_v54  ;;  %v7163_v54 = vld [vmem:[%s8072_s10 + $0x884] ss:$8 sps:$4 sm:$0xff]   ;;  %v3213_v56 = vadd.f32 %v3212_v50, %v642_v44  ;;  %v7190_v44 = vld [vmem:[%s8072_s10 + $0x914] ss:$8 sps:$4 sm:$0xff]   ;;  %v7191_v47 = vld [vmem:[%s8072_s10 + $0x920] ss:$8 sps:$4 sm:$0xff]  }
 0x287   : > { %v7199_v50 = vld [vmem:[%s8072_s10 + $0x944] ss:$8 sps:$4 sm:$0xff]  }
 0x289   : > { %2853 = vmatpush1.bf16.msra.mxu0 %v7079_v59  ;;  %v2891_v59 = vlaneseq }
 0x28a   : > { %2854 = vmatprep.subr.bf16.mxu0 %v7084_v60  ;;  %v3108_v60 = vrot.slane %v3107_v57, 1 }
 0x28d   : > { %2855 = vmatpush1.bf16.msra.mxu0 %v7082_v61  ;;  %v3204_v61 = vrot.slane %v3203_v58, 1 }
 0x28e   : > { %2856 = vmatprep.subr.bf16.mxu0 %v7087_v62  ;;  %v2892_v62 = vshrl.u32 %v2891_v59, 7  ;;  %v3196_v59 = vrot.slane %v3195_v53, 2 }
 0x291   : > { %2857 = vmatpush1.bf16.msra.mxu0 %v7085_v63  ;;  %v3109_v63 = vadd.f32 %v3108_v60, %v3107_v57  ;;  %v7161_v57 = vld [vmem:[%s8072_s10 + $0x880] ss:$8 sps:$4 sm:$0xff]   ;;  %v7166_v60 = vld [vmem:[%s8072_s10 + $0x894] ss:$8 sps:$4 sm:$0xff]  }
 0x292   : > { %2858 = vmatprep.subr.bf16.mxu0 %v7090_v0  ;;  %v3205_v0 = vadd.f32 %v3204_v61, %v3203_v58 }
 0x294   : > { %v3307_v3 = vmul.f32 0.125, %v3205_v0 }
 0x295   : > { %2859 = vmatpush1.bf16.msra.mxu0 %v7088_v1  ;;  %v8425_v1 = vsub.s32 0, %v2892_v62 }
 0x296   : > { %2860 = vmatprep.subr.bf16.mxu0 %v7093_v2  ;;  %v3291_v2 = vmul.f32 0.125, %v3109_v63  ;;  %v7164_v63 = vld [vmem:[%s8072_s10 + $0x890] ss:$8 sps:$4 sm:$0xff]  }
 0x297   : > { %v2894_v7 = vrot.slane %v2889_v4, %v8425_v1  ;;  %v2908_v11 = vrot.slane %v2903_v6, %v8425_v1 }
 0x299   : > { %2861 = vmatpush1.bf16.msra.mxu0 %v7091_v5  ;;  %v8428_v5 = vsub.s32 1, %v2892_v62  ;;  %v3214_v62 = vrot.slane %v3213_v56, 2 }
 0x29a   : > { %2862 = vmatprep.subr.bf16.mxu0 %v7096_v8  ;;  %v3323_v8 = vpack.c.bf16 %v3291_v2, %v3291_v2  ;;  %v3197_v2 = vadd.f32 %v3196_v59, %v3195_v53  ;;  %v7200_v53 = vld [vmem:[%s8072_s10 + $0x950] ss:$8 sps:$4 sm:$0xff]   ;;  %v7203_v59 = vld [vmem:[%s8072_s10 + $0x960] ss:$8 sps:$4 sm:$0xff]  }
 0x29b   : > { %v2898_v10 = vrot.slane %v2889_v4, %v8428_v5 }
 0x29d   : > { %2863 = vmatpush1.bf16.msra.mxu0 %v7094_v9  ;;  %v3339_v9 = vpack.c.bf16 %v3307_v3, %v3307_v3  ;;  %v7169_v3 = vld [vmem:[%s8072_s10 + $0x8a4] ss:$8 sps:$4 sm:$0xff]  }
 0x29e   : > { %2864 = vmatprep.subr.bf16.mxu0 %v7099_v12 }
 0x2a1   : > { %2865 = vmatpush1.bf16.msra.mxu0 %v7097_v13  ;;  %v2912_v13 = vrot.slane %v2903_v6, %v8428_v5  ;;  %v3215_v6 = vadd.f32 %v3214_v62, %v3213_v56  ;;  %v641_v56 = vld [vmem:[%s8070_s8 + $0x190] sm:$0xff] }
 0x2a2   : > { %2866 = vmatprep.subr.bf16.mxu0 %v7102_v16  ;;  %v3644_v16 = vunpack.c.l.b16 %v3323_v8  ;;  %v7208_v62 = vld [vmem:[%s8072_s10 + $0x974] ss:$8 sps:$4 sm:$0xff]  }
 0x2a5   : > { %2867 = vmatpush1.bf16.msra.mxu0 %v7100_v17  ;;  %v3660_v17 = vunpack.c.l.b16 %v3339_v9  ;;  %v3198_v9 = vrot.slane %v3197_v2, 1 }
 0x2a6   : > { %2868 = vmatprep.subr.bf16.mxu0 %v7105_v20 }
 0x2a9   : > { %2869 = vmatpush1.bf16.msra.mxu0 %v7103_v21 }
 0x2aa   : > { %2870 = vmatprep.subr.bf16.mxu0 %v7108_v24  ;;  %v3676_v24 = vsel %vm1232_vm0, %v3660_v17, %v3644_v16  ;;  %v7175_v16 = vld [vmem:[%s8072_s10 + $0x8c4] ss:$8 sps:$4 sm:$0xff]  }
 0x2ad   : > { %2871 = vmatpush1.bf16.msra.mxu0 %v7106_v25 }
 0x2ae   : > { %2872 = vmatprep.subr.bf16.mxu0 %v7111_v28  ;;  %v3692_v28 = vpack.c.b16 %v3676_v24, %v3676_v24 }
 0x2b1   : > { %2873 = vmatpush1.bf16.msra.mxu0 %v7109_v29 }
 0x2b2   : > { %2874 = vmatprep.subr.bf16.mxu0 %v7114_v32  ;;  %v7145_v32 = vld [vmem:[%s8072_s10 + $0x824] ss:$8 sps:$4 sm:$0xff]  }
 0x2b5   : > { %2875 = vmatpush1.bf16.msra.mxu0 %v7112_v33  ;;  %v7143_v33 = vld [vmem:[%s8072_s10 + $0x820] ss:$8 sps:$4 sm:$0xff]  }
 0x2b6   : > { %2876 = vmatprep.subr.bf16.mxu0 %v7117_v36  ;;  %v7151_v36 = vld [vmem:[%s8072_s10 + $0x844] ss:$8 sps:$4 sm:$0xff]  }
 0x2b9   : > { %2877 = vmatpush1.bf16.msra.mxu0 %v7115_v37  ;;  %v7149_v37 = vld [vmem:[%s8072_s10 + $0x840] ss:$8 sps:$4 sm:$0xff]  }
 0x2ba   : > { %2878 = vmatprep.subr.bf16.mxu0 %v7120_v40  ;;  %v7157_v40 = vld [vmem:[%s8072_s10 + $0x864] ss:$8 sps:$4 sm:$0xff]  }
 0x2bd   : > { %2879 = vmatpush1.bf16.msra.mxu0 %v7118_v41  ;;  %v607_v41 = vld [vmem:[%s8070_s8 + $0x80] sm:$0xff] }
 0x2be   : > { %v3098_v46 = vrot.slane %v607_v41, 4 }
 0x2c0   : > { %2881 = vmatmul.mubr.bf16.vlgmr.msra.gmra.mrb[0].mxu0 %v1263_v43  ;;  %v610_v43 = vld [vmem:[%s8070_s8 + $0x98] sm:$0xff]  ;;  %v3099_v52 = vadd.f32 %v3098_v46, %v607_v41  ;;  %v7193_v46 = vld [vmem:[%s8072_s10 + $0x924] ss:$8 sps:$4 sm:$0xff]  }
 0x2c1   : > { %v3116_v49 = vrot.slane %v610_v43, 4 }
 0x2c2   : > { %v3100_v58 = vrot.slane %v3099_v52, 2 }
 0x2c3   : > { %v3117_v55 = vadd.f32 %v3116_v49, %v610_v43  ;;  %v7194_v49 = vld [vmem:[%s8072_s10 + $0x930] ss:$8 sps:$4 sm:$0xff]  }
 0x2c4   : > { %v3101_v0 = vadd.f32 %v3100_v58, %v3099_v52  ;;  %v7202_v52 = vld [vmem:[%s8072_s10 + $0x954] ss:$8 sps:$4 sm:$0xff]   ;;  %v644_v58 = vld [vmem:[%s8070_s8 + $0x1a8] sm:$0xff] }
 0x2c5   : > { %v3118_v61 = vrot.slane %v3117_v55, 2 }
 0x2c6   : > { %v3102_v8 = vrot.slane %v3101_v0, 1 }
 0x2c7   : > { %v3119_v4 = vadd.f32 %v3118_v61, %v3117_v55  ;;  %v609_v55 = vld [vmem:[%s8070_s8 + $0x90] sm:$0xff]  ;;  %v3206_v61 = vrot.slane %v641_v56, 4 }
 0x393   : > { %v2882_v12 = vpop.f32.mrb[0].mxu0 }
 0x394   : > { %v2901_v14 = vmul.f32 %v2894_v7, %v2882_v12  ;;  %v2884_v15 = vpop.f32.mrb[1].mxu0  ;;  %v7167_v7 = vld [vmem:[%s8072_s10 + $0x8a0] ss:$8 sps:$4 sm:$0xff]   ;;  %v3216_v12 = vrot.slane %v3215_v6, 1 }
 0x395   : > { %v2902_v18 = vmul.f32 %v2898_v10, %v2884_v15  ;;  %v2886_v19 = vpop.f32.mrb[2].mxu0  ;;  %v7172_v10 = vld [vmem:[%s8072_s10 + $0x8b4] ss:$8 sps:$4 sm:$0xff]   ;;  %v3199_v15 = vadd.f32 %v3198_v9, %v3197_v2  ;;  %v7206_v2 = vld [vmem:[%s8072_s10 + $0x970] ss:$8 sps:$4 sm:$0xff]  }
 0x396   : > { %v2915_v20 = vadd.f32 %v2908_v11, %v2901_v14  ;;  %v2887_v21 = vpop.f32.mrb[3].mxu0  ;;  %v3120_v11 = vrot.slane %v3119_v4, 1  ;;  %v3103_v14 = vadd.f32 %v3102_v8, %v3101_v0  ;;  %v7173_v19 = vld [vmem:[%s8072_s10 + $0x8c0] ss:$8 sps:$4 sm:$0xff]   ;;  %v3224_v0 = vrot.slane %v644_v58, 4 }
 0x397   : > { %v2916_v22 = vadd.f32 %v2912_v13, %v2902_v18  ;;  %v7170_v13 = vld [vmem:[%s8072_s10 + $0x8b0] ss:$8 sps:$4 sm:$0xff]   ;;  %v3217_v18 = vadd.f32 %v3216_v12, %v3215_v6  ;;  %v3306_v21 = vmul.f32 0.125, %v3199_v15  ;;  %v7211_v6 = vld [vmem:[%s8072_s10 + $0x984] ss:$8 sps:$4 sm:$0xff]  }
 0x398   : > { %v2917_v23 = vmax.f32 %v2915_v20, 0.0  ;;  %v3121_v17 = vadd.f32 %v3120_v11, %v3119_v4  ;;  %v3290_v20 = vmul.f32 0.125, %v3103_v14  ;;  %v3207_v4 = vadd.f32 %v3206_v61, %v641_v56  ;;  %v7209_v9 = vld [vmem:[%s8072_s10 + $0x980] ss:$8 sps:$4 sm:$0xff]   ;;  %v7214_v12 = vld [vmem:[%s8072_s10 + $0x994] ss:$8 sps:$4 sm:$0xff]  }
 0x399   : > { %v2918_v25 = vmax.f32 %v2916_v22, 0.0  ;;  %v7178_v22 = vld [vmem:[%s8072_s10 + $0x8d4] ss:$8 sps:$4 sm:$0xff]   ;;  %v3309_v24 = vmul.f32 0.125, %v3217_v18  ;;  %v3225_v8 = vadd.f32 %v3224_v0, %v644_v58  ;;  %v7212_v15 = vld [vmem:[%s8072_s10 + $0x990] ss:$8 sps:$4 sm:$0xff]  }
 0x39a   : > { %v2919_v29 = vpack.c.bf16 %v2917_v23, %v2917_v23  ;;  %v3293_v23 = vmul.f32 0.125, %v3121_v17  ;;  %v3208_v11 = vrot.slane %v3207_v4, 2  ;;  %v7217_v18 = vld [vmem:[%s8072_s10 + $0x9a4] ss:$8 sps:$4 sm:$0xff]   ;;  %v7233_v56 = vld [vmem:[%s8072_s10 + $0xa00] ss:$8 sps:$4 sm:$0xff]  }
 0x39b   : > { %v2920_v26 = vpack.c.bf16 %v2918_v25, %v2918_v25  ;;  %v7176_v25 = vld [vmem:[%s8072_s10 + $0x8d0] ss:$8 sps:$4 sm:$0xff]   ;;  %v3226_v14 = vrot.slane %v3225_v8, 2  ;;  %v7238_v58 = vld [vmem:[%s8072_s10 + $0xa14] ss:$8 sps:$4 sm:$0xff]  }
 0x39c   : > { %v3209_v17 = vadd.f32 %v3208_v11, %v3207_v4  ;;  %v7239_v61 = vld [vmem:[%s8072_s10 + $0xa20] ss:$8 sps:$4 sm:$0xff]   ;;  %v7247_v0 = vld [vmem:[%s8072_s10 + $0xa44] ss:$8 sps:$4 sm:$0xff]   ;;  %v7248_v4 = vld [vmem:[%s8072_s10 + $0xa50] ss:$8 sps:$4 sm:$0xff]  }
 0x39d   : > { %3088 = vmatprep.mubr.bf16.mxu1 %v2920_v26  ;;  %v3322_v26 = vpack.c.bf16 %v3290_v20, %v3290_v20  ;;  %v3227_v20 = vadd.f32 %v3226_v14, %v3225_v8  ;;  %v643_v8 = vld [vmem:[%s8070_s8 + $0x1a0] sm:$0xff]  ;;  %v7256_v14 = vld [vmem:[%s8072_s10 + $0xa74] ss:$8 sps:$4 sm:$0xff]  }
 0x39e   : > { %3089 = vmatmul.mubr.bf16.vlgmr.msra.gmra.mrb[0].mxu1 %v2919_v29  ;;  %v3325_v29 = vpack.c.bf16 %v3293_v23, %v3293_v23  ;;  %v3210_v23 = vrot.slane %v3209_v17, 1  ;;  %v7251_v11 = vld [vmem:[%s8072_s10 + $0xa60] ss:$8 sps:$4 sm:$0xff]  }
 0x39f   : > { %5004 = vmatpush1.bf16.msra.mxu1 %v7137_v27  ;;  %5035 = vmatprep.mubr.bf16.mxu1 %v3692_v28  ;;  %v3338_v27 = vpack.c.bf16 %v3306_v21, %v3306_v21  ;;  %v7181_v28 = vld [vmem:[%s8072_s10 + $0x8e4] ss:$8 sps:$4 sm:$0xff]   ;;  %v7215_v21 = vld [vmem:[%s8072_s10 + $0x9a0] ss:$8 sps:$4 sm:$0xff]  }
 0x3a0   : > { %5005 = vmatprep.subr.bf16.mxu1 %v7142_v30  ;;  %v3341_v30 = vpack.c.bf16 %v3309_v24, %v3309_v24  ;;  %v7220_v24 = vld [vmem:[%s8072_s10 + $0x9b4] ss:$8 sps:$4 sm:$0xff]  }
 0x3a3   : > { %5006 = vmatpush1.bf16.msra.mxu1 %v7140_v31  ;;  %v7179_v31 = vld [vmem:[%s8072_s10 + $0x8e0] ss:$8 sps:$4 sm:$0xff]  }
 0x3a4   : > { %5007 = vmatprep.subr.bf16.mxu1 %v7145_v32  ;;  %v3643_v32 = vunpack.c.l.b16 %v3322_v26  ;;  %v3228_v26 = vrot.slane %v3227_v20, 1 }
 0x3a7   : > { %5008 = vmatpush1.bf16.msra.mxu1 %v7143_v33  ;;  %v3659_v33 = vunpack.c.l.b16 %v3338_v27  ;;  %v7218_v27 = vld [vmem:[%s8072_s10 + $0x9b0] ss:$8 sps:$4 sm:$0xff]  }
 0x3a8   : > { %5009 = vmatprep.subr.bf16.mxu1 %v7148_v34  ;;  %v7184_v34 = vld [vmem:[%s8072_s10 + $0x8f4] ss:$8 sps:$4 sm:$0xff]  }
 0x3ab   : > { %5010 = vmatpush1.bf16.msra.mxu1 %v7146_v35  ;;  %v3646_v35 = vunpack.c.l.b16 %v3325_v29  ;;  %v3211_v29 = vadd.f32 %v3210_v23, %v3209_v17  ;;  %v7254_v17 = vld [vmem:[%s8072_s10 + $0xa70] ss:$8 sps:$4 sm:$0xff]   ;;  %v7257_v23 = vld [vmem:[%s8072_s10 + $0xa80] ss:$8 sps:$4 sm:$0xff]  }
 0x3ac   : > { %5011 = vmatprep.subr.bf16.mxu1 %v7151_v36  ;;  %v3662_v36 = vunpack.c.l.b16 %v3341_v30  ;;  %v7223_v30 = vld [vmem:[%s8072_s10 + $0x9c4] ss:$8 sps:$4 sm:$0xff]  }
 0x3af   : > { %5012 = vmatpush1.bf16.msra.mxu1 %v7149_v37  ;;  %v7182_v37 = vld [vmem:[%s8072_s10 + $0x8f0] ss:$8 sps:$4 sm:$0xff]  }
 0x3b0   : > { %5013 = vmatprep.subr.bf16.mxu1 %v7154_v38  ;;  %v3675_v38 = vsel %vm1232_vm0, %v3659_v33, %v3643_v32  ;;  %v3229_v32 = vadd.f32 %v3228_v26, %v3227_v20  ;;  %v7221_v33 = vld [vmem:[%s8072_s10 + $0x9c0] ss:$8 sps:$4 sm:$0xff]   ;;  %v7259_v20 = vld [vmem:[%s8072_s10 + $0xa84] ss:$8 sps:$4 sm:$0xff]   ;;  %v7262_v26 = vld [vmem:[%s8072_s10 + $0xa94] ss:$8 sps:$4 sm:$0xff]  }
 0x3b1   : > { %v3691_v41 = vpack.c.b16 %v3675_v38, %v3675_v38 }
 0x3b2   : > { %v3311_v38 = vmul.f32 0.125, %v3229_v32  ;;  %v7265_v32 = vld [vmem:[%s8072_s10 + $0xaa4] ss:$8 sps:$4 sm:$0xff]  }
 0x3b3   : > { %5014 = vmatpush1.bf16.msra.mxu1 %v7152_v39  ;;  %v7187_v39 = vld [vmem:[%s8072_s10 + $0x904] ss:$8 sps:$4 sm:$0xff]  }
 0x3b4   : > { %5015 = vmatprep.subr.bf16.mxu1 %v7157_v40  ;;  %v3678_v40 = vsel %vm1232_vm0, %v3662_v36, %v3646_v35  ;;  %v3308_v35 = vmul.f32 0.125, %v3211_v29  ;;  %v7226_v36 = vld [vmem:[%s8072_s10 + $0x9d4] ss:$8 sps:$4 sm:$0xff]   ;;  %v7260_v29 = vld [vmem:[%s8072_s10 + $0xa90] ss:$8 sps:$4 sm:$0xff]  }
 0x3b5   : > { %v3694_v43 = vpack.c.b16 %v3678_v40, %v3678_v40 }
 0x3b7   : > { %5016 = vmatpush1.bf16.msra.mxu1 %v7155_v45  ;;  %v7188_v45 = vld [vmem:[%s8072_s10 + $0x910] ss:$8 sps:$4 sm:$0xff]  }
 0x3b8   : > { %5017 = vmatprep.subr.bf16.mxu1 %v7160_v48  ;;  %v7196_v48 = vld [vmem:[%s8072_s10 + $0x934] ss:$8 sps:$4 sm:$0xff]  }
 0x3bb   : > { %5018 = vmatpush1.bf16.msra.mxu1 %v7158_v51  ;;  %v7197_v51 = vld [vmem:[%s8072_s10 + $0x940] ss:$8 sps:$4 sm:$0xff]  }
 0x3bc   : > { %5019 = vmatprep.subr.bf16.mxu1 %v7163_v54  ;;  %v7205_v54 = vld [vmem:[%s8072_s10 + $0x964] ss:$8 sps:$4 sm:$0xff]  }
 0x3bf   : > { %5020 = vmatpush1.bf16.msra.mxu1 %v7161_v57  ;;  %v612_v57 = vld [vmem:[%s8070_s8 + $0xa8] sm:$0xff] }
 0x3c0   : > { %5021 = vmatprep.subr.bf16.mxu1 %v7166_v60  ;;  %v3110_v60 = vrot.slane %v609_v55, 4 }
 0x3c3   : > { %5022 = vmatpush1.bf16.msra.mxu1 %v7164_v63  ;;  %v3128_v63 = vrot.slane %v612_v57, 4 }
 0x3c4   : > { %5023 = vmatprep.subr.bf16.mxu1 %v7169_v3  ;;  %v3111_v3 = vadd.f32 %v3110_v60, %v609_v55  ;;  %v7241_v60 = vld [vmem:[%s8072_s10 + $0xa24] ss:$8 sps:$4 sm:$0xff]  }
 0x3c7   : > { %5024 = vmatpush1.bf16.msra.mxu1 %v7167_v7  ;;  %v3129_v7 = vadd.f32 %v3128_v63, %v612_v57  ;;  %v7242_v63 = vld [vmem:[%s8072_s10 + $0xa30] ss:$8 sps:$4 sm:$0xff]  }
 0x3c8   : > { %5025 = vmatprep.subr.bf16.mxu1 %v7172_v10  ;;  %v3112_v10 = vrot.slane %v3111_v3, 2 }
 0x3cb   : > { %5026 = vmatpush1.bf16.msra.mxu1 %v7170_v13  ;;  %v3130_v13 = vrot.slane %v3129_v7, 2 }
 0x3cc   : > { %5027 = vmatprep.subr.bf16.mxu1 %v7175_v16  ;;  %v3113_v16 = vadd.f32 %v3112_v10, %v3111_v3  ;;  %v7250_v3 = vld [vmem:[%s8072_s10 + $0xa54] ss:$8 sps:$4 sm:$0xff]  }
 0x3cd   : > { %v646_v10 = vld [vmem:[%s8070_s8 + $0x1b8] sm:$0xff] }
 0x3cf   : > { %5028 = vmatpush1.bf16.msra.mxu1 %v7173_v19  ;;  %v3131_v19 = vadd.f32 %v3130_v13, %v3129_v7  ;;  %v611_v7 = vld [vmem:[%s8070_s8 + $0xa0] sm:$0xff]  ;;  %v3218_v13 = vrot.slane %v643_v8, 4 }
 0x3d0   : > { %5029 = vmatprep.subr.bf16.mxu1 %v7178_v22  ;;  %v3114_v22 = vrot.slane %v3113_v16, 1 }
 0x3d3   : > { %5030 = vmatpush1.bf16.msra.mxu1 %v7176_v25  ;;  %v3132_v25 = vrot.slane %v3131_v19, 1 }
 0x3d4   : > { %5031 = vmatprep.subr.bf16.mxu1 %v7181_v28  ;;  %v3115_v28 = vadd.f32 %v3114_v22, %v3113_v16  ;;  %v3236_v16 = vrot.slane %v646_v10, 4 }
 0x3d6   : > { %v3237_v22 = vadd.f32 %v3236_v16, %v646_v10  ;;  %v7286_v10 = vld [vmem:[%s8072_s10 + $0xb14] ss:$8 sps:$4 sm:$0xff]   ;;  %v7295_v16 = vld [vmem:[%s8072_s10 + $0xb44] ss:$8 sps:$4 sm:$0xff]  }
 0x3d7   : > { %5032 = vmatpush1.bf16.msra.mxu1 %v7179_v31  ;;  %v3133_v31 = vadd.f32 %v3132_v25, %v3131_v19  ;;  %v3219_v19 = vadd.f32 %v3218_v13, %v643_v8  ;;  %v7281_v8 = vld [vmem:[%s8072_s10 + $0xb00] ss:$8 sps:$4 sm:$0xff]  }
 0x3d8   : > { %5033 = vmatprep.subr.bf16.mxu1 %v7184_v34  ;;  %v3292_v34 = vmul.f32 0.125, %v3115_v28  ;;  %v3238_v28 = vrot.slane %v3237_v22, 2  ;;  %v7287_v13 = vld [vmem:[%s8072_s10 + $0xb20] ss:$8 sps:$4 sm:$0xff]  }
 0x3d9   : > { %v3220_v25 = vrot.slane %v3219_v19, 2 }
 0x3da   : > { %v3324_v40 = vpack.c.bf16 %v3292_v34, %v3292_v34  ;;  %v3239_v34 = vadd.f32 %v3238_v28, %v3237_v22  ;;  %v645_v22 = vld [vmem:[%s8070_s8 + $0x1b0] sm:$0xff] }
 0x3db   : > { %5034 = vmatpush1.bf16.msra.mxu1 %v7182_v37  ;;  %v3295_v37 = vmul.f32 0.125, %v3133_v31  ;;  %v3221_v31 = vadd.f32 %v3220_v25, %v3219_v19  ;;  %v7296_v19 = vld [vmem:[%s8072_s10 + $0xb50] ss:$8 sps:$4 sm:$0xff]   ;;  %v648_v25 = vld [vmem:[%s8070_s8 + $0x1c8] sm:$0xff] }
 0x3dc   : > { %5044 = vmatprep.subr.bf16.mxu1 %v7187_v39  ;;  %v7224_v39 = vld [vmem:[%s8072_s10 + $0x9d0] ss:$8 sps:$4 sm:$0xff]  }
 0x3de   : > { %5036 = vmatmul.mubr.bf16.vlgmr.msra.gmra.mrb[4].mxu1 %v3691_v41  ;;  %v3340_v41 = vpack.c.bf16 %v3308_v35, %v3308_v35  ;;  %v7263_v35 = vld [vmem:[%s8072_s10 + $0xaa0] ss:$8 sps:$4 sm:$0xff]  }
 0x3df   : > { %5045 = vmatpush1.bf16.msra.mxu1 %v7185_v42  ;;  %5076 = vmatprep.mubr.bf16.mxu1 %v3694_v43  ;;  %v7229_v42 = vld [vmem:[%s8072_s10 + $0x9e4] ss:$8 sps:$4 sm:$0xff]   ;;  %v3327_v43 = vpack.c.bf16 %v3295_v37, %v3295_v37  ;;  %v3222_v37 = vrot.slane %v3221_v31, 1 }
 0x3e0   : > { %5046 = vmatprep.subr.bf16.mxu1 %v7190_v44  ;;  %v3343_v44 = vpack.c.bf16 %v3311_v38, %v3311_v38  ;;  %v7268_v38 = vld [vmem:[%s8072_s10 + $0xab4] ss:$8 sps:$4 sm:$0xff]  }
 0x3e3   : > { %5047 = vmatpush1.bf16.msra.mxu1 %v7188_v45  ;;  %v7227_v45 = vld [vmem:[%s8072_s10 + $0x9e0] ss:$8 sps:$4 sm:$0xff]  }
 0x3e4   : > { %5048 = vmatprep.subr.bf16.mxu1 %v7193_v46  ;;  %v3645_v46 = vunpack.c.l.b16 %v3324_v40  ;;  %v3240_v40 = vrot.slane %v3239_v34, 1 }
 0x3e7   : > { %5049 = vmatpush1.bf16.msra.mxu1 %v7191_v47  ;;  %v3661_v47 = vunpack.c.l.b16 %v3340_v41  ;;  %v7266_v41 = vld [vmem:[%s8072_s10 + $0xab0] ss:$8 sps:$4 sm:$0xff]  }
 0x3e8   : > { %5050 = vmatprep.subr.bf16.mxu1 %v7196_v48  ;;  %v7232_v48 = vld [vmem:[%s8072_s10 + $0x9f4] ss:$8 sps:$4 sm:$0xff]  }
 0x3eb   : > { %5051 = vmatpush1.bf16.msra.mxu1 %v7194_v49  ;;  %v3648_v49 = vunpack.c.l.b16 %v3327_v43  ;;  %v3223_v43 = vadd.f32 %v3222_v37, %v3221_v31 }
 0x3ec   : > { %5052 = vmatprep.subr.bf16.mxu1 %v7199_v50  ;;  %v3664_v50 = vunpack.c.l.b16 %v3343_v44  ;;  %v7271_v44 = vld [vmem:[%s8072_s10 + $0xac4] ss:$8 sps:$4 sm:$0xff]  }
 0x3ef   : > { %5053 = vmatpush1.bf16.msra.mxu1 %v7197_v51  ;;  %v7230_v51 = vld [vmem:[%s8072_s10 + $0x9f0] ss:$8 sps:$4 sm:$0xff]  }
 0x3f0   : > { %5054 = vmatprep.subr.bf16.mxu1 %v7202_v52  ;;  %v3677_v52 = vsel %vm1232_vm0, %v3661_v47, %v3645_v46  ;;  %v3241_v46 = vadd.f32 %v3240_v40, %v3239_v34  ;;  %v7269_v47 = vld [vmem:[%s8072_s10 + $0xac0] ss:$8 sps:$4 sm:$0xff]   ;;  %v7304_v34 = vld [vmem:[%s8072_s10 + $0xb74] ss:$8 sps:$4 sm:$0xff]  }
 0x3f1   : > { %v3693_v55 = vpack.c.b16 %v3677_v52, %v3677_v52 }
 0x3f2   : > { %v3313_v52 = vmul.f32 0.125, %v3241_v46 }
 0x3f3   : > { %5055 = vmatpush1.bf16.msra.mxu1 %v7200_v53  ;;  %v7235_v53 = vld [vmem:[%s8072_s10 + $0xa04] ss:$8 sps:$4 sm:$0xff]  }
 0x3f4   : > { %5056 = vmatprep.subr.bf16.mxu1 %v7205_v54  ;;  %v3680_v54 = vsel %vm1232_vm0, %v3664_v50, %v3648_v49  ;;  %v3310_v49 = vmul.f32 0.125, %v3223_v43  ;;  %v7274_v50 = vld [vmem:[%s8072_s10 + $0xad4] ss:$8 sps:$4 sm:$0xff]  }
 0x3f5   : > { %v3696_v57 = vpack.c.b16 %v3680_v54, %v3680_v54 }
 0x3f7   : > { %5057 = vmatpush1.bf16.msra.mxu1 %v7203_v59  ;;  %v7236_v59 = vld [vmem:[%s8072_s10 + $0xa10] ss:$8 sps:$4 sm:$0xff]  }
 0x3f8   : > { %5058 = vmatprep.subr.bf16.mxu1 %v7208_v62  ;;  %v7244_v62 = vld [vmem:[%s8072_s10 + $0xa34] ss:$8 sps:$4 sm:$0xff]  }
 0x3fb   : > { %5059 = vmatpush1.bf16.msra.mxu1 %v7206_v2  ;;  %v7245_v2 = vld [vmem:[%s8072_s10 + $0xa40] ss:$8 sps:$4 sm:$0xff]  }
 0x3fc   : > { %5060 = vmatprep.subr.bf16.mxu1 %v7211_v6  ;;  %v7253_v6 = vld [vmem:[%s8072_s10 + $0xa64] ss:$8 sps:$4 sm:$0xff]  }
 0x3ff   : > { %5061 = vmatpush1.bf16.msra.mxu1 %v7209_v9  ;;  %v614_v9 = vld [vmem:[%s8070_s8 + $0xb8] sm:$0xff] }
 0x400   : > { %5062 = vmatprep.subr.bf16.mxu1 %v7214_v12  ;;  %v3122_v12 = vrot.slane %v611_v7, 4 }
 0x403   : > { %5063 = vmatpush1.bf16.msra.mxu1 %v7212_v15  ;;  %v3140_v15 = vrot.slane %v614_v9, 4 }
 0x404   : > { %5064 = vmatprep.subr.bf16.mxu1 %v7217_v18  ;;  %v3123_v18 = vadd.f32 %v3122_v12, %v611_v7  ;;  %v7289_v12 = vld [vmem:[%s8072_s10 + $0xb24] ss:$8 sps:$4 sm:$0xff]  }
 0x407   : > { %5065 = vmatpush1.bf16.msra.mxu1 %v7215_v21  ;;  %v3141_v21 = vadd.f32 %v3140_v15, %v614_v9  ;;  %v7290_v15 = vld [vmem:[%s8072_s10 + $0xb30] ss:$8 sps:$4 sm:$0xff]  }
 0x408   : > { %5066 = vmatprep.subr.bf16.mxu1 %v7220_v24  ;;  %v3124_v24 = vrot.slane %v3123_v18, 2 }
 0x40b   : > { %5067 = vmatpush1.bf16.msra.mxu1 %v7218_v27  ;;  %v3142_v27 = vrot.slane %v3141_v21, 2 }
 0x40c   : > { %5068 = vmatprep.subr.bf16.mxu1 %v7223_v30  ;;  %v3125_v30 = vadd.f32 %v3124_v24, %v3123_v18  ;;  %v7298_v18 = vld [vmem:[%s8072_s10 + $0xb54] ss:$8 sps:$4 sm:$0xff]   ;;  %v616_v24 = vld [vmem:[%s8070_s8 + $0xc8] sm:$0xff] }
 0x40f   : > { %5069 = vmatpush1.bf16.msra.mxu1 %v7221_v33  ;;  %v3143_v33 = vadd.f32 %v3142_v27, %v3141_v21  ;;  %v613_v21 = vld [vmem:[%s8070_s8 + $0xb0] sm:$0xff] }
 0x410   : > { %5070 = vmatprep.subr.bf16.mxu1 %v7226_v36  ;;  %v3126_v36 = vrot.slane %v3125_v30, 1  ;;  %v3134_v31 = vrot.slane %v613_v21, 4 }
 0x413   : > { %5071 = vmatpush1.bf16.msra.mxu1 %v7224_v39  ;;  %v3144_v39 = vrot.slane %v3143_v33, 1 }
 0x414   : > { %5072 = vmatprep.subr.bf16.mxu1 %v7229_v42  ;;  %v3127_v42 = vadd.f32 %v3126_v36, %v3125_v30  ;;  %v7299_v30 = vld [vmem:[%s8072_s10 + $0xb60] ss:$8 sps:$4 sm:$0xff]   ;;  %v3248_v36 = vrot.slane %v648_v25, 4 }
 0x416   : > { %v3249_v43 = vadd.f32 %v3248_v36, %v648_v25  ;;  %v7338_v36 = vld [vmem:[%s8072_s10 + $0xc30] ss:$8 sps:$4 sm:$0xff]  }
 0x417   : > { %5073 = vmatpush1.bf16.msra.mxu1 %v7227_v45  ;;  %v3145_v45 = vadd.f32 %v3144_v39, %v3143_v33  ;;  %v3135_v39 = vadd.f32 %v3134_v31, %v613_v21  ;;  %v7328_v21 = vld [vmem:[%s8072_s10 + $0xbf4] ss:$8 sps:$4 sm:$0xff]  }
 0x418   : > { %5074 = vmatprep.subr.bf16.mxu1 %v7232_v48  ;;  %v3294_v48 = vmul.f32 0.125, %v3127_v42  ;;  %v7334_v31 = vld [vmem:[%s8072_s10 + $0xc14] ss:$8 sps:$4 sm:$0xff]  }
 0x41a   : > { %v3326_v54 = vpack.c.bf16 %v3294_v48, %v3294_v48 }
 0x41b   : > { %5075 = vmatpush1.bf16.msra.mxu1 %v7230_v51  ;;  %v3297_v51 = vmul.f32 0.125, %v3145_v45  ;;  %v3136_v45 = vrot.slane %v3135_v39, 2 }
 0x41c   : > { %5085 = vmatprep.subr.bf16.mxu1 %v7235_v53  ;;  %v7272_v53 = vld [vmem:[%s8072_s10 + $0xad0] ss:$8 sps:$4 sm:$0xff]  }
 0x41e   : > { %5077 = vmatmul.mubr.bf16.vlgmr.msra.gmra.mrb[4].mxu1 %v3693_v55  ;;  %v3342_v55 = vpack.c.bf16 %v3310_v49, %v3310_v49  ;;  %v3250_v49 = vrot.slane %v3249_v43, 2 }
 0x41f   : > { %5086 = vmatpush1.bf16.msra.mxu1 %v7233_v56  ;;  %5117 = vmatprep.mubr.bf16.mxu1 %v3696_v57  ;;  %v7277_v56 = vld [vmem:[%s8072_s10 + $0xae4] ss:$8 sps:$4 sm:$0xff]   ;;  %v3329_v57 = vpack.c.bf16 %v3297_v51, %v3297_v51  ;;  %v3137_v51 = vadd.f32 %v3136_v45, %v3135_v39  ;;  %v7346_v39 = vld [vmem:[%s8072_s10 + $0xc54] ss:$8 sps:$4 sm:$0xff]  }
 0x420   : > { %5087 = vmatprep.subr.bf16.mxu1 %v7238_v58  ;;  %v3345_v58 = vpack.c.bf16 %v3313_v52, %v3313_v52  ;;  %v650_v45 = vld [vmem:[%s8070_s8 + $0x1d8] sm:$0xff] }
 0x423   : > { %5088 = vmatpush1.bf16.msra.mxu1 %v7236_v59  ;;  %v7275_v59 = vld [vmem:[%s8072_s10 + $0xae0] ss:$8 sps:$4 sm:$0xff]  }
 0x424   : > { %5089 = vmatprep.subr.bf16.mxu1 %v7241_v60  ;;  %v3647_v60 = vunpack.c.l.b16 %v3326_v54 }
 0x427   : > { %5090 = vmatpush1.bf16.msra.mxu1 %v7239_v61  ;;  %v3663_v61 = vunpack.c.l.b16 %v3342_v55  ;;  %v3251_v55 = vadd.f32 %v3250_v49, %v3249_v43  ;;  %v647_v43 = vld [vmem:[%s8070_s8 + $0x1c0] sm:$0xff]  ;;  %v7352_v49 = vld [vmem:[%s8072_s10 + $0xc74] ss:$8 sps:$4 sm:$0xff]  }
 0x428   : > { %5091 = vmatprep.subr.bf16.mxu1 %v7244_v62  ;;  %v7280_v62 = vld [vmem:[%s8072_s10 + $0xaf4] ss:$8 sps:$4 sm:$0xff]  }
 0x42b   : > { %5092 = vmatpush1.bf16.msra.mxu1 %v7242_v63  ;;  %v3650_v63 = vunpack.c.l.b16 %v3329_v57  ;;  %v3138_v57 = vrot.slane %v3137_v51, 1 }
 0x42c   : > { %5093 = vmatprep.subr.bf16.mxu1 %v7247_v0  ;;  %v3666_v0 = vunpack.c.l.b16 %v3345_v58 }
 0x42f   : > { %5094 = vmatpush1.bf16.msra.mxu1 %v7245_v2  ;;  %v7278_v2 = vld [vmem:[%s8072_s10 + $0xaf0] ss:$8 sps:$4 sm:$0xff]  }
 0x430   : > { %5095 = vmatprep.subr.bf16.mxu1 %v7250_v3  ;;  %v3679_v3 = vsel %vm1232_vm0, %v3663_v61, %v3647_v60  ;;  %v3252_v61 = vrot.slane %v3251_v55, 1 }
 0x431   : > { %v3695_v7 = vpack.c.b16 %v3679_v3, %v3679_v3 }
 0x433   : > { %5096 = vmatpush1.bf16.msra.mxu1 %v7248_v4  ;;  %v7283_v4 = vld [vmem:[%s8072_s10 + $0xb04] ss:$8 sps:$4 sm:$0xff]  }
 0x434   : > { %5097 = vmatprep.subr.bf16.mxu1 %v7253_v6  ;;  %v3682_v6 = vsel %vm1232_vm0, %v3666_v0, %v3650_v63  ;;  %v3139_v63 = vadd.f32 %v3138_v57, %v3137_v51  ;;  %v3260_v51 = vrot.slane %v650_v45, 4 }
 0x435   : > { %v3698_v9 = vpack.c.b16 %v3682_v6, %v3682_v6  ;;  %v7317_v6 = vld [vmem:[%s8072_s10 + $0xbc0] ss:$8 sps:$4 sm:$0xff]  }
 0x436   : > { %v3261_v57 = vadd.f32 %v3260_v51, %v650_v45  ;;  %v7382_v45 = vld [vmem:[%s8072_s10 + $0xd14] ss:$8 sps:$4 sm:$0xff]   ;;  %v7391_v51 = vld [vmem:[%s8072_s10 + $0xd44] ss:$8 sps:$4 sm:$0xff]  }
 0x437   : > { %5098 = vmatpush1.bf16.msra.mxu1 %v7251_v11  ;;  %v7284_v11 = vld [vmem:[%s8072_s10 + $0xb10] ss:$8 sps:$4 sm:$0xff]  }
 0x438   : > { %5099 = vmatprep.subr.bf16.mxu1 %v7256_v14  ;;  %v7292_v14 = vld [vmem:[%s8072_s10 + $0xb34] ss:$8 sps:$4 sm:$0xff]  }
 0x43b   : > { %5100 = vmatpush1.bf16.msra.mxu1 %v7254_v17  ;;  %v7293_v17 = vld [vmem:[%s8072_s10 + $0xb40] ss:$8 sps:$4 sm:$0xff]  }
 0x43c   : > { %5101 = vmatprep.subr.bf16.mxu1 %v7259_v20  ;;  %v7301_v20 = vld [vmem:[%s8072_s10 + $0xb64] ss:$8 sps:$4 sm:$0xff]  }
 0x43f   : > { %5102 = vmatpush1.bf16.msra.mxu1 %v7257_v23 }
 0x440   : > { %5103 = vmatprep.subr.bf16.mxu1 %v7262_v26  ;;  %v5997_v26 = vld [vmem:[%s8087_s16] ss:$0 sm:$0xff] }
 0x443   : > { %5104 = vmatpush1.bf16.msra.mxu1 %v7260_v29 }
 0x444   : > { %5105 = vmatprep.subr.bf16.mxu1 %v7265_v32  ;;  %v3230_v32 = vrot.slane %v645_v22, 4 }
 0x446   : > { %v3231_v40 = vadd.f32 %v3230_v32, %v645_v22  ;;  %v7332_v32 = vld [vmem:[%s8072_s10 + $0xc10] ss:$8 sps:$4 sm:$0xff]  }
 0x447   : > { %5106 = vmatpush1.bf16.msra.mxu1 %v7263_v35  ;;  %v3152_v35 = vrot.slane %v616_v24, 4 }
 0x448   : > { %5107 = vmatprep.subr.bf16.mxu1 %v7268_v38  ;;  %v7302_v38 = vld [vmem:[%s8072_s10 + $0xb70] ss:$8 sps:$4 sm:$0xff]   ;;  %v3232_v46 = vrot.slane %v3231_v40, 2 }
 0x449   : > { %v3153_v42 = vadd.f32 %v3152_v35, %v616_v24  ;;  %v7326_v24 = vld [vmem:[%s8072_s10 + $0xbf0] ss:$8 sps:$4 sm:$0xff]   ;;  %v7340_v35 = vld [vmem:[%s8072_s10 + $0xc34] ss:$8 sps:$4 sm:$0xff]  }
 0x44a   : > { %v3233_v52 = vadd.f32 %v3232_v46, %v3231_v40  ;;  %v7344_v40 = vld [vmem:[%s8072_s10 + $0xc50] ss:$8 sps:$4 sm:$0xff]   ;;  %v7347_v46 = vld [vmem:[%s8072_s10 + $0xc60] ss:$8 sps:$4 sm:$0xff]  }
 0x44b   : > { %5108 = vmatpush1.bf16.msra.mxu1 %v7266_v41  ;;  %v7307_v41 = vld [vmem:[%s8072_s10 + $0xb84] ss:$8 sps:$4 sm:$0xff]   ;;  %v3154_v48 = vrot.slane %v3153_v42, 2 }
 0x44c   : > { %5109 = vmatprep.subr.bf16.mxu1 %v7271_v44  ;;  %v7305_v44 = vld [vmem:[%s8072_s10 + $0xb80] ss:$8 sps:$4 sm:$0xff]   ;;  %v3234_v58 = vrot.slane %v3233_v52, 1 }
 0x44d   : > { %v3155_v54 = vadd.f32 %v3154_v48, %v3153_v42  ;;  %v615_v42 = vld [vmem:[%s8070_s8 + $0xc0] sm:$0xff]  ;;  %v3242_v48 = vrot.slane %v647_v43, 4 }
 0x44e   : > { %v3235_v0 = vadd.f32 %v3234_v58, %v3233_v52  ;;  %v7350_v52 = vld [vmem:[%s8072_s10 + $0xc70] ss:$8 sps:$4 sm:$0xff]   ;;  %v7353_v58 = vld [vmem:[%s8072_s10 + $0xc80] ss:$8 sps:$4 sm:$0xff]  }
 0x44f   : > { %5110 = vmatpush1.bf16.msra.mxu1 %v7269_v47  ;;  %v7310_v47 = vld [vmem:[%s8072_s10 + $0xb94] ss:$8 sps:$4 sm:$0xff]   ;;  %v3156_v60 = vrot.slane %v3155_v54, 1 }
 0x450   : > { %5111 = vmatprep.subr.bf16.mxu1 %v7274_v50  ;;  %v7308_v50 = vld [vmem:[%s8072_s10 + $0xb90] ss:$8 sps:$4 sm:$0xff]  }
 0x451   : > { %v3157_v3 = vadd.f32 %v3156_v60, %v3155_v54  ;;  %v3243_v54 = vadd.f32 %v3242_v48, %v647_v43  ;;  %v7377_v43 = vld [vmem:[%s8072_s10 + $0xd00] ss:$8 sps:$4 sm:$0xff]  }
 0x452   : > { %v7383_v48 = vld [vmem:[%s8072_s10 + $0xd20] ss:$8 sps:$4 sm:$0xff]  }
 0x453   : > { %5112 = vmatpush1.bf16.msra.mxu1 %v7272_v53  ;;  %v7313_v53 = vld [vmem:[%s8072_s10 + $0xba4] ss:$8 sps:$4 sm:$0xff]   ;;  %v3244_v60 = vrot.slane %v3243_v54, 2 }
 0x454   : > { %5113 = vmatprep.subr.bf16.mxu1 %v7277_v56  ;;  %v7311_v56 = vld [vmem:[%s8072_s10 + $0xba0] ss:$8 sps:$4 sm:$0xff]  }
 0x457   : > { %5114 = vmatpush1.bf16.msra.mxu1 %v7275_v59  ;;  %v7316_v59 = vld [vmem:[%s8072_s10 + $0xbb4] ss:$8 sps:$4 sm:$0xff]  }
 0x458   : > { %5115 = vmatprep.subr.bf16.mxu1 %v7280_v62  ;;  %v7314_v62 = vld [vmem:[%s8072_s10 + $0xbb0] ss:$8 sps:$4 sm:$0xff]  }
 0x45b   : > { %5116 = vmatpush1.bf16.msra.mxu1 %v7278_v2  ;;  %v7319_v2 = vld [vmem:[%s8072_s10 + $0xbc4] ss:$8 sps:$4 sm:$0xff]  }
 0x45c   : > { %5126 = vmatprep.subr.bf16.mxu1 %v7283_v4  ;;  %v3253_v4 = vadd.f32 %v3252_v61, %v3251_v55  ;;  %v7355_v55 = vld [vmem:[%s8072_s10 + $0xc84] ss:$8 sps:$4 sm:$0xff]   ;;  %v7358_v61 = vld [vmem:[%s8072_s10 + $0xc94] ss:$8 sps:$4 sm:$0xff]  }
 0x45e   : > { %5118 = vmatmul.mubr.bf16.vlgmr.msra.gmra.mrb[4].mxu1 %v3695_v7  ;;  %v3296_v7 = vmul.f32 0.125, %v3139_v63  ;;  %v3262_v63 = vrot.slane %v3261_v57, 2 }
 0x45f   : > { %5127 = vmatpush1.bf16.msra.mxu1 %v7281_v8  ;;  %5158 = vmatprep.mubr.bf16.mxu1 %v3698_v9  ;;  %v3312_v8 = vmul.f32 0.125, %v3235_v0  ;;  %v7322_v9 = vld [vmem:[%s8072_s10 + $0xbd4] ss:$8 sps:$4 sm:$0xff]   ;;  %v7356_v0 = vld [vmem:[%s8072_s10 + $0xc90] ss:$8 sps:$4 sm:$0xff]  }
 0x460   : > { %5128 = vmatprep.subr.bf16.mxu1 %v7286_v10  ;;  %v3299_v10 = vmul.f32 0.125, %v3157_v3  ;;  %v3245_v3 = vadd.f32 %v3244_v60, %v3243_v54  ;;  %v7392_v54 = vld [vmem:[%s8072_s10 + $0xd50] ss:$8 sps:$4 sm:$0xff]   ;;  %v7395_v60 = vld [vmem:[%s8072_s10 + $0xd60] ss:$8 sps:$4 sm:$0xff]  }
 0x463   : > { %5129 = vmatpush1.bf16.msra.mxu1 %v7284_v11  ;;  %v3315_v11 = vmul.f32 0.125, %v3253_v4  ;;  %v7361_v4 = vld [vmem:[%s8072_s10 + $0xca4] ss:$8 sps:$4 sm:$0xff]  }
 0x464   : > { %5130 = vmatprep.subr.bf16.mxu1 %v7289_v12  ;;  %v7320_v12 = vld [vmem:[%s8072_s10 + $0xbd0] ss:$8 sps:$4 sm:$0xff]  }
 0x467   : > { %5131 = vmatpush1.bf16.msra.mxu1 %v7287_v13  ;;  %v3328_v13 = vpack.c.bf16 %v3296_v7, %v3296_v7  ;;  %v3263_v7 = vadd.f32 %v3262_v63, %v3261_v57  ;;  %v649_v57 = vld [vmem:[%s8070_s8 + $0x1d0] sm:$0xff] }
 0x468   : > { %5132 = vmatprep.subr.bf16.mxu1 %v7292_v14  ;;  %v3344_v14 = vpack.c.bf16 %v3312_v8, %v3312_v8  ;;  %v7359_v8 = vld [vmem:[%s8072_s10 + $0xca0] ss:$8 sps:$4 sm:$0xff]   ;;  %v7400_v63 = vld [vmem:[%s8072_s10 + $0xd74] ss:$8 sps:$4 sm:$0xff]  }
 0x46b   : > { %5133 = vmatpush1.bf16.msra.mxu1 %v7290_v15  ;;  %v7325_v15 = vld [vmem:[%s8072_s10 + $0xbe4] ss:$8 sps:$4 sm:$0xff]  }
 0x46c   : > { %5134 = vmatprep.subr.bf16.mxu1 %v7295_v16  ;;  %v3331_v16 = vpack.c.bf16 %v3299_v10, %v3299_v10  ;;  %v3246_v10 = vrot.slane %v3245_v3, 1 }
 0x46e   : > { %v3652_v22 = vunpack.c.l.b16 %v3331_v16  ;;  %v3247_v16 = vadd.f32 %v3246_v10, %v3245_v3  ;;  %v7398_v3 = vld [vmem:[%s8072_s10 + $0xd70] ss:$8 sps:$4 sm:$0xff]   ;;  %v7401_v10 = vld [vmem:[%s8072_s10 + $0xd80] ss:$8 sps:$4 sm:$0xff]  }
 0x46f   : > { %5135 = vmatpush1.bf16.msra.mxu1 %v7293_v17  ;;  %v3347_v17 = vpack.c.bf16 %v3315_v11, %v3315_v11  ;;  %v7364_v11 = vld [vmem:[%s8072_s10 + $0xcb4] ss:$8 sps:$4 sm:$0xff]  }
 0x470   : > { %5136 = vmatprep.subr.bf16.mxu1 %v7298_v18  ;;  %v7323_v18 = vld [vmem:[%s8072_s10 + $0xbe0] ss:$8 sps:$4 sm:$0xff]  }
 0x471   : > { %v6607_v23 = vpop.f32.mrb[0].mxu1 }
 0x472   : > { %v6608_v27 = vpop.f32.mrb[1].mxu1 }
 0x473   : > { %v6609_v28 = vadd.f32 %v6608_v27, %v6607_v23  ;;  %5137 = vmatpush1.bf16.msra.mxu1 %v7296_v19  ;;  %v6610_v29 = vpop.f32.mrb[2].mxu1  ;;  %v3649_v19 = vunpack.c.l.b16 %v3328_v13  ;;  %v3668_v23 = vunpack.c.l.b16 %v3347_v17  ;;  %v3264_v13 = vrot.slane %v3263_v7, 1  ;;  %v7367_v17 = vld [vmem:[%s8072_s10 + $0xcc4] ss:$8 sps:$4 sm:$0xff]  }
 0x474   : > { %v6611_v33 = vpop.f32.mrb[3].mxu1  ;;  %5138 = vmatprep.subr.bf16.mxu1 %v7301_v20  ;;  %v3665_v20 = vunpack.c.l.b16 %v3344_v14  ;;  %v7329_v29 = vld [vmem:[%s8072_s10 + $0xc00] ss:$8 sps:$4 sm:$0xff]   ;;  %v7362_v14 = vld [vmem:[%s8072_s10 + $0xcb0] ss:$8 sps:$4 sm:$0xff]  }
 0x475   : > { %v3091_v37 = vadd.f32 %v6609_v28, %v5997_v26  ;;  %v7331_v26 = vld [vmem:[%s8072_s10 + $0xc04] ss:$8 sps:$4 sm:$0xff]   ;;  %v3684_v27 = vsel %vm1232_vm0, %v3668_v23, %v3652_v22  ;;  %v3314_v22 = vmul.f32 0.125, %v3247_v16  ;;  %v7370_v23 = vld [vmem:[%s8072_s10 + $0xcd4] ss:$8 sps:$4 sm:$0xff]  }
 0x476   : > { %v3681_v25 = vsel %vm1232_vm0, %v3665_v20, %v3649_v19  ;;  %v7337_v33 = vld [vmem:[%s8072_s10 + $0xc24] ss:$8 sps:$4 sm:$0xff]   ;;  %v3265_v19 = vadd.f32 %v3264_v13, %v3263_v7  ;;  %v7365_v20 = vld [vmem:[%s8072_s10 + $0xcc0] ss:$8 sps:$4 sm:$0xff]   ;;  %v7406_v13 = vld [vmem:[%s8072_s10 + $0xd94] ss:$8 sps:$4 sm:$0xff]  }
 0x477   : > { %3097 = vst.msk [vmem:[%s8572_s14] sm:$0x3] %vm3096_vm1, %v3091_v37  ;;  %5139 = vmatpush1.bf16.msra.mxu1 %v7299_v30  ;;  %v3697_v28 = vpack.c.b16 %v3681_v25, %v3681_v25  ;;  %v3700_v30 = vpack.c.b16 %v3684_v27, %v3684_v27  ;;  %v7343_v37 = vld [vmem:[%s8072_s10 + $0xc44] ss:$8 sps:$4 sm:$0xff]   ;;  %v7404_v16 = vld [vmem:[%s8072_s10 + $0xd90] ss:$8 sps:$4 sm:$0xff]  }
 0x478   : > { %5140 = vmatprep.subr.bf16.mxu1 %v7304_v34  ;;  %v7335_v34 = vld [vmem:[%s8072_s10 + $0xc20] ss:$8 sps:$4 sm:$0xff]   ;;  %v3317_v25 = vmul.f32 0.125, %v3265_v19  ;;  %v7403_v7 = vld [vmem:[%s8072_s10 + $0xd84] ss:$8 sps:$4 sm:$0xff]  }
 0x479   : > { %v7409_v19 = vld [vmem:[%s8072_s10 + $0xda4] ss:$8 sps:$4 sm:$0xff]  }
 0x47b   : > { %5141 = vmatpush1.bf16.msra.mxu1 %v7302_v38  ;;  %v7341_v38 = vld [vmem:[%s8072_s10 + $0xc40] ss:$8 sps:$4 sm:$0xff]  }
 0x47c   : > { %5142 = vmatprep.subr.bf16.mxu1 %v7307_v41  ;;  %v7349_v41 = vld [vmem:[%s8072_s10 + $0xc64] ss:$8 sps:$4 sm:$0xff]  }
 0x47f   : > { %5143 = vmatpush1.bf16.msra.mxu1 %v7305_v44  ;;  %v618_v44 = vld [vmem:[%s8070_s8 + $0xd8] sm:$0xff] }
 0x480   : > { %5144 = vmatprep.subr.bf16.mxu1 %v7310_v47  ;;  %v3146_v47 = vrot.slane %v615_v42, 4 }
 0x483   : > { %5145 = vmatpush1.bf16.msra.mxu1 %v7308_v50  ;;  %v3164_v50 = vrot.slane %v618_v44, 4 }
 0x484   : > { %5146 = vmatprep.subr.bf16.mxu1 %v7313_v53  ;;  %v3147_v53 = vadd.f32 %v3146_v47, %v615_v42  ;;  %v7385_v47 = vld [vmem:[%s8072_s10 + $0xd24] ss:$8 sps:$4 sm:$0xff]  }
 0x487   : > { %5147 = vmatpush1.bf16.msra.mxu1 %v7311_v56  ;;  %v3165_v56 = vadd.f32 %v3164_v50, %v618_v44  ;;  %v7386_v50 = vld [vmem:[%s8072_s10 + $0xd30] ss:$8 sps:$4 sm:$0xff]  }
 0x488   : > { %5148 = vmatprep.subr.bf16.mxu1 %v7316_v59  ;;  %v3148_v59 = vrot.slane %v3147_v53, 2 }
 0x48b   : > { %5149 = vmatpush1.bf16.msra.mxu1 %v7314_v62  ;;  %v3166_v62 = vrot.slane %v3165_v56, 2 }
 0x48c   : > { %5150 = vmatprep.subr.bf16.mxu1 %v7319_v2  ;;  %v3149_v2 = vadd.f32 %v3148_v59, %v3147_v53  ;;  %v7394_v53 = vld [vmem:[%s8072_s10 + $0xd54] ss:$8 sps:$4 sm:$0xff]   ;;  %v652_v59 = vld [vmem:[%s8070_s8 + $0x1e8] sm:$0xff] }
 0x48f   : > { %5151 = vmatpush1.bf16.msra.mxu1 %v7317_v6  ;;  %v3167_v6 = vadd.f32 %v3166_v62, %v3165_v56  ;;  %v617_v56 = vld [vmem:[%s8070_s8 + $0xd0] sm:$0xff]  ;;  %v3254_v62 = vrot.slane %v649_v57, 4 }
 0x490   : > { %5152 = vmatprep.subr.bf16.mxu1 %v7322_v9  ;;  %v3150_v9 = vrot.slane %v3149_v2, 1 }
 0x493   : > { %5153 = vmatpush1.bf16.msra.mxu1 %v7320_v12  ;;  %v3168_v12 = vrot.slane %v3167_v6, 1 }
 0x494   : > { %5154 = vmatprep.subr.bf16.mxu1 %v7325_v15  ;;  %v3151_v15 = vadd.f32 %v3150_v9, %v3149_v2  ;;  %v3272_v2 = vrot.slane %v652_v59, 4 }
 0x496   : > { %v3273_v9 = vadd.f32 %v3272_v2, %v652_v59  ;;  %v7430_v59 = vld [vmem:[%s8072_s10 + $0xe14] ss:$8 sps:$4 sm:$0xff]   ;;  %v7524_v2 = vld [vmem:[%s8342_s11 + $0x88] sm:$0xff]  }
 0x497   : > { %5155 = vmatpush1.bf16.msra.mxu1 %v7323_v18  ;;  %v3169_v18 = vadd.f32 %v3168_v12, %v3167_v6  ;;  %v3255_v6 = vadd.f32 %v3254_v62, %v649_v57  ;;  %v7425_v57 = vld [vmem:[%s8072_s10 + $0xe00] ss:$8 sps:$4 sm:$0xff]  }
 0x498   : > { %5156 = vmatprep.subr.bf16.mxu1 %v7328_v21  ;;  %v3298_v21 = vmul.f32 0.125, %v3151_v15  ;;  %v3274_v15 = vrot.slane %v3273_v9, 2  ;;  %v7523_v62 = vld [vmem:[%s8342_s11 + $0xc8] sm:$0xff]  }
 0x499   : > { %v3256_v12 = vrot.slane %v3255_v6, 2 }
 0x49a   : > { %v3330_v27 = vpack.c.bf16 %v3298_v21, %v3298_v21  ;;  %v3275_v21 = vadd.f32 %v3274_v15, %v3273_v9  ;;  %v7434_v9 = vld [vmem:[%s8072_s10 + $0xe30] ss:$8 sps:$4 sm:$0xff]   ;;  %v7530_v15 = vld [vmem:[%s8342_s11 + $0xa0] sm:$0xff]  }
 0x49b   : > { %5157 = vmatpush1.bf16.msra.mxu1 %v7326_v24  ;;  %v3301_v24 = vmul.f32 0.125, %v3169_v18  ;;  %v3257_v18 = vadd.f32 %v3256_v12, %v3255_v6  ;;  %v7436_v6 = vld [vmem:[%s8072_s10 + $0xe34] ss:$8 sps:$4 sm:$0xff]   ;;  %v7529_v12 = vld [vmem:[%s8342_s11 + $0xe0] sm:$0xff]  }
 0x49c   : > { %5167 = vmatprep.subr.bf16.mxu1 %v7331_v26  ;;  %v7368_v26 = vld [vmem:[%s8072_s10 + $0xcd0] ss:$8 sps:$4 sm:$0xff]  }
 0x49e   : > { %5159 = vmatmul.mubr.bf16.vlgmr.msra.gmra.mrb[4].mxu1 %v3697_v28  ;;  %v3346_v28 = vpack.c.bf16 %v3314_v22, %v3314_v22  ;;  %v7407_v22 = vld [vmem:[%s8072_s10 + $0xda0] ss:$8 sps:$4 sm:$0xff]  }
 0x49f   : > { %5168 = vmatpush1.bf16.msra.mxu1 %v7329_v29  ;;  %5199 = vmatprep.mubr.bf16.mxu1 %v3700_v30  ;;  %v7373_v29 = vld [vmem:[%s8072_s10 + $0xce4] ss:$8 sps:$4 sm:$0xff]   ;;  %v3333_v30 = vpack.c.bf16 %v3301_v24, %v3301_v24  ;;  %v3258_v24 = vrot.slane %v3257_v18, 1 }
 0x4a0   : > { %5169 = vmatprep.subr.bf16.mxu1 %v7334_v31  ;;  %v3349_v31 = vpack.c.bf16 %v3317_v25, %v3317_v25  ;;  %v7412_v25 = vld [vmem:[%s8072_s10 + $0xdb4] ss:$8 sps:$4 sm:$0xff]  }
 0x4a3   : > { %5170 = vmatpush1.bf16.msra.mxu1 %v7332_v32  ;;  %v7371_v32 = vld [vmem:[%s8072_s10 + $0xce0] ss:$8 sps:$4 sm:$0xff]  }
 0x4a4   : > { %5171 = vmatprep.subr.bf16.mxu1 %v7337_v33  ;;  %v3651_v33 = vunpack.c.l.b16 %v3330_v27  ;;  %v3276_v27 = vrot.slane %v3275_v21, 1 }
 0x4a7   : > { %5172 = vmatpush1.bf16.msra.mxu1 %v7335_v34  ;;  %v3667_v34 = vunpack.c.l.b16 %v3346_v28  ;;  %v7410_v28 = vld [vmem:[%s8072_s10 + $0xdb0] ss:$8 sps:$4 sm:$0xff]  }
 0x4a8   : > { %5173 = vmatprep.subr.bf16.mxu1 %v7340_v35  ;;  %v7376_v35 = vld [vmem:[%s8072_s10 + $0xcf4] ss:$8 sps:$4 sm:$0xff]  }
 0x4ab   : > { %5174 = vmatpush1.bf16.msra.mxu1 %v7338_v36  ;;  %v3654_v36 = vunpack.c.l.b16 %v3333_v30  ;;  %v3259_v30 = vadd.f32 %v3258_v24, %v3257_v18  ;;  %v7445_v18 = vld [vmem:[%s8072_s10 + $0xe64] ss:$8 sps:$4 sm:$0xff]  }
 0x4ac   : > { %5175 = vmatprep.subr.bf16.mxu1 %v7343_v37  ;;  %v3670_v37 = vunpack.c.l.b16 %v3349_v31  ;;  %v7415_v31 = vld [vmem:[%s8072_s10 + $0xdc4] ss:$8 sps:$4 sm:$0xff]  }
 0x4af   : > { %5176 = vmatpush1.bf16.msra.mxu1 %v7341_v38  ;;  %v7374_v38 = vld [vmem:[%s8072_s10 + $0xcf0] ss:$8 sps:$4 sm:$0xff]  }
 0x4b0   : > { %5177 = vmatprep.subr.bf16.mxu1 %v7346_v39  ;;  %v3683_v39 = vsel %vm1232_vm0, %v3667_v34, %v3651_v33  ;;  %v3277_v33 = vadd.f32 %v3276_v27, %v3275_v21  ;;  %v7413_v34 = vld [vmem:[%s8072_s10 + $0xdc0] ss:$8 sps:$4 sm:$0xff]   ;;  %v622_v21 = vld [vmem:[%s8070_s8 + $0xf8] sm:$0xff] }
 0x4b1   : > { %v3699_v42 = vpack.c.b16 %v3683_v39, %v3683_v39  ;;  %v3188_v27 = vrot.slane %v622_v21, 4 }
 0x4b2   : > { %v3319_v39 = vmul.f32 0.125, %v3277_v33 }
 0x4b3   : > { %5178 = vmatpush1.bf16.msra.mxu1 %v7344_v40  ;;  %v7379_v40 = vld [vmem:[%s8072_s10 + $0xd04] ss:$8 sps:$4 sm:$0xff]   ;;  %v3189_v33 = vadd.f32 %v3188_v27, %v622_v21  ;;  %v7482_v27 = vld [vmem:[%s8072_s10 + $0xf30] ss:$8 sps:$4 sm:$0xff]  }
 0x4b4   : > { %5179 = vmatprep.subr.bf16.mxu1 %v7349_v41  ;;  %v3686_v41 = vsel %vm1232_vm0, %v3670_v37, %v3654_v36  ;;  %v3316_v36 = vmul.f32 0.125, %v3259_v30  ;;  %v7418_v37 = vld [vmem:[%s8072_s10 + $0xdd4] ss:$8 sps:$4 sm:$0xff]  }
 0x4b5   : > { %v3702_v44 = vpack.c.b16 %v3686_v41, %v3686_v41 }
 0x4b7   : > { %5180 = vmatpush1.bf16.msra.mxu1 %v7347_v46  ;;  %v7380_v46 = vld [vmem:[%s8072_s10 + $0xd10] ss:$8 sps:$4 sm:$0xff]  }
 0x4b8   : > { %5181 = vmatprep.subr.bf16.mxu1 %v7352_v49  ;;  %v7388_v49 = vld [vmem:[%s8072_s10 + $0xd34] ss:$8 sps:$4 sm:$0xff]  }
 0x4bb   : > { %5182 = vmatpush1.bf16.msra.mxu1 %v7350_v52  ;;  %v7389_v52 = vld [vmem:[%s8072_s10 + $0xd40] ss:$8 sps:$4 sm:$0xff]  }
 0x4bc   : > { %5183 = vmatprep.subr.bf16.mxu1 %v7355_v55  ;;  %v7397_v55 = vld [vmem:[%s8072_s10 + $0xd64] ss:$8 sps:$4 sm:$0xff]  }
 0x4bf   : > { %5184 = vmatpush1.bf16.msra.mxu1 %v7353_v58  ;;  %v620_v58 = vld [vmem:[%s8070_s8 + $0xe8] sm:$0xff] }
 0x4c0   : > { %5185 = vmatprep.subr.bf16.mxu1 %v7358_v61  ;;  %v3158_v61 = vrot.slane %v617_v56, 4 }
 0x4c3   : > { %5186 = vmatpush1.bf16.msra.mxu1 %v7356_v0  ;;  %v3176_v0 = vrot.slane %v620_v58, 4 }
 0x4c4   : > { %5187 = vmatprep.subr.bf16.mxu1 %v7361_v4  ;;  %v3159_v4 = vadd.f32 %v3158_v61, %v617_v56  ;;  %v7522_v61 = vld [vmem:[%s8342_s11 + $0x80] sm:$0xff]  }
 0x4c7   : > { %5188 = vmatpush1.bf16.msra.mxu1 %v7359_v8  ;;  %v3177_v8 = vadd.f32 %v3176_v0, %v620_v58  ;;  %v7433_v0 = vld [vmem:[%s8072_s10 + $0xe24] ss:$8 sps:$4 sm:$0xff]  }
 0x4c8   : > { %5189 = vmatprep.subr.bf16.mxu1 %v7364_v11  ;;  %v3160_v11 = vrot.slane %v3159_v4, 2 }
 0x4cb   : > { %5190 = vmatpush1.bf16.msra.mxu1 %v7362_v14  ;;  %v3178_v14 = vrot.slane %v3177_v8, 2 }
 0x4cc   : > { %5191 = vmatprep.subr.bf16.mxu1 %v7367_v17  ;;  %v3161_v17 = vadd.f32 %v3160_v11, %v3159_v4  ;;  %v7431_v4 = vld [vmem:[%s8072_s10 + $0xe20] ss:$8 sps:$4 sm:$0xff]   ;;  %v7528_v11 = vld [vmem:[%s8342_s11 + $0x98] sm:$0xff]  }
 0x4cf   : > { %5192 = vmatpush1.bf16.msra.mxu1 %v7365_v20  ;;  %v3179_v20 = vadd.f32 %v3178_v14, %v3177_v8  ;;  %v7527_v8 = vld [vmem:[%s8342_s11 + $0xd8] sm:$0xff]  }
 0x4d0   : > { %5193 = vmatprep.subr.bf16.mxu1 %v7370_v23  ;;  %v3162_v23 = vrot.slane %v3161_v17, 1  ;;  %v7442_v14 = vld [vmem:[%s8072_s10 + $0xe54] ss:$8 sps:$4 sm:$0xff]  }
 0x4d3   : > { %5194 = vmatpush1.bf16.msra.mxu1 %v7368_v26  ;;  %v3180_v26 = vrot.slane %v3179_v20, 1 }
 0x4d4   : > { %5195 = vmatprep.subr.bf16.mxu1 %v7373_v29  ;;  %v3163_v29 = vadd.f32 %v3162_v23, %v3161_v17  ;;  %v7440_v17 = vld [vmem:[%s8072_s10 + $0xe50] ss:$8 sps:$4 sm:$0xff]   ;;  %v7443_v23 = vld [vmem:[%s8072_s10 + $0xe60] ss:$8 sps:$4 sm:$0xff]  }
 0x4d7   : > { %5196 = vmatpush1.bf16.msra.mxu1 %v7371_v32  ;;  %v3181_v32 = vadd.f32 %v3180_v26, %v3179_v20  ;;  %v651_v20 = vld [vmem:[%s8070_s8 + $0x1e0] sm:$0xff]  ;;  %v7448_v26 = vld [vmem:[%s8072_s10 + $0xe74] ss:$8 sps:$4 sm:$0xff]  }
 0x4d8   : > { %5197 = vmatprep.subr.bf16.mxu1 %v7376_v35  ;;  %v3300_v35 = vmul.f32 0.125, %v3163_v29  ;;  %v7446_v29 = vld [vmem:[%s8072_s10 + $0xe70] ss:$8 sps:$4 sm:$0xff]  }
 0x4da   : > { %v3332_v41 = vpack.c.bf16 %v3300_v35, %v3300_v35  ;;  %v7449_v35 = vld [vmem:[%s8072_s10 + $0xe80] ss:$8 sps:$4 sm:$0xff]  }
 0x4db   : > { %5198 = vmatpush1.bf16.msra.mxu1 %v7374_v38  ;;  %v3303_v38 = vmul.f32 0.125, %v3181_v32  ;;  %v7451_v32 = vld [vmem:[%s8072_s10 + $0xe84] ss:$8 sps:$4 sm:$0xff]  }
 0x4dc   : > { %5208 = vmatprep.subr.bf16.mxu1 %v7379_v40  ;;  %v7416_v40 = vld [vmem:[%s8072_s10 + $0xdd0] ss:$8 sps:$4 sm:$0xff]  }
 0x4de   : > { %5200 = vmatmul.mubr.bf16.vlgmr.msra.gmra.mrb[4].mxu1 %v3699_v42  ;;  %v3348_v42 = vpack.c.bf16 %v3316_v36, %v3316_v36 }
 0x4df   : > { %5209 = vmatpush1.bf16.msra.mxu1 %v7377_v43  ;;  %5240 = vmatprep.mubr.bf16.mxu1 %v3702_v44  ;;  %v7421_v43 = vld [vmem:[%s8072_s10 + $0xde4] ss:$8 sps:$4 sm:$0xff]   ;;  %v3335_v44 = vpack.c.bf16 %v3303_v38, %v3303_v38  ;;  %v7454_v38 = vld [vmem:[%s8072_s10 + $0xe94] ss:$8 sps:$4 sm:$0xff]  }
 0x4e0   : > { %5210 = vmatprep.subr.bf16.mxu1 %v7382_v45  ;;  %v3351_v45 = vpack.c.bf16 %v3319_v39, %v3319_v39  ;;  %v3190_v39 = vrot.slane %v3189_v33, 2 }
 0x4e3   : > { %5211 = vmatpush1.bf16.msra.mxu1 %v7380_v46  ;;  %v7419_v46 = vld [vmem:[%s8072_s10 + $0xde0] ss:$8 sps:$4 sm:$0xff]  }
 0x4e4   : > { %5212 = vmatprep.subr.bf16.mxu1 %v7385_v47  ;;  %v3653_v47 = vunpack.c.l.b16 %v3332_v41  ;;  %v7452_v41 = vld [vmem:[%s8072_s10 + $0xe90] ss:$8 sps:$4 sm:$0xff]  }
 0x4e7   : > { %5213 = vmatpush1.bf16.msra.mxu1 %v7383_v48  ;;  %v3669_v48 = vunpack.c.l.b16 %v3348_v42 }
 0x4e8   : > { %5214 = vmatprep.subr.bf16.mxu1 %v7388_v49  ;;  %v7424_v49 = vld [vmem:[%s8072_s10 + $0xdf4] ss:$8 sps:$4 sm:$0xff]  }
 0x4eb   : > { %5215 = vmatpush1.bf16.msra.mxu1 %v7386_v50  ;;  %v3656_v50 = vunpack.c.l.b16 %v3335_v44  ;;  %v7457_v44 = vld [vmem:[%s8072_s10 + $0xea4] ss:$8 sps:$4 sm:$0xff]  }
 0x4ec   : > { %5216 = vmatprep.subr.bf16.mxu1 %v7391_v51  ;;  %v3672_v51 = vunpack.c.l.b16 %v3351_v45  ;;  %v3191_v45 = vadd.f32 %v3190_v39, %v3189_v33  ;;  %v621_v33 = vld [vmem:[%s8070_s8 + $0xf0] sm:$0xff] }
 0x4ed   : > { %v7494_v39 = vld [vmem:[%s8072_s10 + $0xf70] ss:$8 sps:$4 sm:$0xff]  }
 0x4ef   : > { %5217 = vmatpush1.bf16.msra.mxu1 %v7389_v52  ;;  %v7422_v52 = vld [vmem:[%s8072_s10 + $0xdf0] ss:$8 sps:$4 sm:$0xff]  }
 0x4f0   : > { %5218 = vmatprep.subr.bf16.mxu1 %v7394_v53  ;;  %v3685_v53 = vsel %vm1232_vm0, %v3669_v48, %v3653_v47  ;;  %v7455_v47 = vld [vmem:[%s8072_s10 + $0xea0] ss:$8 sps:$4 sm:$0xff]  }
 0x4f1   : > { %v3701_v56 = vpack.c.b16 %v3685_v53, %v3685_v53  ;;  %v7458_v53 = vld [vmem:[%s8072_s10 + $0xeb0] ss:$8 sps:$4 sm:$0xff]  }
 0x4f3   : > { %5219 = vmatpush1.bf16.msra.mxu1 %v7392_v54  ;;  %v7427_v54 = vld [vmem:[%s8072_s10 + $0xe04] ss:$8 sps:$4 sm:$0xff]  }
 0x4f4   : > { %5220 = vmatprep.subr.bf16.mxu1 %v7397_v55  ;;  %v3688_v55 = vsel %vm1232_vm0, %v3672_v51, %v3656_v50  ;;  %v7460_v50 = vld [vmem:[%s8072_s10 + $0xeb4] ss:$8 sps:$4 sm:$0xff]   ;;  %v3192_v51 = vrot.slane %v3191_v45, 1 }
 0x4f5   : > { %v3704_v58 = vpack.c.b16 %v3688_v55, %v3688_v55 }
 0x4f7   : > { %5221 = vmatpush1.bf16.msra.mxu1 %v7395_v60  ;;  %v7521_v60 = vld [vmem:[%s8342_s11 + $0xc0] sm:$0xff]  }
 0x4f8   : > { %5222 = vmatprep.subr.bf16.mxu1 %v7400_v63  ;;  %v7428_v63 = vld [vmem:[%s8072_s10 + $0xe10] ss:$8 sps:$4 sm:$0xff]   ;;  %6613 = vmatprep.subr.bf16.mxu0 %v7521_v60 }
 0x4f9   : > { %6614 = vmatpush3.bf16.msra.mxu0 %v7522_v61 }
 0x4fa   : > { %6615 = vmatprep.subr.bf16.mxu0 %v7523_v62  ;;  %v7466_v62 = vld [vmem:[%s8072_s10 + $0xed4] ss:$8 sps:$4 sm:$0xff]  }
 0x4fb   : > { %5223 = vmatpush1.bf16.msra.mxu1 %v7398_v3  ;;  %v7525_v3 = vld [vmem:[%s8342_s11 + $0xd0] sm:$0xff]  }
 0x4fc   : > { %5224 = vmatprep.subr.bf16.mxu1 %v7403_v7  ;;  %v7526_v7 = vld [vmem:[%s8342_s11 + $0x90] sm:$0xff]  }
 0x4fd   : > { %6616 = vmatpush3.bf16.msra.mxu0 %v7524_v2  ;;  %v7464_v2 = vld [vmem:[%s8072_s10 + $0xed0] ss:$8 sps:$4 sm:$0xff]  }
 0x4fe   : > { %6617 = vmatprep.subr.bf16.mxu0 %v7525_v3 }
 0x4ff   : > { %5225 = vmatpush1.bf16.msra.mxu1 %v7401_v10  ;;  %v7439_v10 = vld [vmem:[%s8072_s10 + $0xe44] ss:$8 sps:$4 sm:$0xff]  }
 0x500   : > { %5226 = vmatprep.subr.bf16.mxu1 %v7406_v13  ;;  %v7437_v13 = vld [vmem:[%s8072_s10 + $0xe40] ss:$8 sps:$4 sm:$0xff]  }
 0x501   : > { %6618 = vmatpush3.bf16.msra.mxu0 %v7526_v7 }
 0x502   : > { %6619 = vmatprep.subr.bf16.mxu0 %v7527_v8 }
 0x503   : > { %5227 = vmatpush1.bf16.msra.mxu1 %v7404_v16  ;;  %v7531_v16 = vld [vmem:[%s8342_s11 + $0xe8] sm:$0xff]  }
 0x504   : > { %5228 = vmatprep.subr.bf16.mxu1 %v7409_v19  ;;  %v619_v19 = vld [vmem:[%s8070_s8 + $0xe0] sm:$0xff] }
 0x505   : > { %6620 = vmatpush3.bf16.msra.mxu0 %v7528_v11  ;;  %v3170_v24 = vrot.slane %v619_v19, 4 }
 0x506   : > { %6621 = vmatprep.subr.bf16.mxu0 %v7529_v12  ;;  %v7472_v12 = vld [vmem:[%s8072_s10 + $0xef4] ss:$8 sps:$4 sm:$0xff]  }
 0x507   : > { %5229 = vmatpush1.bf16.msra.mxu1 %v7407_v22  ;;  %v654_v22 = vld [vmem:[%s8070_s8 + $0x1f8] sm:$0xff]  ;;  %v3171_v30 = vadd.f32 %v3170_v24, %v619_v19  ;;  %v7481_v24 = vld [vmem:[%s8072_s10 + $0xf24] ss:$8 sps:$4 sm:$0xff]  }
 0x508   : > { %5230 = vmatprep.subr.bf16.mxu1 %v7412_v25  ;;  %v3266_v25 = vrot.slane %v651_v20, 4 }
 0x509   : > { %6622 = vmatpush3.bf16.msra.mxu0 %v7530_v15  ;;  %v3172_v36 = vrot.slane %v3171_v30, 2  ;;  %v7470_v15 = vld [vmem:[%s8072_s10 + $0xef0] ss:$8 sps:$4 sm:$0xff]  }
 0x50a   : > { %6623 = vmatprep.subr.bf16.mxu0 %v7531_v16 }
 0x50b   : > { %5231 = vmatpush1.bf16.msra.mxu1 %v7410_v28  ;;  %v3284_v28 = vrot.slane %v654_v22, 4  ;;  %v3173_v42 = vadd.f32 %v3172_v36, %v3171_v30  ;;  %v7490_v30 = vld [vmem:[%s8072_s10 + $0xf54] ss:$8 sps:$4 sm:$0xff]   ;;  %v3182_v36 = vrot.slane %v621_v33, 4 }
 0x50c   : > { %5232 = vmatprep.subr.bf16.mxu1 %v7415_v31  ;;  %v3267_v31 = vadd.f32 %v3266_v25, %v651_v20  ;;  %v7473_v20 = vld [vmem:[%s8072_s10 + $0xf00] ss:$8 sps:$4 sm:$0xff]  }
 0x50d   : > { %v3174_v48 = vrot.slane %v3173_v42, 1  ;;  %v7479_v25 = vld [vmem:[%s8072_s10 + $0xf20] ss:$8 sps:$4 sm:$0xff]  }
 0x50f   : > { %5233 = vmatpush1.bf16.msra.mxu1 %v7413_v34  ;;  %v3285_v34 = vadd.f32 %v3284_v28, %v654_v22  ;;  %v7478_v22 = vld [vmem:[%s8072_s10 + $0xf14] ss:$8 sps:$4 sm:$0xff]   ;;  %v7487_v28 = vld [vmem:[%s8072_s10 + $0xf44] ss:$8 sps:$4 sm:$0xff]  }
 0x510   : > { %5234 = vmatprep.subr.bf16.mxu1 %v7418_v37  ;;  %v3268_v37 = vrot.slane %v3267_v31, 2 }
 0x513   : > { %5235 = vmatpush1.bf16.msra.mxu1 %v7416_v40  ;;  %v3286_v40 = vrot.slane %v3285_v34, 2 }
 0x514   : > { %5236 = vmatprep.subr.bf16.mxu1 %v7421_v43  ;;  %v3269_v43 = vadd.f32 %v3268_v37, %v3267_v31  ;;  %v7488_v31 = vld [vmem:[%s8072_s10 + $0xf50] ss:$8 sps:$4 sm:$0xff]  }
 0x517   : > { %5237 = vmatpush1.bf16.msra.mxu1 %v7419_v46  ;;  %v3287_v46 = vadd.f32 %v3286_v40, %v3285_v34  ;;  %v653_v34 = vld [vmem:[%s8070_s8 + $0x1f0] sm:$0xff]  ;;  %v3183_v40 = vadd.f32 %v3182_v36, %v621_v33 }
 0x518   : > { %5238 = vmatprep.subr.bf16.mxu1 %v7424_v49  ;;  %v3270_v49 = vrot.slane %v3269_v43, 1  ;;  %v3278_v37 = vrot.slane %v653_v34, 4 }
 0x51a   : > { %v3271_v55 = vadd.f32 %v3270_v49, %v3269_v43  ;;  %v7497_v43 = vld [vmem:[%s8072_s10 + $0xf80] ss:$8 sps:$4 sm:$0xff]  }
 0x51b   : > { %5239 = vmatpush1.bf16.msra.mxu1 %v7422_v52  ;;  %v3288_v52 = vrot.slane %v3287_v46, 1 }
 0x51c   : > { %5249 = vmatprep.subr.bf16.mxu1 %v7427_v54  ;;  %v3175_v54 = vadd.f32 %v3174_v48, %v3173_v42  ;;  %v3318_v61 = vmul.f32 0.125, %v3271_v55  ;;  %v7499_v42 = vld [vmem:[%s8072_s10 + $0xf84] ss:$8 sps:$4 sm:$0xff]   ;;  %v7506_v55 = vld [vmem:[%s8072_s10 + $0xfb0] ss:$8 sps:$4 sm:$0xff]  }
 0x51e   : > { %5241 = vmatmul.mubr.bf16.vlgmr.msra.gmra.mrb[4].mxu1 %v3701_v56  ;;  %v7463_v56 = vld [vmem:[%s8072_s10 + $0xec4] ss:$8 sps:$4 sm:$0xff]   ;;  %v3302_v60 = vmul.f32 0.125, %v3175_v54  ;;  %v7508_v54 = vld [vmem:[%s8072_s10 + $0xfb4] ss:$8 sps:$4 sm:$0xff]  }
 0x51f   : > { %5250 = vmatpush1.bf16.msra.mxu1 %v7425_v57  ;;  %5281 = vmatprep.mubr.bf16.mxu1 %v3704_v58  ;;  %v3193_v57 = vadd.f32 %v3192_v51, %v3191_v45  ;;  %v3289_v58 = vadd.f32 %v3288_v52, %v3287_v46  ;;  %v7502_v46 = vld [vmem:[%s8072_s10 + $0xf94] ss:$8 sps:$4 sm:$0xff]   ;;  %v7503_v51 = vld [vmem:[%s8072_s10 + $0xfa0] ss:$8 sps:$4 sm:$0xff]  }
 0x520   : > { %5251 = vmatprep.subr.bf16.mxu1 %v7430_v59  ;;  %v7461_v59 = vld [vmem:[%s8072_s10 + $0xec0] ss:$8 sps:$4 sm:$0xff]   ;;  %v3334_v3 = vpack.c.bf16 %v3302_v60, %v3302_v60 }
 0x523   : > { %5252 = vmatpush1.bf16.msra.mxu1 %v7428_v63  ;;  %v3305_v63 = vmul.f32 0.125, %v3193_v57 }
 0x524   : > { %5253 = vmatprep.subr.bf16.mxu1 %v7433_v0  ;;  %v3321_v0 = vmul.f32 0.125, %v3289_v58  ;;  %v7511_v58 = vld [vmem:[%s8072_s10 + $0xfc4] ss:$8 sps:$4 sm:$0xff]  }
 0x525   : > { %v3337_v7 = vpack.c.bf16 %v3305_v63, %v3305_v63  ;;  %v7512_v63 = vld [vmem:[%s8072_s10 + $0xfd0] ss:$8 sps:$4 sm:$0xff]  }
 0x526   : > { %v3353_v8 = vpack.c.bf16 %v3321_v0, %v3321_v0 }
 0x527   : > { %5254 = vmatpush1.bf16.msra.mxu1 %v7431_v4  ;;  %v3350_v4 = vpack.c.bf16 %v3318_v61, %v3318_v61 }
 0x528   : > { %5255 = vmatprep.subr.bf16.mxu1 %v7436_v6  ;;  %v7469_v6 = vld [vmem:[%s8072_s10 + $0xee4] ss:$8 sps:$4 sm:$0xff]  }
 0x529   : > { %v3671_v11 = vunpack.c.l.b16 %v3350_v4  ;;  %v7515_v4 = vld [vmem:[%s8072_s10 + $0xfe0] ss:$8 sps:$4 sm:$0xff]  }
 0x52b   : > { %5256 = vmatpush1.bf16.msra.mxu1 %v7434_v9  ;;  %v7467_v9 = vld [vmem:[%s8072_s10 + $0xee0] ss:$8 sps:$4 sm:$0xff]  }
 0x52c   : > { %5257 = vmatprep.subr.bf16.mxu1 %v7439_v10  ;;  %v3655_v10 = vunpack.c.l.b16 %v3334_v3  ;;  %v7517_v3 = vld [vmem:[%s8072_s10 + $0xfe4] ss:$8 sps:$4 sm:$0xff]  }
 0x52e   : > { %v3687_v16 = vsel %vm1232_vm0, %v3671_v11, %v3655_v10 }
 0x52f   : > { %5258 = vmatpush1.bf16.msra.mxu1 %v7437_v13  ;;  %v3658_v13 = vunpack.c.l.b16 %v3337_v7  ;;  %v3703_v19 = vpack.c.b16 %v3687_v16, %v3687_v16  ;;  %v7536_v16 = vld [vmem:[%s8342_s11 + $0xb8] sm:$0xff]  }
 0x530   : > { %5259 = vmatprep.subr.bf16.mxu1 %v7442_v14  ;;  %v3674_v14 = vunpack.c.l.b16 %v3353_v8  ;;  %v7520_v8 = vld [vmem:[%s8072_s10 + $0xff4] ss:$8 sps:$4 sm:$0xff]  }
 0x533   : > { %5260 = vmatpush1.bf16.msra.mxu1 %v7440_v17  ;;  %v7475_v17 = vld [vmem:[%s8072_s10 + $0xf04] ss:$8 sps:$4 sm:$0xff]  }
 0x534   : > { %5261 = vmatprep.subr.bf16.mxu1 %v7445_v18  ;;  %v3690_v18 = vsel %vm1232_vm0, %v3674_v14, %v3658_v13  ;;  %v7533_v13 = vld [vmem:[%s8342_s11 + $0xf0] sm:$0xff]  }
 0x535   : > { %v3706_v21 = vpack.c.b16 %v3690_v18, %v3690_v18  ;;  %v7534_v14 = vld [vmem:[%s8342_s11 + $0xb0] sm:$0xff]   ;;  %v6527_v18 = vld [vmem:[%s8085_s21 + $0x2] sm:$0x3] }
 0x537   : > { %5262 = vmatpush1.bf16.msra.mxu1 %v7443_v23  ;;  %v7476_v23 = vld [vmem:[%s8072_s10 + $0xf10] ss:$8 sps:$4 sm:$0xff]  }
 0x538   : > { %5263 = vmatprep.subr.bf16.mxu1 %v7448_v26  ;;  %v7484_v26 = vld [vmem:[%s8072_s10 + $0xf34] ss:$8 sps:$4 sm:$0xff]  }
 0x53b   : > { %5264 = vmatpush1.bf16.msra.mxu1 %v7446_v29  ;;  %v7485_v29 = vld [vmem:[%s8072_s10 + $0xf40] ss:$8 sps:$4 sm:$0xff]  }
 0x53c   : > { %5265 = vmatprep.subr.bf16.mxu1 %v7451_v32  ;;  %v7493_v32 = vld [vmem:[%s8072_s10 + $0xf64] ss:$8 sps:$4 sm:$0xff]  }
 0x53f   : > { %5266 = vmatpush1.bf16.msra.mxu1 %v7449_v35  ;;  %v7491_v35 = vld [vmem:[%s8072_s10 + $0xf60] ss:$8 sps:$4 sm:$0xff]  }
 0x540   : > { %5267 = vmatprep.subr.bf16.mxu1 %v7454_v38  ;;  %v7496_v38 = vld [vmem:[%s8072_s10 + $0xf74] ss:$8 sps:$4 sm:$0xff]  }
 0x543   : > { %5268 = vmatpush1.bf16.msra.mxu1 %v7452_v41  ;;  %v3279_v41 = vadd.f32 %v3278_v37, %v653_v34 }
 0x544   : > { %5269 = vmatprep.subr.bf16.mxu1 %v7457_v44  ;;  %v3184_v44 = vrot.slane %v3183_v40, 2 }
 0x545   : > { %v3280_v45 = vrot.slane %v3279_v41, 2 }
 0x546   : > { %v3185_v48 = vadd.f32 %v3184_v44, %v3183_v40 }
 0x547   : > { %5270 = vmatpush1.bf16.msra.mxu1 %v7455_v47  ;;  %v7500_v47 = vld [vmem:[%s8072_s10 + $0xf90] ss:$8 sps:$4 sm:$0xff]   ;;  %v3281_v49 = vadd.f32 %v3280_v45, %v3279_v41 }
 0x548   : > { %5271 = vmatprep.subr.bf16.mxu1 %v7460_v50  ;;  %v7505_v50 = vld [vmem:[%s8072_s10 + $0xfa4] ss:$8 sps:$4 sm:$0xff]   ;;  %v3186_v52 = vrot.slane %v3185_v48, 1 }
 0x54b   : > { %5272 = vmatpush1.bf16.msra.mxu1 %v7458_v53  ;;  %v3282_v53 = vrot.slane %v3281_v49, 1 }
 0x54c   : > { %5273 = vmatprep.subr.bf16.mxu1 %v7463_v56  ;;  %v3187_v56 = vadd.f32 %v3186_v52, %v3185_v48 }
 0x54d   : > { %v3283_v57 = vadd.f32 %v3282_v53, %v3281_v49 }
 0x54e   : > { %v3304_v60 = vmul.f32 0.125, %v3187_v56 }
 0x54f   : > { %5274 = vmatpush1.bf16.msra.mxu1 %v7461_v59  ;;  %v7509_v59 = vld [vmem:[%s8072_s10 + $0xfc0] ss:$8 sps:$4 sm:$0xff]   ;;  %v3320_v61 = vmul.f32 0.125, %v3283_v57 }
 0x550   : > { %5275 = vmatprep.subr.bf16.mxu1 %v7466_v62  ;;  %v7514_v62 = vld [vmem:[%s8072_s10 + $0xfd4] ss:$8 sps:$4 sm:$0xff]   ;;  %v3336_v0 = vpack.c.bf16 %v3304_v60, %v3304_v60 }
 0x553   : > { %5276 = vmatpush1.bf16.msra.mxu1 %v7464_v2  ;;  %v3352_v2 = vpack.c.bf16 %v3320_v61, %v3320_v61 }
 0x554   : > { %5277 = vmatprep.subr.bf16.mxu1 %v7469_v6  ;;  %v3657_v6 = vunpack.c.l.b16 %v3336_v0 }
 0x555   : > { %v3673_v7 = vunpack.c.l.b16 %v3352_v2 }
 0x557   : > { %5278 = vmatpush1.bf16.msra.mxu1 %v7467_v9  ;;  %v7518_v9 = vld [vmem:[%s8072_s10 + $0xff0] ss:$8 sps:$4 sm:$0xff]   ;;  %v3689_v10 = vsel %vm1232_vm0, %v3673_v7, %v3657_v6 }
 0x558   : > { %5279 = vmatprep.subr.bf16.mxu1 %v7472_v12  ;;  %v3705_v11 = vpack.c.b16 %v3689_v10, %v3689_v10  ;;  %v7532_v12 = vld [vmem:[%s8342_s11 + $0xa8] sm:$0xff]  }
 0x559   : > { %6624 = vmatpush3.bf16.msra.mxu0 %v7532_v12 }
 0x55a   : > { %6625 = vmatprep.subr.bf16.mxu0 %v7533_v13 }
 0x55b   : > { %5280 = vmatpush1.bf16.msra.mxu1 %v7470_v15  ;;  %v7535_v15 = vld [vmem:[%s8342_s11 + $0xf8] sm:$0xff]  }
 0x55c   : > { %5290 = vmatprep.subr.bf16.mxu1 %v7475_v17  ;;  %v6526_v17 = vld [vmem:[%s8079_s20 + $0x2] sm:$0x3] }
 0x55d   : > { %6626 = vmatpush3.bf16.msra.mxu0 %v7534_v14 }
 0x55e   : > { %5282 = vmatmul.mubr.bf16.vlgmr.msra.gmra.mrb[4].mxu1 %v3703_v19  ;;  %6627 = vmatprep.subr.bf16.mxu0 %v7535_v15  ;;  %v5337_v19 = vrot.slane %v6526_v17, %v8425_v1 }
 0x55f   : > { %5291 = vmatpush1.bf16.msra.mxu1 %v7473_v20  ;;  %5322 = vmatprep.mubr.bf16.mxu1 %v3706_v21  ;;  %v5341_v20 = vrot.slane %v6526_v17, %v8428_v5  ;;  %v5352_v21 = vrot.slane %v6527_v18, %v8425_v1  ;;  %v6561_v1 = vld [vmem:[%s8087_s16 + $0x1] ss:$0 sm:$0xff] }
 0x560   : > { %5292 = vmatprep.subr.bf16.mxu1 %v7478_v22 }
 0x561   : > { %6628 = vmatpush3.bf16.msra.mxu0 %v7536_v16 }
 0x563   : > { %5293 = vmatpush1.bf16.msra.mxu1 %v7476_v23  ;;  %v5356_v23 = vrot.slane %v6527_v18, %v8428_v5 }
 0x564   : > { %5294 = vmatprep.subr.bf16.mxu1 %v7481_v24 }
 0x567   : > { %5295 = vmatpush1.bf16.msra.mxu1 %v7479_v25 }
 0x568   : > { %5296 = vmatprep.subr.bf16.mxu1 %v7484_v26 }
 0x56b   : > { %5297 = vmatpush1.bf16.msra.mxu1 %v7482_v27 }
 0x56c   : > { %5298 = vmatprep.subr.bf16.mxu1 %v7487_v28 }
 0x56f   : > { %5299 = vmatpush1.bf16.msra.mxu1 %v7485_v29 }
 0x570   : > { %5300 = vmatprep.subr.bf16.mxu1 %v7490_v30 }
 0x573   : > { %5301 = vmatpush1.bf16.msra.mxu1 %v7488_v31 }
 0x574   : > { %5302 = vmatprep.subr.bf16.mxu1 %v7493_v32 }
 0x577   : > { %5303 = vmatpush1.bf16.msra.mxu1 %v7491_v35 }
 0x578   : > { %5304 = vmatprep.subr.bf16.mxu1 %v7496_v38 }
 0x57b   : > { %5305 = vmatpush1.bf16.msra.mxu1 %v7494_v39 }
 0x57c   : > { %5306 = vmatprep.subr.bf16.mxu1 %v7499_v42 }
 0x57f   : > { %5307 = vmatpush1.bf16.msra.mxu1 %v7497_v43 }
 0x580   : > { %5308 = vmatprep.subr.bf16.mxu1 %v7502_v46 }
 0x583   : > { %5309 = vmatpush1.bf16.msra.mxu1 %v7500_v47 }
 0x584   : > { %5310 = vmatprep.subr.bf16.mxu1 %v7505_v50 }
 0x587   : > { %5311 = vmatpush1.bf16.msra.mxu1 %v7503_v51 }
 0x588   : > { %5312 = vmatprep.subr.bf16.mxu1 %v7508_v54 }
 0x58b   : > { %5313 = vmatpush1.bf16.msra.mxu1 %v7506_v55 }
 0x58c   : > { %5314 = vmatprep.subr.bf16.mxu1 %v7511_v58 }
 0x58f   : > { %5315 = vmatpush1.bf16.msra.mxu1 %v7509_v59 }
 0x590   : > { %5316 = vmatprep.subr.bf16.mxu1 %v7514_v62 }
 0x593   : > { %5317 = vmatpush1.bf16.msra.mxu1 %v7512_v63 }
 0x594   : > { %5318 = vmatprep.subr.bf16.mxu1 %v7517_v3 }
 0x597   : > { %5319 = vmatpush1.bf16.msra.mxu1 %v7515_v4 }
 0x598   : > { %5320 = vmatprep.subr.bf16.mxu1 %v7520_v8 }
 0x59b   : > { %5321 = vmatpush1.bf16.msra.mxu1 %v7518_v9 }
 0x59e   : > { %5323 = vmatmul.mubr.bf16.vlgmr.msra.gmra.mrb[4].mxu1 %v3705_v11 }
 0x671   : > { %v5324_v22 = vpop.f32.mrb[4].mxu1 }
 0x672   : > { %v5344_v24 = vmul.f32 %v5337_v19, %v5324_v22  ;;  %v5326_v25 = vpop.f32.mrb[5].mxu1 }
 0x673   : > { %v5345_v26 = vmul.f32 %v5341_v20, %v5326_v25  ;;  %v5328_v27 = vpop.f32.mrb[6].mxu1 }
 0x674   : > { %v5359_v28 = vadd.f32 %v5352_v21, %v5344_v24  ;;  %v5329_v29 = vpop.f32.mrb[7].mxu1 }
 0x675   : > { %v5360_v30 = vadd.f32 %v5356_v23, %v5345_v26 }
 0x676   : > { %v5361_v31 = vmax.f32 %v5359_v28, 0.0 }
 0x677   : > { %v5362_v32 = vmax.f32 %v5360_v30, 0.0 }
 0x678   : > { %v5363_v34 = vpack.c.bf16 %v5361_v31, %v5361_v31 }
 0x679   : > { %v5364_v33 = vpack.c.bf16 %v5362_v32, %v5362_v32 }
 0x67b   : > { %5534 = vmatprep.mubr.bf16.mxu0 %v5364_v33 }
 0x67c   : > { %5535 = vmatmul.mubr.bf16.vlgmr.msra.gmra.mrb[4].mxu0 %v5363_v34 }
 0x74f   : > { %v6629_v35 = vpop.f32.mrb[4].mxu0 }
 0x750   : > { %v6630_v36 = vpop.f32.mrb[5].mxu0 }
 0x751   : > { %v6631_v37 = vadd.f32 %v6630_v36, %v6629_v35  ;;  %v6632_v38 = vpop.f32.mrb[6].mxu0 }
 0x752   : > { %v6633_v5 = vpop.f32.mrb[7].mxu0 }
 0x753   : > { %v5537_v39 = vadd.f32 %v6631_v37, %v6561_v1 }
 0x755   : > { %6578 = vst.msk [vmem:[%s8572_s14 + $0x2] sm:$0x3] %vm3096_vm1, %v5537_v39 }
 0x756 PF: > { %p22_p6 = scmp.ge.s32.totalorder %s7760_s26, 4   ;;  %s8796_s21 = smov %s7683_s22 }
 0x757   : > { %s8797_s22 = smov %s7687_s23  ;;  %s8798_s23 = smov %s7770_s29 }
 0x758   : > { %s8799_s24 = smov %s7760_s26  ;;  %24 = sbr.rel (!%p22_p6) target bundleno = 10 (0xa), region = 161 }
 0x75f   :  { %5566 = vsyncpa [#allocation4], 1 }
 0x760   :  { %5568 = vsyncpa [#allocation4 + $0x1], 1 }
 0x761   :  { %5569 = vsyncpa [#allocation6], 1 }
 0x762   :  { %5571 = vsyncpa [#allocation6 + $0x1], 1 }
 0x763   :  { %5572 = vsyncpa [#allocation9], 1 }
 0x764   :  { %5574 = vsyncpa [#allocation9 + $0x1], 1 }

</bundles_post_ra>
